<compile_context>
chip_gen: v5e
topology: v5e:2x2
jax: 0.10.0
libtpu: 0.0.40
codegen_flags: <defaults>
</compile_context>

<pallas_src>
import jax
import jax.numpy as jnp
from jax.experimental import pallas as pl
from jax.experimental.pallas import tpu as pltpu

_LANE = 128


def _round_up(v, m):
    return (v + m - 1) // m * m


def _fold_bn(gamma, beta, mean, var, eps=1e-5):
    scale = gamma / jnp.sqrt(var + eps)
    bias = beta - mean * scale
    return scale, bias


# ---------------------------------------------------------------------------
# Pallas kernel
# ---------------------------------------------------------------------------
def _bottleneck_up_kernel(x_ref, w0_ref, b0_ref, w1_ref, b1_ref, o_ref, shifted_ref):
    _, H, W, Cp = x_ref.shape
    _, Hp, _, C3 = shifted_ref.shape          # Hp = H + 2, C3 = 3 * Crp
    Crp = C3 // 3

    xv = x_ref[...]                           # bf16 (1, H, W, Cp)

    # ---- block0: 1x1 conv == channel matmul (BN scale folded into w0), bias + SiLU.
    t = jnp.dot(xv.reshape(H * W, Cp), w0_ref[...],
                preferred_element_type=jnp.float32)
    t = t + b0_ref[...]
    t = t * jax.nn.sigmoid(t)                 # SiLU (sigmoid -> EUP slot, no divide)
    t = t.reshape(1, H, W, Crp).astype(jnp.bfloat16)

    # ---- scatter block0 output into the kw-pre-shifted im2col buffer.
    # Channel block kw (width Crp) holds the padded activation shifted by kw in W:
    #   shifted[h', w, kw*Crp + c] == pad[h', w + kw, c]   (pad has a 1-px zero border).
    # Border zeros are rewritten every step (see header note about "parallel" + scratch).
    z_row = jnp.zeros((1, 1, W, C3), jnp.bfloat16)
    shifted_ref[:, 0:1, :, :] = z_row                      # top padded row
    shifted_ref[:, Hp - 1:Hp, :, :] = z_row                # bottom padded row
    z_col = jnp.zeros((1, Hp, 1, Crp), jnp.bfloat16)
    shifted_ref[:, :, 0:1, 0:Crp] = z_col                  # kw=0: left zero column
    shifted_ref[:, :, W - 1:W, 2 * Crp:3 * Crp] = z_col    # kw=2: right zero column
    shifted_ref[:, 1:H + 1, 1:W, 0:Crp] = t[:, :, 0:W - 1, :]          # kw = 0
    shifted_ref[:, 1:H + 1, :, Crp:2 * Crp] = t                        # kw = 1
    shifted_ref[:, 1:H + 1, 0:W - 1, 2 * Crp:3 * Crp] = t[:, :, 1:W, :]  # kw = 2

    # ---- block1: 3x3 conv as 3 accumulating dots (K = 3*Crp), bias + SiLU.
    # LHS for tap-row kh is a cheap major-axis window of the pre-shifted buffer.
    acc = jnp.dot(shifted_ref[:, 0:H, :, :].reshape(H * W, C3), w1_ref[0],
                  preferred_element_type=jnp.float32)
    for kh in (1, 2):
        acc += jnp.dot(shifted_ref[:, kh:kh + H, :, :].reshape(H * W, C3),
                       w1_ref[kh], preferred_element_type=jnp.float32)
    y = acc + b1_ref[...]
    y = y * jax.nn.sigmoid(y)                 # SiLU

    # ---- residual add (f32) ----
    o_ref[...] = (y.reshape(1, H, W, Cp) + xv.astype(jnp.float32)).astype(o_ref.dtype)


# ---------------------------------------------------------------------------
# VMEM budget: derived from block sizes, capped below v7x physical VMEM.
# ---------------------------------------------------------------------------
def _vmem_limit_bytes(H, W, Cp, Crp):
    bf16, f32 = 2, 4
    act_blk = H * W * Cp * bf16                          # x / out block (bf16)
    weights = (Cp * Crp + 9 * Crp * Cp) * bf16 + (Crp + Cp) * f32
    scratch = (H + 2) * W * 3 * Crp * bf16               # kw-pre-shifted buffer
    temps = H * W * (Crp + 3 * Cp) * f32                 # t / acc / residual work set
    need = 2 * (2 * act_blk) + 2 * weights + scratch + temps
    return int(min(max(4 * need, 32 << 20), 48 << 20))   # headroom, <= 48 MiB (v7x safe)


# ---------------------------------------------------------------------------
# pallas_call wrapper (NHWC, channel-padded, bf16 activations)
# ---------------------------------------------------------------------------
def _bottleneck_up_pallas(x_pad, w0p, b0p, w1p, b1p):
    N, H, W, Cp = x_pad.shape
    Crp = w0p.shape[1]
    return pl.pallas_call(
        _bottleneck_up_kernel,
        out_shape=jax.ShapeDtypeStruct((N, H, W, Cp), x_pad.dtype),
        grid_spec=pltpu.PrefetchScalarGridSpec(
            num_scalar_prefetch=0,
            grid=(N,),
            in_specs=[
                pl.BlockSpec((1, H, W, Cp), lambda n: (n, 0, 0, 0)),   # x (bf16)
                pl.BlockSpec((Cp, Crp), lambda n: (0, 0)),             # w0 (bf16, BN folded)
                pl.BlockSpec((1, Crp), lambda n: (0, 0)),              # b0 (f32)
                pl.BlockSpec((3, 3 * Crp, Cp), lambda n: (0, 0, 0)),   # w1 per-kh (bf16)
                pl.BlockSpec((1, Cp), lambda n: (0, 0)),               # b1 (f32)
            ],
            out_specs=pl.BlockSpec((1, H, W, Cp), lambda n: (n, 0, 0, 0)),
            scratch_shapes=[pltpu.VMEM((1, H + 2, W, 3 * Crp), jnp.bfloat16)],
        ),
        compiler_params=pltpu.CompilerParams(
            dimension_semantics=("parallel",),            # batch axis -> megacore
            vmem_limit_bytes=_vmem_limit_bytes(H, W, Cp, Crp),
        ),
    )(x_pad, w0p, b0p, w1p, b1p)


# ---------------------------------------------------------------------------
# Parameter prep: fold BN into weights, pad channels to lane multiples, bf16 weights.
# ---------------------------------------------------------------------------
def _prepare_params(w0_oihw, gamma0, beta0, mean0, var0,
                    w1_oihw, gamma1, beta1, mean1, var1, eps=1e-5):
    Cr, C = w0_oihw.shape[0], w0_oihw.shape[1]
    Cp, Crp = _round_up(C, _LANE), _round_up(Cr, _LANE)

    s0, b0 = _fold_bn(gamma0, beta0, mean0, var0, eps)
    s1, b1 = _fold_bn(gamma1, beta1, mean1, var1, eps)

    # conv0 (1x1): torch (Cr, C, 1, 1) -> (C, Cr); BN scale folded per out-channel.
    w0 = jnp.transpose(w0_oihw[:, :, 0, 0], (1, 0)) * s0[None, :]
    w0p = jnp.zeros((Cp, Crp), jnp.float32).at[:C, :Cr].set(w0).astype(jnp.bfloat16)
    b0p = jnp.zeros((1, Crp), jnp.float32).at[0, :Cr].set(b0)

    # conv1 (3x3): torch (C, Cr, 3, 3) -> HWIO (3, 3, Cr, C); BN scale folded.
    w1 = jnp.transpose(w1_oihw, (2, 3, 1, 0)) * s1[None, None, None, :]
    w1p_hwio = (jnp.zeros((3, 3, Crp, Cp), jnp.float32)
                .at[:, :, :Cr, :C].set(w1).astype(jnp.bfloat16))
    w1p = w1p_hwio.reshape(3, 3 * Crp, Cp)    # per-kh matrices, rows = (kw, c_in)
    b1p = jnp.zeros((1, Cp), jnp.float32).at[0, :C].set(b1)

    return w0p, b0p, w1p, b1p, w1p_hwio, Cp, Crp


def bottleneck_up(x_nchw, w0_oihw, gamma0, beta0, mean0, var0,
                  w1_oihw, gamma1, beta1, mean1, var1, eps=1e-5):
    """PyTorch-layout (NCHW, f32) forward of BottleNeckUp (inference-mode BN).

    NOTE: the layout / channel-pad / bf16 conversions here are per-call convenience
    only; in a real network keep activations in channel-padded NHWC bf16 between layers
    and call _bottleneck_up_pallas directly (saves two extra HBM passes per call).
    """
    N, C, H, W = x_nchw.shape
    if W % 8:
        raise NotImplementedError("W must be a multiple of 8 (sublane tile) for this kernel")
    w0p, b0p, w1p, b1p, _, Cp, _ = _prepare_params(
        w0_oihw, gamma0, beta0, mean0, var0,
        w1_oihw, gamma1, beta1, mean1, var1, eps)
    x_nhwc = jnp.transpose(x_nchw, (0, 2, 3, 1)).astype(jnp.bfloat16)
    x_pad = jnp.zeros((N, H, W, Cp), jnp.bfloat16).at[..., :C].set(x_nhwc)
    out_pad = _bottleneck_up_pallas(x_pad, w0p, b0p, w1p, b1p)
    return jnp.transpose(out_pad[..., :C], (0, 3, 1, 2)).astype(x_nchw.dtype)


# ---------------------------------------------------------------------------
# Pure-JAX reference with matching precision (bf16 activations, f32 accumulation).
# ---------------------------------------------------------------------------
def _reference_nhwc(x_pad_bf16, w0p, b0p, w1p_hwio, b1p):
    dn = ('NHWC', 'HWIO', 'NHWC')
    Cp, Crp = w0p.shape
    t = jax.lax.conv_general_dilated(
        x_pad_bf16, w0p.reshape(1, 1, Cp, Crp), (1, 1), 'VALID',
        dimension_numbers=dn, preferred_element_type=jnp.float32)
    t = t + b0p
    t = t * jax.nn.sigmoid(t)
    y = jax.lax.conv_general_dilated(
        t.astype(jnp.bfloat16), w1p_hwio, (1, 1), ((1, 1), (1, 1)),
        dimension_numbers=dn, preferred_element_type=jnp.float32)
    y = y + b1p
    y = y * jax.nn.sigmoid(y)
    return (y + x_pad_bf16.astype(jnp.float32)).astype(jnp.bfloat16)


if __name__ == "__main__":
    # Small shapes: batch=2, in_channels=8 (reduced_channels=4), spatial 16x16.
    N, C, H, W = 2, 8, 16, 16
    Cr = C // 2

    key = jax.random.PRNGKey(0)
    keys = jax.random.split(key, 12)

    # PyTorch-convention NCHW input and OIHW weights.
    x_nchw = jax.random.normal(keys[0], (N, C, H, W), jnp.float32)
    w0_oihw = 0.2 * jax.random.normal(keys[1], (Cr, C, 1, 1), jnp.float32)
    w1_oihw = 0.2 * jax.random.normal(keys[2], (C, Cr, 3, 3), jnp.float32)

    # BatchNorm parameters (inference mode).
    gamma0 = 1.0 + 0.1 * jax.random.normal(keys[3], (Cr,), jnp.float32)
    beta0 = 0.1 * jax.random.normal(keys[4], (Cr,), jnp.float32)
    mean0 = 0.1 * jax.random.normal(keys[5], (Cr,), jnp.float32)
    var0 = 1.0 + 0.1 * jnp.abs(jax.random.normal(keys[6], (Cr,), jnp.float32))
    gamma1 = 1.0 + 0.1 * jax.random.normal(keys[7], (C,), jnp.float32)
    beta1 = 0.1 * jax.random.normal(keys[8], (C,), jnp.float32)
    mean1 = 0.1 * jax.random.normal(keys[9], (C,), jnp.float32)
    var1 = 1.0 + 0.1 * jnp.abs(jax.random.normal(keys[10], (C,), jnp.float32))

    # Run the Pallas kernel (NCHW in -> NCHW out).
    out_nchw = bottleneck_up(x_nchw, w0_oihw, gamma0, beta0, mean0, var0,
                             w1_oihw, gamma1, beta1, mean1, var1)
    out_nchw = jax.block_until_ready(out_nchw)
    assert out_nchw.shape == (N, C, H, W)

    # Reference with the same folded-BN / bf16-activation / f32-accumulate semantics.
    w0p, b0p, w1p, b1p, w1p_hwio, Cp, Crp = _prepare_params(
        w0_oihw, gamma0, beta0, mean0, var0,
        w1_oihw, gamma1, beta1, mean1, var1)
    x_nhwc = jnp.transpose(x_nchw, (0, 2, 3, 1)).astype(jnp.bfloat16)
    x_pad = jnp.zeros((N, H, W, Cp), jnp.bfloat16).at[..., :C].set(x_nhwc)
    ref_pad = jax.block_until_ready(_reference_nhwc(x_pad, w0p, b0p, w1p_hwio, b1p))
    ref_nchw = jnp.transpose(ref_pad[..., :C], (0, 3, 1, 2)).astype(jnp.float32)

    max_err = float(jnp.max(jnp.abs(out_nchw - ref_nchw)))
    assert jnp.allclose(out_nchw, ref_nchw, atol=5e-2, rtol=5e-2), max_err

    print("KERNEL_OK")
</pallas_src>

<mosaic_0001>
module attributes {stable_mosaic.version = 11 : i64} {
  func.func @_bottleneck_up_kernel(%arg0: i32, %arg1: memref<1x16x16x128xbf16, #tpu.memory_space<vmem>>, %arg2: memref<128x128xbf16, #tpu.memory_space<vmem>>, %arg3: memref<1x128xf32, #tpu.memory_space<vmem>>, %arg4: memref<3x384x128xbf16, #tpu.memory_space<vmem>>, %arg5: memref<1x128xf32, #tpu.memory_space<vmem>>, %arg6: memref<1x16x16x128xbf16, #tpu.memory_space<vmem>>, %arg7: memref<1x18x16x384xbf16, #tpu.memory_space<vmem>>) attributes {dimension_semantics = [#tpu.dimension_semantics<parallel>], iteration_bounds = array<i64: 2>, scalar_prefetch = 0 : i64, scratch_operands = 1 : i64, tpu.core_type = #tpu.core_type<tc>, window_params = [{transform_indices = @transform_0, window_bounds = array<i64: 1, 16, 16, 128>}, {pipeline_mode = #tpu.pipeline_mode<synchronous>, transform_indices = @transform_1, window_bounds = array<i64: 128, 128>}, {pipeline_mode = #tpu.pipeline_mode<synchronous>, transform_indices = @transform_2, window_bounds = array<i64: 1, 128>}, {pipeline_mode = #tpu.pipeline_mode<synchronous>, transform_indices = @transform_3, window_bounds = array<i64: 3, 384, 128>}, {pipeline_mode = #tpu.pipeline_mode<synchronous>, transform_indices = @transform_4, window_bounds = array<i64: 1, 128>}, {transform_indices = @transform_5, window_bounds = array<i64: 1, 16, 16, 128>}]} {
    %c0 = arith.constant 0 : index
    %c0_0 = arith.constant 0 : index
    %c0_1 = arith.constant 0 : index
    %c0_2 = arith.constant 0 : index
    %0 = vector.load %arg1[%c0, %c0_0, %c0_1, %c0_2] : memref<1x16x16x128xbf16, #tpu.memory_space<vmem>>, vector<1x16x16x128xbf16>
    %1 = vector.shape_cast %0 : vector<1x16x16x128xbf16> to vector<256x128xbf16>
    %c0_3 = arith.constant 0 : index
    %c0_4 = arith.constant 0 : index
    %2 = vector.load %arg2[%c0_3, %c0_4] : memref<128x128xbf16, #tpu.memory_space<vmem>>, vector<128x128xbf16>
    %cst = arith.constant dense<0.000000e+00> : vector<256x128xf32>
    %3 = tpu.matmul %1, %2, %cst {dimension_numbers = #tpu.dot_dimension_numbers<[1], [0], [0], [1], [0, 0, 1, 1], [], []>} : vector<256x128xbf16>, vector<128x128xbf16>, vector<256x128xf32> -> vector<256x128xf32>
    %c0_5 = arith.constant 0 : index
    %c0_6 = arith.constant 0 : index
    %4 = vector.load %arg3[%c0_5, %c0_6] : memref<1x128xf32, #tpu.memory_space<vmem>>, vector<1x128xf32>
    %5 = vector.broadcast %4 : vector<1x128xf32> to vector<256x128xf32>
    %6 = arith.addf %3, %5 : vector<256x128xf32>
    %7 = arith.negf %6 : vector<256x128xf32>
    %8 = math.exp %7 : vector<256x128xf32>
    %cst_7 = arith.constant 1.000000e+00 : f32
    %9 = vector.broadcast %cst_7 : f32 to vector<256x128xf32>
    %10 = arith.addf %9, %8 : vector<256x128xf32>
    %11 = arith.divf %9, %10 : vector<256x128xf32>
    %12 = arith.mulf %6, %11 : vector<256x128xf32>
    %13 = vector.shape_cast %12 : vector<256x128xf32> to vector<1x16x16x128xf32>
    %14 = arith.truncf %13 : vector<1x16x16x128xf32> to vector<1x16x16x128xbf16>
    %cst_8 = arith.constant 0.000000e+00 : bf16
    %15 = vector.broadcast %cst_8 : bf16 to vector<1x1x16x384xbf16>
    %c0_9 = arith.constant 0 : index
    %c0_10 = arith.constant 0 : index
    %c0_11 = arith.constant 0 : index
    %c0_12 = arith.constant 0 : index
    %16 = vector.load %arg7[%c0_9, %c0_10, %c0_11, %c0_12] : memref<1x18x16x384xbf16, #tpu.memory_space<vmem>>, vector<1x1x16x384xbf16>
    tpu.vector_store %arg7[%c0_9, %c0_10, %c0_11, %c0_12], %15 {strides = array<i32>} : memref<1x18x16x384xbf16, #tpu.memory_space<vmem>>, vector<1x1x16x384xbf16>,
    %c0_13 = arith.constant 0 : index
    %c17 = arith.constant 17 : index
    %c0_14 = arith.constant 0 : index
    %c0_15 = arith.constant 0 : index
    %17 = vector.load %arg7[%c0_13, %c17, %c0_14, %c0_15] : memref<1x18x16x384xbf16, #tpu.memory_space<vmem>>, vector<1x1x16x384xbf16>
    tpu.vector_store %arg7[%c0_13, %c17, %c0_14, %c0_15], %15 {strides = array<i32>} : memref<1x18x16x384xbf16, #tpu.memory_space<vmem>>, vector<1x1x16x384xbf16>,
    %cst_16 = arith.constant 0.000000e+00 : bf16
    %18 = vector.broadcast %cst_16 : bf16 to vector<1x18x1x128xbf16>
    %c0_17 = arith.constant 0 : index
    %c0_18 = arith.constant 0 : index
    %c0_19 = arith.constant 0 : index
    %c0_20 = arith.constant 0 : index
    %19 = vector.load %arg7[%c0_17, %c0_18, %c0_19, %c0_20] : memref<1x18x16x384xbf16, #tpu.memory_space<vmem>>, vector<1x18x1x128xbf16>
    tpu.vector_store %arg7[%c0_17, %c0_18, %c0_19, %c0_20], %18 {strides = array<i32>} : memref<1x18x16x384xbf16, #tpu.memory_space<vmem>>, vector<1x18x1x128xbf16>,
    %c0_21 = arith.constant 0 : index
    %c0_22 = arith.constant 0 : index
    %c15 = arith.constant 15 : index
    %c256 = arith.constant 256 : index
    %20 = vector.load %arg7[%c0_21, %c0_22, %c15, %c256] : memref<1x18x16x384xbf16, #tpu.memory_space<vmem>>, vector<1x18x1x128xbf16>
    tpu.vector_store %arg7[%c0_21, %c0_22, %c15, %c256], %18 {strides = array<i32>} : memref<1x18x16x384xbf16, #tpu.memory_space<vmem>>, vector<1x18x1x128xbf16>,
    %21 = vector.extract_strided_slice %14 {offsets = [0, 0, 0, 0], sizes = [1, 16, 15, 128], strides = [1, 1, 1, 1]} : vector<1x16x16x128xbf16> to vector<1x16x15x128xbf16>
    %c0_23 = arith.constant 0 : index
    %c1 = arith.constant 1 : index
    %c1_24 = arith.constant 1 : index
    %c0_25 = arith.constant 0 : index
    %22 = vector.load %arg7[%c0_23, %c1, %c1_24, %c0_25] : memref<1x18x16x384xbf16, #tpu.memory_space<vmem>>, vector<1x16x15x128xbf16>
    tpu.vector_store %arg7[%c0_23, %c1, %c1_24, %c0_25], %21 {strides = array<i32>} : memref<1x18x16x384xbf16, #tpu.memory_space<vmem>>, vector<1x16x15x128xbf16>,
    %c0_26 = arith.constant 0 : index
    %c1_27 = arith.constant 1 : index
    %c0_28 = arith.constant 0 : index
    %c128 = arith.constant 128 : index
    %23 = vector.load %arg7[%c0_26, %c1_27, %c0_28, %c128] : memref<1x18x16x384xbf16, #tpu.memory_space<vmem>>, vector<1x16x16x128xbf16>
    tpu.vector_store %arg7[%c0_26, %c1_27, %c0_28, %c128], %14 {strides = array<i32>} : memref<1x18x16x384xbf16, #tpu.memory_space<vmem>>, vector<1x16x16x128xbf16>,
    %24 = vector.extract_strided_slice %14 {offsets = [0, 0, 1, 0], sizes = [1, 16, 15, 128], strides = [1, 1, 1, 1]} : vector<1x16x16x128xbf16> to vector<1x16x15x128xbf16>
    %c0_29 = arith.constant 0 : index
    %c1_30 = arith.constant 1 : index
    %c0_31 = arith.constant 0 : index
    %c256_32 = arith.constant 256 : index
    %25 = vector.load %arg7[%c0_29, %c1_30, %c0_31, %c256_32] : memref<1x18x16x384xbf16, #tpu.memory_space<vmem>>, vector<1x16x15x128xbf16>
    tpu.vector_store %arg7[%c0_29, %c1_30, %c0_31, %c256_32], %24 {strides = array<i32>} : memref<1x18x16x384xbf16, #tpu.memory_space<vmem>>, vector<1x16x15x128xbf16>,
    %c0_33 = arith.constant 0 : index
    %c0_34 = arith.constant 0 : index
    %c0_35 = arith.constant 0 : index
    %c0_36 = arith.constant 0 : index
    %26 = vector.load %arg7[%c0_33, %c0_34, %c0_35, %c0_36] : memref<1x18x16x384xbf16, #tpu.memory_space<vmem>>, vector<1x16x16x384xbf16>
    %27 = vector.shape_cast %26 : vector<1x16x16x384xbf16> to vector<256x384xbf16>
    %c0_37 = arith.constant 0 : index
    %c0_38 = arith.constant 0 : index
    %c0_39 = arith.constant 0 : index
    %28 = vector.load %arg4[%c0_37, %c0_38, %c0_39] : memref<3x384x128xbf16, #tpu.memory_space<vmem>>, vector<1x384x128xbf16>
    %29 = vector.shape_cast %28 : vector<1x384x128xbf16> to vector<384x128xbf16>
    %cst_40 = arith.constant dense<0.000000e+00> : vector<256x128xf32>
    %30 = tpu.matmul %27, %29, %cst_40 {dimension_numbers = #tpu.dot_dimension_numbers<[1], [0], [0], [1], [0, 0, 1, 1], [], []>} : vector<256x384xbf16>, vector<384x128xbf16>, vector<256x128xf32> -> vector<256x128xf32>
    %c0_41 = arith.constant 0 : index
    %c1_42 = arith.constant 1 : index
    %c0_43 = arith.constant 0 : index
    %c0_44 = arith.constant 0 : index
    %31 = vector.load %arg7[%c0_41, %c1_42, %c0_43, %c0_44] : memref<1x18x16x384xbf16, #tpu.memory_space<vmem>>, vector<1x16x16x384xbf16>
    %32 = vector.shape_cast %31 : vector<1x16x16x384xbf16> to vector<256x384xbf16>
    %c1_45 = arith.constant 1 : index
    %c0_46 = arith.constant 0 : index
    %c0_47 = arith.constant 0 : index
    %33 = vector.load %arg4[%c1_45, %c0_46, %c0_47] : memref<3x384x128xbf16, #tpu.memory_space<vmem>>, vector<1x384x128xbf16>
    %34 = vector.shape_cast %33 : vector<1x384x128xbf16> to vector<384x128xbf16>
    %cst_48 = arith.constant dense<0.000000e+00> : vector<256x128xf32>
    %35 = tpu.matmul %32, %34, %cst_48 {dimension_numbers = #tpu.dot_dimension_numbers<[1], [0], [0], [1], [0, 0, 1, 1], [], []>} : vector<256x384xbf16>, vector<384x128xbf16>, vector<256x128xf32> -> vector<256x128xf32>
    %36 = arith.addf %30, %35 : vector<256x128xf32>
    %c0_49 = arith.constant 0 : index
    %c2 = arith.constant 2 : index
    %c0_50 = arith.constant 0 : index
    %c0_51 = arith.constant 0 : index
    %37 = vector.load %arg7[%c0_49, %c2, %c0_50, %c0_51] : memref<1x18x16x384xbf16, #tpu.memory_space<vmem>>, vector<1x16x16x384xbf16>
    %38 = vector.shape_cast %37 : vector<1x16x16x384xbf16> to vector<256x384xbf16>
    %c2_52 = arith.constant 2 : index
    %c0_53 = arith.constant 0 : index
    %c0_54 = arith.constant 0 : index
    %39 = vector.load %arg4[%c2_52, %c0_53, %c0_54] : memref<3x384x128xbf16, #tpu.memory_space<vmem>>, vector<1x384x128xbf16>
    %40 = vector.shape_cast %39 : vector<1x384x128xbf16> to vector<384x128xbf16>
    %cst_55 = arith.constant dense<0.000000e+00> : vector<256x128xf32>
    %41 = tpu.matmul %38, %40, %cst_55 {dimension_numbers = #tpu.dot_dimension_numbers<[1], [0], [0], [1], [0, 0, 1, 1], [], []>} : vector<256x384xbf16>, vector<384x128xbf16>, vector<256x128xf32> -> vector<256x128xf32>
    %42 = arith.addf %36, %41 : vector<256x128xf32>
    %c0_56 = arith.constant 0 : index
    %c0_57 = arith.constant 0 : index
    %43 = vector.load %arg5[%c0_56, %c0_57] : memref<1x128xf32, #tpu.memory_space<vmem>>, vector<1x128xf32>
    %44 = vector.broadcast %43 : vector<1x128xf32> to vector<256x128xf32>
    %45 = arith.addf %42, %44 : vector<256x128xf32>
    %46 = arith.negf %45 : vector<256x128xf32>
    %47 = math.exp %46 : vector<256x128xf32>
    %cst_58 = arith.constant 1.000000e+00 : f32
    %48 = vector.broadcast %cst_58 : f32 to vector<256x128xf32>
    %49 = arith.addf %48, %47 : vector<256x128xf32>
    %50 = arith.divf %48, %49 : vector<256x128xf32>
    %51 = arith.mulf %45, %50 : vector<256x128xf32>
    %52 = vector.shape_cast %51 : vector<256x128xf32> to vector<1x16x16x128xf32>
    %53 = arith.extf %0 : vector<1x16x16x128xbf16> to vector<1x16x16x128xf32>
    %54 = arith.addf %52, %53 : vector<1x16x16x128xf32>
    %55 = arith.truncf %54 : vector<1x16x16x128xf32> to vector<1x16x16x128xbf16>
    %c0_59 = arith.constant 0 : index
    %c0_60 = arith.constant 0 : index
    %c0_61 = arith.constant 0 : index
    %c0_62 = arith.constant 0 : index
    %56 = vector.load %arg6[%c0_59, %c0_60, %c0_61, %c0_62] : memref<1x16x16x128xbf16, #tpu.memory_space<vmem>>, vector<1x16x16x128xbf16>
    tpu.vector_store %arg6[%c0_59, %c0_60, %c0_61, %c0_62], %55 {strides = array<i32>} : memref<1x16x16x128xbf16, #tpu.memory_space<vmem>>, vector<1x16x16x128xbf16>,
    return
  }
  func.func @transform_0(%arg0: i32) -> (i32, i32, i32, i32) {
    %c0_i32 = arith.constant 0 : i32
    %c0_i32_0 = arith.constant 0 : i32
    %c0_i32_1 = arith.constant 0 : i32
    %c0_i32_2 = arith.constant 0 : i32
    return %arg0, %c0_i32, %c0_i32_0, %c0_i32_1 : i32, i32, i32, i32
  }
  func.func @transform_1(%arg0: i32) -> (i32, i32) {
    %c0_i32 = arith.constant 0 : i32
    %c0_i32_0 = arith.constant 0 : i32
    %c0_i32_1 = arith.constant 0 : i32
    return %c0_i32, %c0_i32_0 : i32, i32
  }
  func.func @transform_2(%arg0: i32) -> (i32, i32) {
    %c0_i32 = arith.constant 0 : i32
    %c0_i32_0 = arith.constant 0 : i32
    %c0_i32_1 = arith.constant 0 : i32
    return %c0_i32, %c0_i32_0 : i32, i32
  }
  func.func @transform_3(%arg0: i32) -> (i32, i32, i32) {
    %c0_i32 = arith.constant 0 : i32
    %c0_i32_0 = arith.constant 0 : i32
    %c0_i32_1 = arith.constant 0 : i32
    %c0_i32_2 = arith.constant 0 : i32
    return %c0_i32, %c0_i32_0, %c0_i32_1 : i32, i32, i32
  }
  func.func @transform_4(%arg0: i32) -> (i32, i32) {
    %c0_i32 = arith.constant 0 : i32
    %c0_i32_0 = arith.constant 0 : i32
    %c0_i32_1 = arith.constant 0 : i32
    return %c0_i32, %c0_i32_0 : i32, i32
  }
  func.func @transform_5(%arg0: i32) -> (i32, i32, i32, i32) {
    %c0_i32 = arith.constant 0 : i32
    %c0_i32_0 = arith.constant 0 : i32
    %c0_i32_1 = arith.constant 0 : i32
    %c0_i32_2 = arith.constant 0 : i32
    return %arg0, %c0_i32, %c0_i32_0, %c0_i32_1 : i32, i32, i32, i32
  }
}

</mosaic_0001>

<bundles_post_ra>
// kernel: tpu_custom_call.1
= control target key start
LH: loop header
LB: loop body
LE: loop exit
PB: predicated region body
PF: predicated region fallthrough
CT: control target
= control target key end

     0   :  { %10 = vsyncpa [#allocation4], 0  ;;  %s9553_s0 = inlined_call_operand.hbm [shape: bf16[2,16,16,128], index: 0, kind: input, shape index: {}]   ;;  %s9554_s1 = inlined_call_operand.hbm [shape: bf16[128,128], index: 1, kind: input, shape index: {}]   ;;  %s9555_s2 = inlined_call_operand.vmem [shape: f32[1,128], index: 2, kind: input, shape index: {}]   ;;  %s9556_s3 = inlined_call_operand.hbm [shape: bf16[3,384,128], index: 3, kind: input, shape index: {}]   ;;  %s9557_s4 = inlined_call_operand.vmem [shape: f32[1,128], index: 4, kind: input, shape index: {}]   ;;  %s9558_s5 = inlined_call_operand.hbm [shape: bf16[2,16,16,128], index: 5, kind: output, shape index: {}]  }
   0x1   :  { %12 = vsyncpa [#allocation4 + $0x1], 0 }
   0x2   :  { %13 = vsyncpa [#allocation7], 0 }
   0x3   :  { %14 = vsyncpa [#allocation5], 0 }
   0x4   :  { %16 = vsyncpa [#allocation5 + $0x1], 0  ;;  %s7204_s18 = smov 0   ;;  %s7206_s19 = smov 0  }
   0x5   :  { %s7208_s20 = smov 0   ;;  %s7210_s21 = smov 0  }
   0x6 LB: > { %s7225_s22 = sadd.s32 4294967295, %s7165_s21   ;;  %s5277_s23 = sadd.s32 4294967294, %s7165_s21   ;;  %s7165_s21 = sphi %s7210_s21, %s9824_s21   ;;  %s7161_s20 = sphi %s7208_s20, %s9823_s20   ;;  %s7157_s19 = sphi %s7206_s19, %s9822_s19   ;;  %s7153_s18 = sphi %s7204_s18, %s9821_s18  }
   0x7   : > { %p42_p0 = scmp.ne.s32.totalorder %s7157_s19, %s7153_s18  ;;  %p43_p1 = scmp.eq.s32.totalorder %s7225_s22, 0 }
   0x8   : > { %p150_p2 = scmp.eq.s32.totalorder %s7225_s22, 1  ;;  %p156_p3 = scmp.eq.s32.totalorder %s5277_s23, 1 }
   0x9   : > { %p7234_p4 = por %p43_p1, %p42_p0  ;;  %p5278_p5 = scmp.ge.s32.totalorder %s7165_s21, 1 }
   0xa   : > { %p7239_p6 = por %p156_p3, %p42_p0  ;;  %p163_p7 = scmp.lt.s32.totalorder %s7165_s21, 3 }
   0xb   : > { %s174_s28 = sshll.u32 %s9554_s1, 4  ;;  %s7167_s30 = smov [#allocation6]   ;;  %s175_s28 = int_to_ptr.hbm [resolvable:$true] %s174_s28 }
   0xc   : > { %p7247_p8 = pnand %p5278_p5, %p163_p7  ;;  %s176_s6 = sshll.u32 %s7167_s30, 4  ;;  %s177_s6 = int_to_ptr.vmem [resolvable:$true] %s176_s6 }
   0xd   : > { %s191_s9 = sshll.u32 %s9556_s3, 4  ;;  %s9559_s10 = smov 64   ;;  %s192_s9 = int_to_ptr.hbm [resolvable:$true] %s191_s9 }
   0xe   : > { %p6684_p9 = pneg %p7247_p8  ;;  %s7169_s11 = smov 4  }
   0xf   : > { %s7170_s12 = smov [#allocation8]   ;;  %s7266_s14 = sadd.s32 1, %s7165_s21  }
  0x10   : > { %p6685_p10 = pnand %p6684_p9, %p43_p1  ;;  %s193_s13 = sshll.u32 %s7170_s12, 4  ;;  %s194_s13 = int_to_ptr.vmem [resolvable:$true] %s193_s13 }
  0x11   : > { %s29_s15 = sadd.s32 1, %s7161_s20  ;;  %s26_s16 = ssub.s32 %s7165_s21, %s7266_s14 }
  0x12   : > { %6687 = dma.hbm_to_vmem [thread:$0]  (!%p6685_p10), %s175_s28, 1024, %s177_s6, [#allocation7], %s9559_s10, %s9559_s10, %s7169_s11  }
  0x13   : > { %6690 = dma.hbm_to_vmem [thread:$0]  (!%p6685_p10), %s192_s9, 9216, %s194_s13, [#allocation7], %s9559_s10, %s9559_s10, %s7169_s11  }
  0x14   : > { %p36_p12 = scmp.ne.s32.totalorder %s7161_s20, %s7157_s19  ;;  %p27_p13 = scmp.eq.s32.totalorder %s26_s16, 0 }
  0x15   : > { %p37_p0 = scmp.eq.s32.totalorder %s7165_s21, 0  ;;  %p6701_p5 = scmp.lt.s32.totalorder %s7165_s21, 2 }
  0x16   : > { %p7276_p3 = por %p150_p2, %p36_p12  ;;  %s210_s26 = sand.u32 1, %s7161_s20  }
  0x17   : > { %s7282_s23 = scalar_select %p27_p13, %s7161_s20, %s29_s15  }
  0x18   : > { %p38_p7 = por %p37_p0, %p36_p12  ;;  %s5282_s27 = sshll.u32 %s210_s26, 7 }
  0x19   : > { %s6319_s28 = sshll.u32 %s7165_s21, 7  ;;  %s214_s8 = scalar_lea.vmem [#allocation3], %s5282_s27 }
  0x1a   : > { %s219_s7 = scalar_lea.hbm %s9553_s0, %s6319_s28  ;;  %s222_s9 = sshll.u32 %s214_s8, 4  ;;  %s223_s9 = int_to_ptr.vmem [resolvable:$true] %s222_s9 }
  0x1b   : > { %s220_s12 = sshll.u32 %s219_s7, 4  ;;  %p7289_p2 = pnand %p6701_p5, %p38_p7  ;;  %s221_s12 = int_to_ptr.hbm [resolvable:$true] %s220_s12 }
  0x1c   : > { %s211_s15 = scalar_lea.sflag [#allocation4], %s210_s26  ;;  %s7065_s16 = sshra.s32 %s221_s12, 4  ;;  %s7066_s16 = int_to_ptr.hbm [resolvable:$true] %s7065_s16 }
  0x1d   : > { %s7067_s10 = scalar_lea.hbm %s7066_s16, 128  ;;  %p7069_p10 = pneg %p7289_p2 }
  0x1e   : > { %p7068_p9 = scmp.ne.s32.totalorder %s7066_s16, %s7067_s10  ;;  %s7072_s30 = scalar_lea.hbm %s9553_s0, 256 }
  0x1f   : > { %p7073_p0 = scmp.lt.s32.totalorder %s7066_s16, %s9553_s0  ;;  %p7074_p5 = scmp.lt.s32.totalorder %s7072_s30, %s7067_s10 }
  0x20   : > { %p7070_p12 = pnand %p7069_p10, %p7068_p9 }
  0x21   : > { %p7075_p7 = por %p7074_p5, %p7073_p0 }
  0x22   : > { %p7071_p13 = pneg %p7070_p12 }
  0x24   : > { %p7076_p11 = pnand %p7075_p7, %p7071_p13 }
  0x26   : > { %7079 = shalt.err (!%p7076_p11)
}
  0x27   : > { %s9568_s26 = smov 64   ;;  %234 = sbr.rel (%p7247_p8) target bundleno = 1220 (0x4c4), region = 40 }
  0x28   : > { %6694 = dma.hbm_to_vmem [thread:$0]  (!%p7289_p2), %s221_s12, 2048, %s223_s9, %s211_s15, %s9568_s26, %s9568_s26, %s7169_s11  }
  0x2c   : > { %s7309_s8 = sand.u32 1, %s7157_s19  }
  0x2d   : > { %s5286_s10 = sshll.u32 %s7309_s8, 7  ;;  %s237_s16 = scalar_lea.sflag [#allocation4], %s7309_s8 }
  0x2e   : > { %s7315_s28 = scalar_lea.vmem [#allocation3], %s5286_s10 }
  0x2f   : > { %7140 = dma.done.wait (%p7234_p4), %s237_s16, 2048  }
  0x30   : > { %7142 = vsyncadd (%p7234_p4), %s237_s16, 4294965248 }
  0x31   : > { %7144 = dma.done.wait (%p43_p1), [#allocation7], 10240  }
  0x32   : > { %7146 = vsyncadd (%p43_p1), [#allocation7], 4294957056  ;;  %v6343_v0 = vld [vmem:[#allocation6 + $0x38] sm:$0xff]  ;;  %v6342_v1 = vld [vmem:[#allocation6 + $0x30] sm:$0xff]  ;;  %vm1245_vm0 = vcmask 1040384   ;;  %v9569_v28 = vmov 0 }
  0x33   : > { %475 = vmatpush.bf16.msra.mxu0 %v6343_v0  ;;  %6656 = vmatpush.bf16.msra.mxu2 %v6343_v0  ;;  %v6341_v2 = vld [vmem:[#allocation6 + $0x28] sm:$0xff]  ;;  %v6340_v3 = vld [vmem:[#allocation6 + $0x20] sm:$0xff]  ;;  %v6339_v4 = vld [vmem:[#allocation6 + $0x18] sm:$0xff]  ;;  %vm9560_vm1 = vsmask.f32 256  ;;  %vm1302_vm3 = vcmask 1043459  }
  0x34   : > { %v6338_v5 = vld [vmem:[#allocation6 + $0x10] sm:$0xff]  ;;  %v6337_v6 = vld [vmem:[#allocation6 + $0x8] sm:$0xff]  ;;  %v6336_v7 = vld [vmem:[#allocation6] sm:$0xff]  ;;  %vm1303_vm4 = vsmask.f32 7950  ;;  %v9572_v47 = vmov 0 }
  0x35   : > { %v6320_v8 = vld [vmem:[%s7315_s28] sm:$0xff]  ;;  %v6321_v10 = vld [vmem:[%s7315_s28 + $0x8] sm:$0xff]  ;;  %v6322_v12 = vld [vmem:[%s7315_s28 + $0x10] sm:$0xff]  ;;  %vm1650_vm11 = vcmask 1043456   ;;  %vm1651_vm12 = vsmask.f32 7938 }
  0x36   : > { %v6328_v9 = vld [vmem:[%s7315_s28 + $0x40] sm:$0xff]  ;;  %v6329_v11 = vld [vmem:[%s7315_s28 + $0x48] sm:$0xff]  ;;  %v6330_v13 = vld [vmem:[%s7315_s28 + $0x50] sm:$0xff]  ;;  %s9060_s30 = scalar_lea.vmem [#allocation9], %s5286_s10  ;;  %s6560_s26 = sshll.u32 %s7225_s22, 7 }
  0x37   : > { %476 = vmatpush.bf16.msra.mxu0 %v6342_v1  ;;  %6657 = vmatpush.bf16.msra.mxu2 %v6342_v1  ;;  %v6323_v14 = vld [vmem:[%s7315_s28 + $0x18] sm:$0xff]  ;;  %v6324_v16 = vld [vmem:[%s7315_s28 + $0x20] sm:$0xff]  ;;  %v6325_v18 = vld [vmem:[%s7315_s28 + $0x28] sm:$0xff]  ;;  %s5181_s24 = scalar_lea.hbm %s9558_s5, %s6560_s26  ;;  %s5182_s22 = sshll.u32 %s9060_s30, 4  ;;  %s5183_s22 = int_to_ptr.vmem [resolvable:$true] %s5182_s22 }
  0x38   : > { %v6331_v15 = vld [vmem:[%s7315_s28 + $0x58] sm:$0xff]  ;;  %v6332_v17 = vld [vmem:[%s7315_s28 + $0x60] sm:$0xff]  ;;  %v6333_v19 = vld [vmem:[%s7315_s28 + $0x68] sm:$0xff]  ;;  %s5170_s29 = scalar_lea.sflag [#allocation5], %s7309_s8  ;;  %s7115_s15 = scalar_lea.hbm %s9558_s5, 256 }
  0x39   : > { %v6326_v20 = vld [vmem:[%s7315_s28 + $0x30] sm:$0xff]  ;;  %v6399_v22 = vld [vmem:[#allocation8 + $0x38] sm:$0xff]  ;;  %v6397_v26 = vld [vmem:[#allocation8 + $0x28] sm:$0xff] }
  0x3a   : > { %v6334_v21 = vld [vmem:[%s7315_s28 + $0x70] sm:$0xff]  ;;  %v6327_v23 = vld [vmem:[%s7315_s28 + $0x38] sm:$0xff]  ;;  %vm7347_vm2 = vmand %vm1245_vm0, %vm9560_vm1  ;;  %vm1359_vm1 = vsmask.f32 4368 }
  0x3b   : > { %477 = vmatpush.bf16.msra.mxu0 %v6341_v2  ;;  %6658 = vmatpush.bf16.msra.mxu2 %v6341_v2  ;;  %v6335_v24 = vld [vmem:[%s7315_s28 + $0x78] sm:$0xff]  ;;  %v6398_v25 = vld [vmem:[#allocation8 + $0x30] sm:$0xff]  ;;  %v9570_v28 = vsel %vm7347_vm2, 4294967295, %v9569_v28  ;;  %v1251_v29 = vld [vmem:[#allocation2 + $0x18] sm:$0x1] }
  0x3c   : > { %v7344_v27 = vld [vmem:[%s9555_s2] ss:$0 sm:$0xff]  ;;  %9571 = vst [vmem:[#allocation13_spill] sm:$0xff] %v9570_v28  ;;  %v1252_v31 = vsel %vm7347_vm2, 0, %v1251_v29  ;;  %v6479_v33 = vld [vmem:[#allocation8 + $0x138] sm:$0xff]  ;;  %v6396_v42 = vld [vmem:[#allocation8 + $0x20] sm:$0xff] }
  0x3d   : > { %1253 = vst [vmem:[#allocation2 + $0x18] sm:$0x1] %v1252_v31  ;;  %v1275_v35 = vld [vmem:[#allocation2 + $0xd8] sm:$0x1]  ;;  %v6478_v43 = vld [vmem:[#allocation8 + $0x130] sm:$0xff]  ;;  %vm7367_vm5 = vmand %vm1302_vm3, %vm1303_vm4 }
  0x3e   : > { %v1276_v37 = vsel %vm7347_vm2, 0, %v1275_v35  ;;  %v9573_v47 = vsel %vm7367_vm5, 4294967295, %v9572_v47  ;;  %v1308_v48 = vld [vmem:[#allocation2 + $0x2c] sm:$0x8]  ;;  %v1254_v60 = vld [vmem:[#allocation2 + $0x30] sm:$0x1] }
  0x3f   : > { %478 = vmatpush.bf16.msra.mxu0 %v6340_v3  ;;  %6659 = vmatpush.bf16.msra.mxu2 %v6340_v3  ;;  %1277 = vst [vmem:[#allocation2 + $0xd8] sm:$0x1] %v1276_v37  ;;  %v1309_v49 = vsel %vm7367_vm5, 0, %v1308_v48  ;;  %v6471_v50 = vld [vmem:[#allocation8 + $0xf8] sm:$0xff]  ;;  %v1255_v0 = vsel %vm7347_vm2, 0, %v1254_v60  ;;  %v6476_v48 = vld [vmem:[#allocation8 + $0x120] sm:$0xff] }
  0x40   : > { %9574 = vst [vmem:[#allocation14_spill] sm:$0xff] %v9573_v47  ;;  %v6395_v51 = vld [vmem:[#allocation8 + $0x18] sm:$0xff]  ;;  %2618 = vmatpush.bf16.msra.mxu1 %v6471_v50  ;;  %6664 = vmatpush.bf16.msra.mxu3 %v6471_v50 }
  0x41   : > { %1310 = vst [vmem:[#allocation2 + $0x2c] sm:$0x8] %v1309_v49  ;;  %v1332_v59 = vld [vmem:[#allocation2 + $0xec] sm:$0x8] }
  0x42   : > { %v1333_v62 = vsel %vm7367_vm5, 0, %v1332_v59  ;;  %1256 = vst [vmem:[#allocation2 + $0x30] sm:$0x1] %v1255_v0 }
  0x43   : > { %479 = vmatpush.bf16.msra.mxu0 %v6339_v4  ;;  %6660 = vmatpush.bf16.msra.mxu2 %v6339_v4  ;;  %1334 = vst [vmem:[#allocation2 + $0xec] sm:$0x8] %v1333_v62  ;;  %v6393_v62 = vld [vmem:[#allocation8 + $0x8] sm:$0xff] }
  0x47   : > { %480 = vmatpush.bf16.msra.mxu0 %v6338_v5  ;;  %6661 = vmatpush.bf16.msra.mxu2 %v6338_v5 }
  0x4b   : > { %481 = vmatpush.bf16.msra.mxu0 %v6337_v6  ;;  %6662 = vmatpush.bf16.msra.mxu2 %v6337_v6 }
  0x4f   : > { %482 = vmatpush.bf16.msra.mxu0 %v6336_v7  ;;  %6663 = vmatpush.bf16.msra.mxu2 %v6336_v7  ;;  %v6477_v7 = vld [vmem:[#allocation8 + $0x128] sm:$0xff] }
  0x52   : > { %483 = vmatmul.bf16.vlgmr.msra.gmra.mxu0 %v6320_v8  ;;  %523 = vmatmul.bf16.vlgmr.msra.gmra.mxu2 %v6328_v9 }
  0x53   : > { %3285 = vmatpush.bf16.msrb.mxu0 %v6399_v22  ;;  %2707 = vmatpush.bf16.msrb.mxu2 %v6479_v33 }
  0x57   : > { %3286 = vmatpush.bf16.msrb.mxu0 %v6398_v25  ;;  %2708 = vmatpush.bf16.msrb.mxu2 %v6478_v43 }
  0x5b   : > { %3287 = vmatpush.bf16.msrb.mxu0 %v6397_v26  ;;  %2709 = vmatpush.bf16.msrb.mxu2 %v6477_v7 }
  0x5f   : > { %3288 = vmatpush.bf16.msrb.mxu0 %v6396_v42  ;;  %v6394_v42 = vld [vmem:[#allocation8 + $0x10] sm:$0xff]  ;;  %2710 = vmatpush.bf16.msrb.mxu2 %v6476_v48 }
  0x62   : > { %488 = vmatmul.bf16.gmra.mxu0 %v6321_v10  ;;  %528 = vmatmul.bf16.gmra.mxu2 %v6329_v11  ;;  %v7171_v10 = vmov 0  }
  0x63   : > { %3289 = vmatpush.bf16.msrb.mxu0 %v6395_v51  ;;  %1236 = vst [vmem:[#allocation2] sm:$0xff] %v7171_v10 }
  0x64   : > { %1238 = vst [vmem:[#allocation2 + $0xc] sm:$0xff] %v7171_v10 }
  0x65   : > { %1237 = vst [vmem:[#allocation2 + $0x8] sm:$0xf] %v7171_v10 }
  0x66   : > { %1239 = vst [vmem:[#allocation2 + $0x14] sm:$0xf] %v7171_v10 }
  0x67   : > { %1241 = vst [vmem:[#allocation2 + $0x198] sm:$0xff] %v7171_v10  ;;  %3290 = vmatpush.bf16.msrb.mxu0 %v6394_v42 }
  0x68   : > { %1243 = vst [vmem:[#allocation2 + $0x1a4] sm:$0xff] %v7171_v10 }
  0x69   : > { %1242 = vst [vmem:[#allocation2 + $0x1a0] sm:$0xf] %v7171_v10 }
  0x6a   : > { %1244 = vst [vmem:[#allocation2 + $0x1ac] sm:$0xf] %v7171_v10 }
  0x6b   : > { %3291 = vmatpush.bf16.msrb.mxu0 %v6393_v62 }
  0x72   : > { %493 = vmatmul.bf16.gmra.mxu0 %v6322_v12  ;;  %533 = vmatmul.bf16.gmra.mxu2 %v6330_v13 }
  0x82   : > { %498 = vmatmul.bf16.gmra.mxu0 %v6323_v14  ;;  %538 = vmatmul.bf16.gmra.mxu2 %v6331_v15 }
  0x92   : > { %503 = vmatmul.bf16.gmra.mxu0 %v6324_v16  ;;  %543 = vmatmul.bf16.gmra.mxu2 %v6332_v17 }
  0xa2   : > { %508 = vmatmul.bf16.gmra.mxu0 %v6325_v18  ;;  %548 = vmatmul.bf16.gmra.mxu2 %v6333_v19 }
  0xb2   : > { %513 = vmatmul.bf16.gmra.mxu0 %v6326_v20  ;;  %553 = vmatmul.bf16.gmra.mxu2 %v6334_v21 }
  0xc2   : > { %518 = vmatmul.bf16.gmra.mxu0 %v6327_v23  ;;  %558 = vmatmul.bf16.gmra.mxu2 %v6335_v24 }
  0xcf   : > { %v484_v30 = vpop.f32.mrf.mxu0 }
  0xd0   : > { %v7354_v32 = vadd.f32 %v7344_v27, %v484_v30 }
  0xd2   : > { %v5386_v34 = vmul.f32 -1.442695, %v7354_v32 }
  0xd4   : > { %6746 = vpow2.f32 %v5386_v34 }
  0xd5   : > { %v524_v36 = vpop.f32.mrf.mxu2 }
  0xd6   : > { %v7360_v38 = vadd.f32 %v7344_v27, %v524_v36 }
  0xd7   : > { %v486_v39 = vpop.f32.mrf.mxu0 }
  0xd8   : > { %v5402_v40 = vmul.f32 -1.442695, %v7360_v38  ;;  %v7364_v41 = vadd.f32 %v7344_v27, %v486_v39 }
  0xda   : > { %v6747_v44 = vpop.eup %6746  ;;  %6748 = vpow2.f32 %v5402_v40  ;;  %v5387_v45 = vmul.f32 -1.442695, %v7364_v41  ;;  %v6470_v40 = vld [vmem:[#allocation8 + $0xf0] sm:$0xff] }
  0xdb   : > { %v660_v46 = vadd.f32 1.0, %v6747_v44  ;;  %2619 = vmatpush.bf16.msra.mxu1 %v6470_v40  ;;  %6665 = vmatpush.bf16.msra.mxu3 %v6470_v40 }
  0xdc   : > { %6750 = vpow2.f32 %v5387_v45 }
  0xdd   : > { %6752 = vrcp.f32 %v660_v46  ;;  %v526_v52 = vpop.f32.mrf.mxu2  ;;  %v701_v2 = vand.u32 2147483647, %v660_v46  ;;  %v703_v4 = vand.u32 2147483648, %v660_v46  ;;  %vm697_vm6 = vweird.f32 %v660_v46 }
  0xde   : > { %v7374_v53 = vadd.f32 %v7344_v27, %v526_v52 }
  0xdf   : > { %v489_v54 = vpop.f32.mrf.mxu0  ;;  %vm7396_vm8 = vcmp.eq.f32.partialorder %v701_v2, 8.507059e+37  ;;  %v704_v17 = vor.u32 1.1754944e-38, %v703_v4 }
  0xe0   : > { %v6749_v55 = vpop.eup %6748  ;;  %v5403_v56 = vmul.f32 -1.442695, %v7374_v53  ;;  %v7378_v57 = vadd.f32 %v7344_v27, %v489_v54 }
  0xe1   : > { %v7380_v58 = vadd.f32 1.0, %v6749_v55 }
  0xe2   : > { %v6751_v61 = vpop.eup %6750  ;;  %6754 = vpow2.f32 %v5403_v56  ;;  %v5388_v63 = vmul.f32 -1.442695, %v7378_v57 }
  0xe3   : > { %v6753_v1 = vpop.eup %6752  ;;  %6756 = vrcp.f32 %v7380_v58  ;;  %v7388_v5 = vadd.f32 1.0, %v6751_v61  ;;  %v941_v9 = vand.u32 2147483647, %v7380_v58  ;;  %v943_v11 = vand.u32 2147483648, %v7380_v58  ;;  %v6469_v61 = vld [vmem:[#allocation8 + $0xe8] sm:$0xff] }
  0xe4   : > { %v693_v3 = vmul.f32 %v6753_v1, %v660_v46  ;;  %6758 = vpow2.f32 %v5388_v63  ;;  %vm698_vm7 = vweird.f32 %v6753_v1  ;;  %vm937_vm10 = vweird.f32 %v7380_v58  ;;  %v1278_v46 = vld [vmem:[#allocation2 + $0xf0] sm:$0x1]  ;;  %2620 = vmatpush.bf16.msra.mxu1 %v6469_v61  ;;  %6666 = vmatpush.bf16.msra.mxu3 %v6469_v61 }
  0xe5   : > { %v529_v6 = vpop.f32.mrf.mxu2  ;;  %6760 = vrcp.f32 %v7388_v5  ;;  %vm7407_vm9 = vmor %vm697_vm6, %vm698_vm7  ;;  %v718_v21 = vand.u32 2147483648, %v7388_v5  ;;  %vm7418_vm13 = vcmp.eq.f32.partialorder %v941_v9, 8.507059e+37  ;;  %v716_v30 = vand.u32 2147483647, %v7388_v5 }
  0xe6   : > { %v694_v8 = vsub.f32 1.0, %v693_v3  ;;  %v7394_v12 = vadd.f32 %v7344_v27, %v529_v6  ;;  %v944_v31 = vor.u32 1.1754944e-38, %v943_v11  ;;  %vm712_vm14 = vweird.f32 %v7388_v5  ;;  %v6475_v3 = vld [vmem:[#allocation8 + $0x118] sm:$0xff] }
  0xe7   : > { %v491_v13 = vpop.f32.mrf.mxu0  ;;  %v7437_v45 = vor.u32 1.1754944e-38, %v718_v21  ;;  %vm7442_vm0 = vcmp.eq.f32.partialorder %v716_v30, 8.507059e+37  ;;  %v1279_v60 = vsel %vm7347_vm2, 0, %v1278_v46  ;;  %2711 = vmatpush.bf16.msrb.mxu2 %v6475_v3  ;;  %v6474_v30 = vld [vmem:[#allocation8 + $0x110] sm:$0xff] }
  0xe8   : > { %v6755_v14 = vpop.eup %6754  ;;  %v695_v15 = vmul.f32 %v6753_v1, %v694_v8  ;;  %v7401_v18 = vadd.f32 %v7344_v27, %v491_v13  ;;  %v5404_v23 = vmul.f32 -1.442695, %v7394_v12  ;;  %1280 = vst [vmem:[#allocation2 + $0xf0] sm:$0x1] %v1279_v60  ;;  %v1685_v60 = vld [vmem:[#allocation2 + $0xd8] sm:$0xf] }
  0xe9   : > { %v7403_v19 = vpop.eup %6756  ;;  %v7413_v22 = vadd.f32 1.0, %v6755_v14 }
  0xea   : > { %v6759_v24 = vpop.eup %6758  ;;  %v696_v25 = vadd.f32 %v6753_v1, %v695_v15  ;;  %v933_v26 = vmul.f32 %v7403_v19, %v7380_v58  ;;  %v5389_v34 = vmul.f32 -1.442695, %v7401_v18  ;;  %vm938_vm15 = vweird.f32 %v7403_v19 }
  0xeb   : > { %6762 = vrcp.f32 %v7413_v22  ;;  %v958_v33 = vand.u32 2147483648, %v7413_v22  ;;  %v7426_v35 = vpop.eup %6760  ;;  %v7430_v39 = vadd.f32 1.0, %v6759_v24  ;;  %v956_v54 = vand.u32 2147483647, %v7413_v22  ;;  %vm7462_vm6 = vmor %vm937_vm10, %vm938_vm15  ;;  %v6392_v24 = vld [vmem:[#allocation8] sm:$0xff]  ;;  %2712 = vmatpush.bf16.msrb.mxu2 %v6474_v30 }
  0xec   : > { %v700_v36 = vsel %vm7407_vm9, %v6753_v1, %v696_v25  ;;  %v934_v37 = vsub.f32 1.0, %v933_v26  ;;  %6764 = vpow2.f32 %v5404_v23  ;;  %v708_v44 = vmul.f32 %v7426_v35, %v7388_v5  ;;  %v6468_v23 = vld [vmem:[#allocation8 + $0xe0] sm:$0xff]  ;;  %v1653_v26 = vld [vmem:[#allocation2 + $0x18] sm:$0xf]  ;;  %3292 = vmatpush.bf16.msrb.mxu0 %v6392_v24 }
  0xed   : > { %v705_v43 = vsel %vm7396_vm8, %v704_v17, %v700_v36  ;;  %6766 = vrcp.f32 %v7430_v39  ;;  %vm713_vm3 = vweird.f32 %v7426_v35  ;;  %vm952_vm4 = vweird.f32 %v7413_v22  ;;  %v531_v36 = vpop.f32.mrf.mxu2  ;;  %2621 = vmatpush.bf16.msra.mxu1 %v6468_v23  ;;  %6667 = vmatpush.bf16.msra.mxu3 %v6468_v23  ;;  %v6344_v23 = vld [vmem:[#allocation2 + $0x4] sm:$0xf] }
  0xee   : > { %v1172_v49 = vmul.f32 %v705_v43, %v7354_v32  ;;  %v935_v50 = vmul.f32 %v7403_v19, %v934_v37  ;;  %v709_v52 = vsub.f32 1.0, %v708_v44  ;;  %v731_v32 = vand.u32 2147483647, %v7430_v39 }
  0xef   : > { %v7452_v59 = vor.u32 1.1754944e-38, %v958_v33  ;;  %vm727_vm7 = vweird.f32 %v7430_v39  ;;  %v733_v2 = vand.u32 2147483648, %v7430_v39  ;;  %6768 = vpow2.f32 %v5389_v34 }
  0xf0   : > { %v1204_v55 = vpack.c.bf16 %v1172_v49, %v1172_v49  ;;  %v936_v56 = vadd.f32 %v7403_v19, %v935_v50  ;;  %v710_v1 = vmul.f32 %v7426_v35, %v709_v52  ;;  %vm1749_vm8 = vsmask.f32 3328 }
  0xf1   : > { %v7456_v63 = vpop.eup %6762  ;;  %vm1750_vm9 = vsmask.f32 7440  ;;  %vm7477_vm10 = vcmp.eq.f32.partialorder %v956_v54, 8.507059e+37  ;;  %vm7481_vm15 = vcmp.eq.f32.partialorder %v731_v32, 8.507059e+37  ;;  %v734_v48 = vor.u32 1.1754944e-38, %v733_v2 }
  0xf2   : > { %v6765_v4 = vpop.eup %6764  ;;  %v1362_v6 = vshrl.u32 %v1204_v55, 16  ;;  %v1365_v7 = vshll.u32 %v1204_v55, 16  ;;  %1717 = vst [vmem:[#allocation2 + $0x1c] sm:$0xf] %v1204_v55  ;;  %v940_v58 = vsel %vm7462_vm6, %v7403_v19, %v936_v56  ;;  %v948_v8 = vmul.f32 %v7456_v63, %v7413_v22  ;;  %vm7502_vm6 = vmand %vm1650_vm11, %vm1651_vm12 }
  0xf3   : > { %v945_v9 = vsel %vm7418_vm13, %v944_v31, %v940_v58  ;;  %v711_v10 = vadd.f32 %v7426_v35, %v710_v1  ;;  %v7485_v14 = vadd.f32 1.0, %v6765_v4  ;;  %v7487_v15 = vpop.eup %6766  ;;  %vm7496_vm13 = vmor %vm712_vm14, %vm713_vm3  ;;  %vm953_vm14 = vweird.f32 %v7456_v63  ;;  %v7557_v4 = vpop.f32.mrf.mxu0 }
  0xf4   : > { %v7489_v16 = vrot.slane %v1362_v6, 7  ;;  %v1752_v17 = vrot.slane %v1362_v6, 4  ;;  %v1753_v19 = vrot.slane %v1365_v7, 5  ;;  %v1188_v20 = vmul.f32 %v945_v9, %v7360_v38 }
  0xf5   : > { %v715_v38 = vsel %vm7496_vm13, %v7426_v35, %v711_v10  ;;  %v949_v29 = vsub.f32 1.0, %v948_v8  ;;  %v723_v5 = vmul.f32 %v7487_v15, %v7430_v39  ;;  %vm728_vm12 = vweird.f32 %v7487_v15  ;;  %v7514_v37 = vpop.eup %6768 }
  0xf6   : > { %v1367_v31 = vor.u32 %v1365_v7, %v7489_v16  ;;  %v1754_v33 = vor.u32 %v1753_v19, %v1752_v17  ;;  %v1220_v34 = vpack.c.bf16 %v1188_v20, %v1188_v20  ;;  %v720_v35 = vsel %vm7442_vm0, %v7437_v45, %v715_v38  ;;  %vm7529_vm0 = vmor %vm952_vm4, %vm953_vm14 }
  0xf7   : > { %v950_v40 = vmul.f32 %v7456_v63, %v949_v29  ;;  %v724_v42 = vsub.f32 1.0, %v723_v5  ;;  %6770 = vrcp.f32 %v7485_v14  ;;  %v1173_v49 = vmul.f32 %v720_v35, %v7364_v41  ;;  %vm7544_vm3 = vmor %vm727_vm7, %vm728_vm12 }
  0xf8   : > { %v1654_v43 = vsel %vm7502_vm6, %v1367_v31, %v1653_v26  ;;  %v1490_v44 = vshrl.u32 %v1220_v34, 16  ;;  %v1493_v46 = vshll.u32 %v1220_v34, 16  ;;  %1733 = vst [vmem:[#allocation2 + $0xdc] sm:$0xf] %v1220_v34  ;;  %v7535_v52 = vadd.f32 %v7344_v27, %v531_v36  ;;  %vm7570_vm7 = vmor %vm1749_vm8, %vm1750_vm9  ;;  %v6467_v26 = vld [vmem:[#allocation8 + $0xd8] sm:$0xff]  ;;  %v7589_v31 = vpop.f32.mrf.mxu2 }
  0xf9   : > { %1655 = vst [vmem:[#allocation2 + $0x18] sm:$0xf] %v1654_v43  ;;  %v951_v50 = vadd.f32 %v7456_v63, %v950_v40  ;;  %v725_v51 = vmul.f32 %v7487_v15, %v724_v42  ;;  %v1368_v54 = vrot.slane %v7489_v16, 4  ;;  %v1755_v56 = vrot.slane %v1754_v33, 4  ;;  %v6473_v33 = vld [vmem:[#allocation8 + $0x108] sm:$0xff]  ;;  %2622 = vmatpush.bf16.msra.mxu1 %v6467_v26  ;;  %6668 = vmatpush.bf16.msra.mxu3 %v6467_v26 }
  0xfa   : > { %v7538_v32 = vrot.slane %v1490_v44, 7  ;;  %v1824_v41 = vrot.slane %v1490_v44, 4  ;;  %v1825_v55 = vrot.slane %v1493_v46, 5  ;;  %v1205_v61 = vpack.c.bf16 %v1173_v49, %v1173_v49  ;;  %2713 = vmatpush.bf16.msrb.mxu2 %v6473_v33 }
  0xfb   : > { %v955_v62 = vsel %vm7529_vm0, %v7456_v63, %v951_v50  ;;  %v726_v0 = vadd.f32 %v7487_v15, %v725_v51  ;;  %v971_v3 = vand.u32 2147483647, %v7485_v14  ;;  %vm967_vm4 = vweird.f32 %v7485_v14 }
  0xfc   : > { %v1495_v1 = vor.u32 %v1493_v46, %v7538_v32  ;;  %v1826_v2 = vor.u32 %v1825_v55, %v1824_v41  ;;  %v960_v39 = vsel %vm7477_vm10, %v7452_v59, %v955_v62  ;;  %v1370_v7 = vshrl.u32 %v1205_v61, 16  ;;  %1718 = vst [vmem:[#allocation2 + $0x28] sm:$0xf] %v1205_v61  ;;  %v1962_v62 = vld [vmem:[#allocation2 + $0xec] sm:$0xf] }
  0xfd   : > { %v7559_v6 = vpop.eup %6770  ;;  %v1373_v58 = vshll.u32 %v1205_v61, 16  ;;  %v1189_v63 = vmul.f32 %v960_v39, %v7374_v53  ;;  %v730_v8 = vsel %vm7544_vm3, %v7487_v15, %v726_v0  ;;  %v973_v11 = vand.u32 2147483648, %v7485_v14 }
  0xfe   : > { %v1686_v59 = vsel %vm7502_vm6, %v1495_v1, %v1685_v60  ;;  %v735_v10 = vsel %vm7481_vm15, %v734_v48, %v730_v8  ;;  %v963_v53 = vmul.f32 %v7559_v6, %v7485_v14  ;;  %v1372_v15 = vrot.slane %v1370_v7, 7  ;;  %v1311_v48 = vld [vmem:[#allocation2 + $0x44] sm:$0x8]  ;;  %v6416_v1 = vld [vmem:[#allocation2 + $0x1c] sm:$0xf] }
  0xff   : > { %1687 = vst [vmem:[#allocation2 + $0xd8] sm:$0xf] %v1686_v59  ;;  %v1756_v16 = vrot.slane %v1373_v58, 5  ;;  %v1758_v17 = vrot.slane %v1370_v7, 4  ;;  %v1221_v19 = vpack.c.bf16 %v1189_v63, %v1189_v63  ;;  %v1496_v20 = vrot.slane %v7538_v32, 4  ;;  %v6466_v32 = vld [vmem:[#allocation8 + $0xd0] sm:$0xff] }
 0x100   : > { %v1827_v21 = vrot.slane %v1826_v2, 4  ;;  %vm9599_vm9 = vsmask.f32 256  ;;  %v1174_v13 = vmul.f32 %v735_v10, %v7378_v57  ;;  %v964_v24 = vsub.f32 1.0, %v963_v53  ;;  %v1930_v57 = vld [vmem:[#allocation2 + $0x2c] sm:$0xf]  ;;  %v496_v2 = vpop.f32.mrf.mxu0  ;;  %2623 = vmatpush.bf16.msra.mxu1 %v6466_v32  ;;  %6669 = vmatpush.bf16.msra.mxu3 %v6466_v32 }
 0x101   : > { %vm7582_vm10 = vmor %vm9599_vm9, %vm1359_vm1  ;;  %v1375_v38 = vor.u32 %v1373_v58, %v1372_v15  ;;  %v1757_v29 = vsel %vm7570_vm7, %v1755_v56, %v1756_v16  ;;  %v1759_v5 = vor.u32 %v1758_v17, %v1756_v16  ;;  %v1498_v30 = vshrl.u32 %v1221_v19, 16  ;;  %1734 = vst [vmem:[#allocation2 + $0xe8] sm:$0xf] %v1221_v19  ;;  %v6472_v56 = vld [vmem:[#allocation8 + $0x100] sm:$0xff]  ;;  %v1335_v10 = vld [vmem:[#allocation2 + $0x104] sm:$0x8] }
 0x102   : > { %vm7593_vm1 = vmand %vm1650_vm11, %vm1749_vm8  ;;  %1928 = vst [vmem:[#allocation2 + $0x20] sm:$0xf] %v1757_v29  ;;  %v1501_v36 = vshll.u32 %v1221_v19, 16  ;;  %v1206_v35 = vpack.c.bf16 %v1174_v13, %v1174_v13  ;;  %v965_v40 = vmul.f32 %v7559_v6, %v964_v24  ;;  %vm968_vm15 = vweird.f32 %v7559_v6  ;;  %v1657_v7 = vld [vmem:[#allocation2 + $0x30] sm:$0xf]  ;;  %2714 = vmatpush.bf16.msrb.mxu2 %v6472_v56 }
 0x103   : > { %v1376_v42 = vsel %vm7582_vm10, %v1368_v54, %v1375_v38  ;;  %v1760_v43 = vrot.slane %v1759_v5, 4  ;;  %v1500_v44 = vrot.slane %v1498_v30, 7  ;;  %v1830_v46 = vrot.slane %v1498_v30, 4  ;;  %vm7615_vm11 = vmor %vm967_vm4, %vm968_vm15  ;;  %v1257_v24 = vld [vmem:[#allocation2 + $0x48] sm:$0x1] }
 0x104   : > { %1656 = vst [vmem:[#allocation2 + $0x24] sm:$0xf] %v1376_v42  ;;  %v1828_v49 = vrot.slane %v1501_v36, 5  ;;  %v1378_v50 = vshrl.u32 %v1206_v35, 16  ;;  %v966_v45 = vadd.f32 %v7559_v6, %v965_v40  ;;  %v974_v51 = vor.u32 1.1754944e-38, %v973_v11  ;;  %v6465_v11 = vld [vmem:[#allocation8 + $0xc8] sm:$0xff] }
 0x105   : > { %v1931_v41 = vsel %vm7593_vm1, %v1760_v43, %v1930_v57  ;;  %v1503_v55 = vor.u32 %v1501_v36, %v1500_v44  ;;  %v1381_v22 = vshll.u32 %v1206_v35, 16  ;;  %1719 = vst [vmem:[#allocation2 + $0x34] sm:$0xf] %v1206_v35  ;;  %v7605_v54 = vadd.f32 1.0, %v7514_v37  ;;  %2624 = vmatpush.bf16.msra.mxu1 %v6465_v11  ;;  %6670 = vmatpush.bf16.msra.mxu3 %v6465_v11  ;;  %v1689_v42 = vld [vmem:[#allocation2 + $0xf0] sm:$0xf] }
 0x106   : > { %1932 = vst [vmem:[#allocation2 + $0x2c] sm:$0xf] %v1931_v41  ;;  %v1829_v60 = vsel %vm7570_vm7, %v1827_v21, %v1828_v49  ;;  %v1831_v61 = vor.u32 %v1830_v46, %v1828_v49  ;;  %v7609_v0 = vrot.slane %v1378_v50, 7  ;;  %v1312_v37 = vsel %vm7367_vm5, 0, %v1311_v48  ;;  %v1314_v11 = vld [vmem:[#allocation2 + $0x5c] sm:$0x8] }
 0x107   : > { %v1504_v39 = vsel %vm7582_vm10, %v1496_v20, %v1503_v55  ;;  %1961 = vst [vmem:[#allocation2 + $0xe0] sm:$0xf] %v1829_v60  ;;  %v970_v58 = vsel %vm7615_vm11, %v7559_v6, %v966_v45  ;;  %vm972_vm8 = vcmp.eq.f32.partialorder %v971_v3, 8.507059e+37  ;;  %6772 = vrcp.f32 %v7605_v54  ;;  %v1248_v6 = vld [vmem:[#allocation2] sm:$0x1]  ;;  %v536_v20 = vpop.f32.mrf.mxu2 }
 0x108   : > { %1688 = vst [vmem:[#allocation2 + $0xe4] sm:$0xf] %v1504_v39  ;;  %v1832_v63 = vrot.slane %v1831_v61, 4  ;;  %v1383_v8 = vor.u32 %v1381_v22, %v7609_v0  ;;  %v975_v59 = vsel %vm972_vm8, %v974_v51, %v970_v58  ;;  %v5405_v3 = vmul.f32 -1.442695, %v7535_v52  ;;  %v499_v48 = vpop.f32.mrf.mxu0 }
 0x109   : > { %v1190_v53 = vmul.f32 %v975_v59, %v7394_v12  ;;  %1313 = vst [vmem:[#allocation2 + $0x44] sm:$0x8] %v1312_v37  ;;  %v7636_v16 = vrot.slane %v1378_v50, 4  ;;  %v7638_v17 = vrot.slane %v1381_v22, 5  ;;  %v1336_v12 = vsel %vm7367_vm5, 0, %v1335_v10 }
 0x10a   : > { %v1963_v15 = vsel %vm7593_vm1, %v1832_v63, %v1962_v62  ;;  %v1658_v14 = vsel %vm7502_vm6, %v1383_v8, %v1657_v7  ;;  %v746_v21 = vand.u32 2147483647, %v7605_v54  ;;  %6774 = vpow2.f32 %v5405_v3  ;;  %1337 = vst [vmem:[#allocation2 + $0x104] sm:$0x8] %v1336_v12  ;;  %v5422_v51 = vld [vmem:[#allocation2 + $0x24] sm:$0xf0] }
 0x10b   : > { %1964 = vst [vmem:[#allocation2 + $0xec] sm:$0xf] %v1963_v15  ;;  %v1222_v19 = vpack.c.bf16 %v1190_v53, %v1190_v53  ;;  %v7645_v13 = vadd.f32 %v7344_v27, %v7557_v4  ;;  %v7649_v26 = vadd.f32 %v7344_v27, %v7589_v31  ;;  %v1258_v30 = vsel %vm7347_vm2, 0, %v1257_v24  ;;  %v1281_v55 = vld [vmem:[#allocation2 + $0x108] sm:$0x1] }
 0x10c   : > { %1659 = vst [vmem:[#allocation2 + $0x30] sm:$0xf] %v1658_v14  ;;  %v7654_v33 = vadd.f32 %v7344_v27, %v496_v2  ;;  %vm742_vm13 = vweird.f32 %v7605_v54  ;;  %v748_v31 = vand.u32 2147483648, %v7605_v54  ;;  %v1249_v40 = vsel %vm7347_vm2, 0, %v1248_v6  ;;  %v5518_v9 = vld [vmem:[#allocation2 + $0xe4] sm:$0xf0] }
 0x10d   : > { %v6773_v38 = vpop.eup %6772  ;;  %v1506_v29 = vshrl.u32 %v1222_v19, 16  ;;  %v1509_v5 = vshll.u32 %v1222_v19, 16  ;;  %1735 = vst [vmem:[#allocation2 + $0xf4] sm:$0xf] %v1222_v19  ;;  %v5390_v4 = vmul.f32 -1.442695, %v7645_v13  ;;  %v7667_v46 = vadd.f32 %v7344_v27, %v536_v20 }
 0x10e   : > { %v738_v57 = vmul.f32 %v6773_v38, %v7605_v54  ;;  %v5406_v36 = vmul.f32 -1.442695, %v7649_v26  ;;  %1259 = vst [vmem:[#allocation2 + $0x48] sm:$0x1] %v1258_v30  ;;  %v5391_v44 = vmul.f32 -1.442695, %v7654_v33  ;;  %vm743_vm14 = vweird.f32 %v6773_v38 }
 0x10f   : > { %v7659_v35 = vrot.slane %v1506_v29, 7  ;;  %6776 = vpow2.f32 %v5390_v4  ;;  %v1833_v50 = vrot.slane %v1506_v29, 4  ;;  %v1834_v45 = vrot.slane %v1509_v5, 5  ;;  %1250 = vst [vmem:[#allocation2] sm:$0x1] %v1249_v40  ;;  %vm744_vm12 = vmor %vm742_vm13, %vm743_vm14  ;;  %v539_v8 = vpop.f32.mrf.mxu2  ;;  %v6464_v30 = vld [vmem:[#allocation8 + $0xc0] sm:$0xff] }
 0x110   : > { %v739_v43 = vsub.f32 1.0, %v738_v57  ;;  %6778 = vpow2.f32 %v5406_v36  ;;  %v6775_v32 = vpop.eup %6774  ;;  %v5407_v22 = vmul.f32 -1.442695, %v7667_v46  ;;  %v1282_v61 = vsel %vm7347_vm2, 0, %v1281_v55  ;;  %2625 = vmatpush.bf16.msra.mxu1 %v6464_v30  ;;  %6671 = vmatpush.bf16.msra.mxu3 %v6464_v30 }
 0x111   : > { %v1511_v49 = vor.u32 %v1509_v5, %v7659_v35  ;;  %6780 = vpow2.f32 %v5391_v44  ;;  %v7673_v60 = vadd.f32 1.0, %v6775_v32  ;;  %v7678_v62 = vadd.f32 %v7344_v27, %v499_v48  ;;  %1283 = vst [vmem:[#allocation2 + $0x108] sm:$0x1] %v1282_v61  ;;  %v6345_v5 = vld [vmem:[#allocation2 + $0x8] sm:$0xf0] }
 0x112   : > { %v740_v41 = vmul.f32 %v6773_v38, %v739_v43  ;;  %v1384_v37 = vrot.slane %v7609_v0, 4  ;;  %v5425_v39 = vor.u32 %v6416_v1, %v5422_v51  ;;  %v1763_v7 = vor.u32 %v7638_v17, %v7636_v16 }
 0x113   : > { %v1690_v56 = vsel %vm7502_vm6, %v1511_v49, %v1689_v42  ;;  %v1835_v58 = vor.u32 %v1834_v45, %v1833_v50  ;;  %v749_v63 = vor.u32 1.1754944e-38, %v748_v31  ;;  %6782 = vrcp.f32 %v7673_v60 }
 0x114   : > { %1691 = vst [vmem:[#allocation2 + $0xf0] sm:$0xf] %v1690_v56  ;;  %v741_v2 = vadd.f32 %v6773_v38, %v740_v41  ;;  %vm747_vm0 = vcmp.eq.f32.partialorder %v746_v21, 8.507059e+37  ;;  %v988_v53 = vand.u32 2147483648, %v7673_v60  ;;  %6784 = vpow2.f32 %v5407_v22  ;;  %2715 = vmatmul.bf16.vlgmr.msrb.gmra.mxu2 %v5425_v39 }
 0x115   : > { %v6777_v59 = vpop.eup %6776  ;;  %v986_v3 = vand.u32 2147483647, %v7673_v60  ;;  %v5392_v54 = vmul.f32 -1.442695, %v7678_v62  ;;  %v1315_v12 = vsel %vm7367_vm5, 0, %v1314_v11  ;;  %v7698_v20 = vadd.f32 %v7344_v27, %v539_v8 }
 0x116   : > { %v745_v10 = vsel %vm744_vm12, %v6773_v38, %v741_v2  ;;  %v6779_v15 = vpop.eup %6778  ;;  %v7689_v6 = vadd.f32 1.0, %v6777_v59  ;;  %v1764_v21 = vrot.slane %v1763_v7, 4  ;;  %v1512_v24 = vrot.slane %v7659_v35, 4  ;;  %1316 = vst [vmem:[#allocation2 + $0x5c] sm:$0x8] %v1315_v12 }
 0x117   : > { %v750_v14 = vsel %vm747_vm0, %v749_v63, %v745_v10  ;;  %v6781_v16 = vpop.eup %6780  ;;  %v7693_v19 = vadd.f32 1.0, %v6779_v15  ;;  %v7701_v38 = vrot.slane %v1835_v58, 4  ;;  %vm982_vm3 = vweird.f32 %v7673_v60  ;;  %v5708_v31 = vld [vmem:[#allocation2] sm:$0xf]  ;;  %v1934_v8 = vld [vmem:[#allocation2 + $0x44] sm:$0xf] }
 0x118   : > { %v1175_v17 = vmul.f32 %v750_v14, %v7401_v18  ;;  %6786 = vrcp.f32 %v7689_v6  ;;  %v7705_v18 = vor.u32 1.1754944e-38, %v988_v53  ;;  %v761_v27 = vand.u32 2147483647, %v7689_v6 }
 0x119   : > { %6788 = vrcp.f32 %v7693_v19  ;;  %v7708_v57 = vpop.eup %6782  ;;  %v763_v4 = vand.u32 2147483648, %v7689_v6  ;;  %v7712_v36 = vadd.f32 1.0, %v6781_v16  ;;  %vm7716_vm4 = vcmp.eq.f32.partialorder %v986_v3, 8.507059e+37 }
 0x11a   : > { %v1207_v29 = vpack.c.bf16 %v1175_v17, %v1175_v17  ;;  %6790 = vpow2.f32 %v5392_v54  ;;  %v6785_v40 = vpop.eup %6784  ;;  %v978_v44 = vmul.f32 %v7708_v57, %v7673_v60  ;;  %v7721_v49 = vmul.f32 -1.442695, %v7698_v20 }
 0x11b   : > { %vm757_vm9 = vweird.f32 %v7689_v6  ;;  %v1001_v50 = vand.u32 2147483647, %v7693_v19  ;;  %v1003_v45 = vand.u32 2147483648, %v7693_v19  ;;  %6792 = vrcp.f32 %v7712_v36 }
 0x11c   : > { %v1386_v42 = vshrl.u32 %v1207_v29, 16  ;;  %v1389_v43 = vshll.u32 %v1207_v29, 16  ;;  %1720 = vst [vmem:[#allocation2 + $0x40] sm:$0xf] %v1207_v29  ;;  %v979_v55 = vsub.f32 1.0, %v978_v44  ;;  %vm983_vm15 = vweird.f32 %v7708_v57 }
 0x11d   : > { %vm7730_vm11 = vcmp.eq.f32.partialorder %v761_v27, 8.507059e+37  ;;  %v7734_v61 = vor.u32 1.1754944e-38, %v763_v4  ;;  %vm997_vm8 = vweird.f32 %v7693_v19  ;;  %v5709_v1 = vor.u32 %v6345_v5, %v5708_v31  ;;  %vm984_vm14 = vmor %vm982_vm3, %vm983_vm15  ;;  %v1338_v27 = vld [vmem:[#allocation2 + $0x11c] sm:$0x8] }
 0x11e   : > { %v1388_v51 = vrot.slane %v1386_v42, 7  ;;  %v1765_v32 = vrot.slane %v1389_v43, 5  ;;  %v1767_v41 = vrot.slane %v1386_v42, 4  ;;  %v7727_v22 = vpop.eup %6786  ;;  %v7737_v2 = vadd.f32 1.0, %v6785_v40 }
 0x11f   : > { %v6789_v39 = vpop.eup %6788  ;;  %v980_v59 = vmul.f32 %v7708_v57, %v979_v55  ;;  %v753_v53 = vmul.f32 %v7727_v22, %v7689_v6  ;;  %vm7745_vm13 = vcmp.eq.f32.partialorder %v1001_v50, 8.507059e+37  ;;  %v1004_v14 = vor.u32 1.1754944e-38, %v1003_v45  ;;  %3293 = vmatmul.bf16.vlgmr.msrb.gmra.mxu0 %v5709_v1 }
 0x120   : > { %v1391_v7 = vor.u32 %v1389_v43, %v1388_v51  ;;  %v1766_v58 = vsel %vm7570_vm7, %v1764_v21, %v1765_v32  ;;  %v1768_v63 = vor.u32 %v1767_v41, %v1765_v32  ;;  %v6791_v10 = vpop.eup %6790  ;;  %v993_v11 = vmul.f32 %v6789_v39, %v7693_v19 }
 0x121   : > { %1933 = vst [vmem:[#allocation2 + $0x38] sm:$0xf] %v1766_v58  ;;  %v776_v3 = vand.u32 2147483647, %v7712_v36  ;;  %v981_v17 = vadd.f32 %v7708_v57, %v980_v59  ;;  %v778_v12 = vand.u32 2147483648, %v7712_v36  ;;  %v6793_v21 = vpop.eup %6792  ;;  %v754_v29 = vsub.f32 1.0, %v753_v53 }
 0x122   : > { %v1392_v54 = vsel %vm7582_vm10, %v1384_v37, %v1391_v7  ;;  %v1769_v16 = vrot.slane %v1768_v63, 4  ;;  %vm758_vm12 = vweird.f32 %v7727_v22  ;;  %v994_v5 = vsub.f32 1.0, %v993_v11 }
 0x123   : > { %1660 = vst [vmem:[#allocation2 + $0x3c] sm:$0xf] %v1392_v54  ;;  %6794 = vrcp.f32 %v7737_v2  ;;  %v985_v37 = vsel %vm984_vm14, %v7708_v57, %v981_v17  ;;  %v768_v30 = vmul.f32 %v6793_v21, %v7712_v36  ;;  %vm772_vm0 = vweird.f32 %v7712_v36  ;;  %vm7774_vm15 = vmor %vm757_vm9, %vm758_vm12  ;;  %v7830_v57 = vpop.f32.mrf.mxu0 }
 0x124   : > { %v1935_v0 = vsel %vm7593_vm1, %v1769_v16, %v1934_v8  ;;  %v990_v60 = vsel %vm7716_vm4, %v7705_v18, %v985_v37  ;;  %v755_v4 = vmul.f32 %v7727_v22, %v754_v29  ;;  %v995_v31 = vmul.f32 %v6789_v39, %v994_v5  ;;  %v1966_v16 = vld [vmem:[#allocation2 + $0x104] sm:$0xf]  ;;  %v1661_v37 = vld [vmem:[#allocation2 + $0x48] sm:$0xf] }
 0x125   : > { %1936 = vst [vmem:[#allocation2 + $0x44] sm:$0xf] %v1935_v0  ;;  %vm998_vm3 = vweird.f32 %v6789_v39  ;;  %v1191_v40 = vmul.f32 %v990_v60, %v7535_v52  ;;  %v769_v42 = vsub.f32 1.0, %v768_v30  ;;  %vm7778_vm14 = vcmp.eq.f32.partialorder %v776_v3, 8.507059e+37 }
 0x126   : > { %v1018_v44 = vand.u32 2147483648, %v7737_v2  ;;  %v756_v18 = vadd.f32 %v7727_v22, %v755_v4  ;;  %v996_v48 = vadd.f32 %v6789_v39, %v995_v31  ;;  %v779_v50 = vor.u32 1.1754944e-38, %v778_v12  ;;  %vm999_vm4 = vmor %vm997_vm8, %vm998_vm3 }
 0x127   : > { %v1339_v52 = vsel %vm7367_vm5, 0, %v1338_v27  ;;  %v1223_v45 = vpack.c.bf16 %v1191_v40, %v1191_v40  ;;  %v770_v6 = vmul.f32 %v6793_v21, %v769_v42  ;;  %vm773_vm9 = vweird.f32 %v6793_v21  ;;  %v1693_v42 = vld [vmem:[#allocation2 + $0x108] sm:$0xf] }
 0x128   : > { %1340 = vst [vmem:[#allocation2 + $0x11c] sm:$0x8] %v1339_v52  ;;  %v7788_v51 = vadd.f32 1.0, %v6791_v10  ;;  %v760_v41 = vsel %vm7774_vm15, %v7727_v22, %v756_v18  ;;  %v1000_v55 = vsel %vm999_vm4, %v6789_v39, %v996_v48  ;;  %v1016_v1 = vand.u32 2147483647, %v7737_v2  ;;  %vm774_vm8 = vmor %vm772_vm0, %vm773_vm9 }
 0x129   : > { %v7790_v32 = vpop.eup %6794  ;;  %v7796_v7 = vor.u32 1.1754944e-38, %v1018_v44  ;;  %v1514_v58 = vshrl.u32 %v1223_v45, 16  ;;  %v1517_v63 = vshll.u32 %v1223_v45, 16  ;;  %1736 = vst [vmem:[#allocation2 + $0x100] sm:$0xf] %v1223_v45  ;;  %v765_v19 = vsel %vm7730_vm11, %v7734_v61, %v760_v41 }
 0x12a   : > { %v1005_v8 = vsel %vm7745_vm13, %v1004_v14, %v1000_v55  ;;  %v1176_v59 = vmul.f32 %v765_v19, %v7645_v13  ;;  %v771_v22 = vadd.f32 %v6793_v21, %v770_v6  ;;  %v1008_v39 = vmul.f32 %v7790_v32, %v7737_v2 }
 0x12b   : > { %v1192_v10 = vmul.f32 %v1005_v8, %v7649_v26  ;;  %v1516_v53 = vrot.slane %v1514_v58, 7  ;;  %v1837_v11 = vrot.slane %v1517_v63, 5  ;;  %v1839_v3 = vrot.slane %v1514_v58, 4 }
 0x12c   : > { %6796 = vrcp.f32 %v7788_v51  ;;  %v1208_v56 = vpack.c.bf16 %v1176_v59, %v1176_v59  ;;  %v775_v15 = vsel %vm774_vm8, %v6793_v21, %v771_v22  ;;  %v1009_v14 = vsub.f32 1.0, %v1008_v39 }
 0x12d   : > { %v1224_v61 = vpack.c.bf16 %v1192_v10, %v1192_v10  ;;  %vm1012_vm11 = vweird.f32 %v7737_v2  ;;  %v1519_v13 = vor.u32 %v1517_v63, %v1516_v53  ;;  %v1838_v26 = vsel %vm7570_vm7, %v7701_v38, %v1837_v11  ;;  %v1938_v2 = vld [vmem:[#allocation2 + $0x5c] sm:$0xf] }
 0x12e   : > { %v1840_v54 = vor.u32 %v1839_v3, %v1837_v11  ;;  %v780_v17 = vsel %vm7778_vm14, %v779_v50, %v775_v15  ;;  %1965 = vst [vmem:[#allocation2 + $0xf8] sm:$0xf] %v1838_v26  ;;  %v1394_v36 = vshrl.u32 %v1208_v56, 16  ;;  %v1397_v12 = vshll.u32 %v1208_v56, 16  ;;  %v1260_v11 = vld [vmem:[#allocation2 + $0x60] sm:$0x1] }
 0x12f   : > { %v1522_v29 = vshrl.u32 %v1224_v61, 16  ;;  %v1525_v5 = vshll.u32 %v1224_v61, 16  ;;  %vm7817_vm13 = vcmp.eq.f32.partialorder %v1016_v1, 8.507059e+37  ;;  %v1520_v0 = vsel %vm7582_vm10, %v1512_v24, %v1519_v13  ;;  %1721 = vst [vmem:[#allocation2 + $0x4c] sm:$0xf] %v1208_v56  ;;  %v541_v56 = vpop.f32.mrf.mxu2 }
 0x130   : > { %v1841_v38 = vrot.slane %v1840_v54, 4  ;;  %v1177_v30 = vmul.f32 %v780_v17, %v7654_v33  ;;  %v1010_v27 = vmul.f32 %v7790_v32, %v1009_v14  ;;  %1692 = vst [vmem:[#allocation2 + $0xfc] sm:$0xf] %v1520_v0  ;;  %v1396_v60 = vrot.slane %v1394_v36, 7  ;;  %v6417_v3 = vld [vmem:[#allocation2 + $0x20] sm:$0xf0] }
 0x131   : > { %v1770_v4 = vrot.slane %v1394_v36, 4  ;;  %v1771_v31 = vrot.slane %v1397_v12, 5  ;;  %v7827_v40 = vrot.slane %v1522_v29, 7  ;;  %vm787_vm12 = vweird.f32 %v7788_v51  ;;  %1737 = vst [vmem:[#allocation2 + $0x10c] sm:$0xf] %v1224_v61 }
 0x132   : > { %v7832_v35 = vpop.eup %6796  ;;  %v1967_v24 = vsel %vm7593_vm1, %v1841_v38, %v1966_v16  ;;  %v7836_v33 = vrot.slane %v1522_v29, 4  ;;  %v7838_v43 = vrot.slane %v1525_v5, 5  ;;  %v1209_v44 = vpack.c.bf16 %v1177_v30, %v1177_v30  ;;  %v1284_v13 = vld [vmem:[#allocation2 + $0x120] sm:$0x1]  ;;  %v6348_v26 = vld [vmem:[#allocation2 + $0x20] sm:$0xf0]  ;;  %v504_v30 = vpop.f32.mrf.mxu0 }
 0x133   : > { %1968 = vst [vmem:[#allocation2 + $0x104] sm:$0xf] %v1967_v24  ;;  %v1399_v18 = vor.u32 %v1397_v12, %v1396_v60  ;;  %v1772_v48 = vor.u32 %v1771_v31, %v1770_v4  ;;  %v1527_v50 = vor.u32 %v1525_v5, %v7827_v40  ;;  %vm1013_vm0 = vweird.f32 %v7790_v32  ;;  %v1317_v31 = vld [vmem:[#allocation2 + $0x74] sm:$0x8] }
 0x134   : > { %v1400_v52 = vrot.slane %v1396_v60, 4  ;;  %v1528_v45 = vrot.slane %v7827_v40, 4  ;;  %v1402_v6 = vshrl.u32 %v1209_v44, 16  ;;  %v1405_v41 = vshll.u32 %v1209_v44, 16  ;;  %1722 = vst [vmem:[#allocation2 + $0x58] sm:$0xf] %v1209_v44  ;;  %vm1014_vm3 = vmor %vm1012_vm11, %vm1013_vm0 }
 0x135   : > { %v1662_v55 = vsel %vm7502_vm6, %v1399_v18, %v1661_v37  ;;  %v1694_v1 = vsel %vm7502_vm6, %v1527_v50, %v1693_v42  ;;  %v1844_v58 = vor.u32 %v7838_v43, %v7836_v33  ;;  %v1011_v63 = vadd.f32 %v7790_v32, %v1010_v27  ;;  %v5720_v37 = vld [vmem:[#allocation2 + $0x18] sm:$0xf]  ;;  %v7891_v60 = vld [vmem:[%s9555_s2] ss:$0 sm:$0xff]  ;;  %v6441_v18 = vld [vmem:[#allocation2 + $0xe0] sm:$0xf0] }
 0x136   : > { %1663 = vst [vmem:[#allocation2 + $0x48] sm:$0xf] %v1662_v55  ;;  %v1773_v19 = vrot.slane %v1772_v48, 4  ;;  %v1404_v8 = vrot.slane %v1402_v6, 7  ;;  %v1774_v59 = vrot.slane %v1405_v41, 5  ;;  %v1776_v10 = vrot.slane %v1402_v6, 4 }
 0x137   : > { %1695 = vst [vmem:[#allocation2 + $0x108] sm:$0xf] %v1694_v1  ;;  %v1015_v22 = vsel %vm1014_vm3, %v7790_v32, %v1011_v63  ;;  %v783_v39 = vmul.f32 %v7832_v35, %v7788_v51  ;;  %vm788_vm15 = vweird.f32 %v7832_v35  ;;  %v791_v53 = vand.u32 2147483647, %v7788_v51  ;;  %v5434_v48 = vld [vmem:[#allocation2 + $0x3c] sm:$0xf0] }
 0x138   : > { %v1407_v61 = vor.u32 %v1405_v41, %v1404_v8  ;;  %v1775_v15 = vsel %vm7570_vm7, %v1773_v19, %v1774_v59  ;;  %v1777_v14 = vor.u32 %v1776_v10, %v1774_v59  ;;  %v1020_v32 = vsel %vm7817_vm13, %v7796_v7, %v1015_v22  ;;  %v5420_v7 = vld [vmem:[#allocation2 + $0x18] sm:$0xf]  ;;  %vm7884_vm4 = vmor %vm787_vm12, %vm788_vm15 }
 0x139   : > { %1937 = vst [vmem:[#allocation2 + $0x50] sm:$0xf] %v1775_v15  ;;  %v1193_v54 = vmul.f32 %v1020_v32, %v7667_v46  ;;  %v784_v16 = vsub.f32 1.0, %v783_v39  ;;  %vm7865_vm14 = vcmp.eq.f32.partialorder %v791_v53, 8.507059e+37  ;;  %v793_v36 = vand.u32 2147483648, %v7788_v51 }
 0x13a   : > { %v1408_v12 = vsel %vm7582_vm10, %v1400_v52, %v1407_v61  ;;  %v1778_v29 = vrot.slane %v1777_v14, 4  ;;  %v1261_v5 = vsel %vm7347_vm2, 0, %v1260_v11  ;;  %6798 = vpow2.f32 %v7721_v49  ;;  %v1970_v53 = vld [vmem:[#allocation2 + $0x11c] sm:$0xf]  ;;  %v1341_v15 = vld [vmem:[#allocation2 + $0x134] sm:$0x8] }
 0x13b   : > { %1664 = vst [vmem:[#allocation2 + $0x54] sm:$0xf] %v1408_v12  ;;  %v1225_v21 = vpack.c.bf16 %v1193_v54, %v1193_v54  ;;  %v785_v46 = vmul.f32 %v7832_v35, %v784_v16  ;;  %v794_v0 = vor.u32 1.1754944e-38, %v793_v36  ;;  %v1285_v38 = vsel %vm7347_vm2, 0, %v1284_v13  ;;  %v506_v36 = vpop.f32.mrf.mxu0 }
 0x13c   : > { %v1939_v27 = vsel %vm7593_vm1, %v1778_v29, %v1938_v2  ;;  %1262 = vst [vmem:[#allocation2 + $0x60] sm:$0x1] %v1261_v5  ;;  %v7895_v4 = vadd.f32 %v7891_v60, %v7830_v57  ;;  %v5421_v24 = vor.u32 %v6417_v3, %v5420_v7  ;;  %v5721_v42 = vor.u32 %v6348_v26, %v5720_v37  ;;  %v6419_v3 = vld [vmem:[#allocation2 + $0x34] sm:$0xf]  ;;  %v6420_v7 = vld [vmem:[#allocation2 + $0x38] sm:$0xf0] }
 0x13d   : > { %1940 = vst [vmem:[#allocation2 + $0x5c] sm:$0xf] %v1939_v27  ;;  %v1530_v33 = vshrl.u32 %v1225_v21, 16  ;;  %v1533_v51 = vshll.u32 %v1225_v21, 16  ;;  %v786_v43 = vadd.f32 %v7832_v35, %v785_v46  ;;  %v1318_v44 = vsel %vm7367_vm5, 0, %v1317_v31 }
 0x13e   : > { %v1845_v50 = vrot.slane %v1844_v58, 4  ;;  %1738 = vst [vmem:[#allocation2 + $0x118] sm:$0xf] %v1225_v21  ;;  %v5393_v52 = vmul.f32 -1.442695, %v7895_v4  ;;  %2626 = vmatmul.bf16.vlgmr.msra.gmra.mxu1 %v5421_v24  ;;  %3298 = vmatmul.bf16.gmra.mxu0 %v5721_v42  ;;  %v7902_v57 = vadd.f32 %v7891_v60, %v541_v56  ;;  %v7905_v6 = vadd.f32 %v7891_v60, %v504_v30  ;;  %v544_v56 = vpop.f32.mrf.mxu2 }
 0x13f   : > { %v1532_v41 = vrot.slane %v1530_v33, 7  ;;  %v1846_v55 = vrot.slane %v1533_v51, 5  ;;  %v1848_v1 = vrot.slane %v1530_v33, 4  ;;  %v790_v63 = vsel %vm7884_vm4, %v7832_v35, %v786_v43  ;;  %1286 = vst [vmem:[#allocation2 + $0x120] sm:$0x1] %v1285_v38 }
 0x140   : > { %v6799_v58 = vpop.eup %6798  ;;  %v795_v19 = vsel %vm7865_vm14, %v794_v0, %v790_v63  ;;  %6800 = vpow2.f32 %v5393_v52  ;;  %1319 = vst [vmem:[#allocation2 + $0x74] sm:$0x8] %v1318_v44  ;;  %v5409_v8 = vmul.f32 -1.442695, %v7902_v57  ;;  %v5394_v59 = vmul.f32 -1.442695, %v7905_v6 }
 0x141   : > { %v1535_v10 = vor.u32 %v1533_v51, %v1532_v41  ;;  %v1847_v22 = vsel %vm7570_vm7, %v1845_v50, %v1846_v55  ;;  %v1849_v39 = vor.u32 %v1848_v1, %v1846_v55  ;;  %v1178_v11 = vmul.f32 %v795_v19, %v7678_v62  ;;  %v5516_v35 = vld [vmem:[#allocation2 + $0xd8] sm:$0xf]  ;;  %v5432_v37 = vld [vmem:[#allocation2 + $0x30] sm:$0xf]  ;;  %v6351_v30 = vld [vmem:[#allocation2 + $0x38] sm:$0xf0] }
 0x142   : > { %1969 = vst [vmem:[#allocation2 + $0x110] sm:$0xf] %v1847_v22  ;;  %v7917_v61 = vadd.f32 1.0, %v6799_v58  ;;  %6802 = vpow2.f32 %v5409_v8  ;;  %v5517_v14 = vor.u32 %v6441_v18, %v5516_v35  ;;  %v5437_v2 = vor.u32 %v6419_v3, %v5434_v48  ;;  %v5732_v51 = vld [vmem:[#allocation2 + $0x30] sm:$0xf]  ;;  %v6487_v58 = vld [vmem:[#allocation8 + $0x178] sm:$0xff] }
 0x143   : > { %v1536_v32 = vsel %vm7582_vm10, %v1528_v45, %v1535_v10  ;;  %v1850_v13 = vrot.slane %v1849_v39, 4  ;;  %v1210_v26 = vpack.c.bf16 %v1178_v11, %v1178_v11  ;;  %v1342_v54 = vsel %vm7367_vm5, 0, %v1341_v15  ;;  %v1263_v45 = vld [vmem:[#allocation2 + $0x78] sm:$0x1]  ;;  %v1665_v49 = vld [vmem:[#allocation2 + $0x60] sm:$0xf]  ;;  %2796 = vmatpush.bf16.msrb.mxu3 %v6487_v58 }
 0x144   : > { %1696 = vst [vmem:[#allocation2 + $0x114] sm:$0xf] %v1536_v32  ;;  %6804 = vrcp.f32 %v7917_v61  ;;  %v1033_v62 = vand.u32 2147483648, %v7917_v61  ;;  %2666 = vmatmul.bf16.vlgmr.msra.gmra.mxu3 %v5517_v14  ;;  %2720 = vmatmul.bf16.gmra.mxu2 %v5437_v2  ;;  %v1031_v29 = vand.u32 2147483647, %v7917_v61  ;;  %v7931_v5 = vadd.f32 %v7891_v60, %v544_v56 }
 0x145   : > { %v1971_v16 = vsel %vm7593_vm1, %v1850_v13, %v1970_v53  ;;  %v1410_v17 = vshrl.u32 %v1210_v26, 16  ;;  %v1413_v40 = vshll.u32 %v1210_v26, 16  ;;  %1723 = vst [vmem:[#allocation2 + $0x64] sm:$0xf] %v1210_v26  ;;  %6806 = vpow2.f32 %v5394_v59  ;;  %v1287_v19 = vld [vmem:[#allocation2 + $0x138] sm:$0x1]  ;;  %v509_v26 = vpop.f32.mrf.mxu0 }
 0x146   : > { %v6801_v12 = vpop.eup %6800  ;;  %1972 = vst [vmem:[#allocation2 + $0x11c] sm:$0xf] %v1971_v16  ;;  %v1264_v31 = vsel %vm7347_vm2, 0, %v1263_v45  ;;  %vm1027_vm9 = vweird.f32 %v7917_v61  ;;  %v7941_v33 = vor.u32 1.1754944e-38, %v1033_v62  ;;  %v5410_v18 = vmul.f32 -1.442695, %v7931_v5  ;;  %v546_v59 = vpop.f32.mrf.mxu2 }
 0x147   : > { %v7933_v21 = vrot.slane %v1410_v17, 7  ;;  %v1779_v46 = vrot.slane %v1410_v17, 4  ;;  %v1780_v0 = vrot.slane %v1413_v40, 5  ;;  %v7935_v38 = vadd.f32 1.0, %v6801_v12  ;;  %1343 = vst [vmem:[#allocation2 + $0x134] sm:$0x8] %v1342_v54 }
 0x148   : > { %v6803_v27 = vpop.eup %6802  ;;  %1265 = vst [vmem:[#allocation2 + $0x78] sm:$0x1] %v1264_v31  ;;  %v5433_v48 = vor.u32 %v6420_v7, %v5432_v37  ;;  %v5733_v50 = vor.u32 %v6351_v30, %v5732_v51  ;;  %vm7954_vm8 = vcmp.eq.f32.partialorder %v1031_v29, 8.507059e+37  ;;  %v7959_v8 = vadd.f32 %v7891_v60, %v506_v36  ;;  %v6444_v15 = vld [vmem:[#allocation2 + $0xf8] sm:$0xf0] }
 0x149   : > { %v1415_v24 = vor.u32 %v1413_v40, %v7933_v21  ;;  %v1781_v42 = vor.u32 %v1780_v0, %v1779_v46  ;;  %6808 = vrcp.f32 %v7935_v38  ;;  %v7946_v44 = vadd.f32 1.0, %v6803_v27  ;;  %v5528_v36 = vld [vmem:[#allocation2 + $0xf0] sm:$0xf]  ;;  %v5446_v37 = vld [vmem:[#allocation2 + $0x54] sm:$0xf0] }
 0x14a   : > { %v7944_v43 = vpop.eup %6804  ;;  %v1416_v41 = vrot.slane %v7933_v21, 4  ;;  %vm802_vm11 = vweird.f32 %v7935_v38  ;;  %v806_v10 = vand.u32 2147483647, %v7935_v38  ;;  %v808_v22 = vand.u32 2147483648, %v7935_v38  ;;  %v1942_v51 = vld [vmem:[#allocation2 + $0x74] sm:$0xf] }
 0x14b   : > { %v6807_v52 = vpop.eup %6806  ;;  %v1666_v55 = vsel %vm7502_vm6, %v1415_v24, %v1665_v49  ;;  %v1023_v1 = vmul.f32 %v7944_v43, %v7917_v61  ;;  %6810 = vrcp.f32 %v7946_v44  ;;  %v7965_v39 = vrot.slane %v1781_v42, 4 }
 0x14c   : > { %1667 = vst [vmem:[#allocation2 + $0x60] sm:$0xf] %v1666_v55  ;;  %v1048_v11 = vand.u32 2147483648, %v7946_v44  ;;  %v7968_v35 = vadd.f32 1.0, %v6807_v52  ;;  %vm1028_vm13 = vweird.f32 %v7944_v43  ;;  %6812 = vpow2.f32 %v5410_v18  ;;  %v6422_v18 = vld [vmem:[#allocation2 + $0x4c] sm:$0xf] }
 0x14d   : > { %v1024_v53 = vsub.f32 1.0, %v1023_v1  ;;  %v1288_v3 = vsel %vm7347_vm2, 0, %v1287_v19  ;;  %v7974_v56 = vadd.f32 %v7891_v60, %v546_v59  ;;  %v1046_v32 = vand.u32 2147483647, %v7946_v44  ;;  %vm1029_vm14 = vmor %vm1027_vm9, %vm1028_vm13 }
 0x14e   : > { %2631 = vmatmul.bf16.gmra.mxu1 %v5433_v48  ;;  %3303 = vmatmul.bf16.gmra.mxu0 %v5733_v50  ;;  %6814 = vrcp.f32 %v7968_v35  ;;  %1289 = vst [vmem:[#allocation2 + $0x138] sm:$0x1] %v1288_v3  ;;  %v5395_v13 = vmul.f32 -1.442695, %v7959_v8  ;;  %vm7981_vm12 = vcmp.eq.f32.partialorder %v806_v10, 8.507059e+37  ;;  %v809_v16 = vor.u32 1.1754944e-38, %v808_v22 }
 0x14f   : > { %v6809_v14 = vpop.eup %6808  ;;  %v1025_v2 = vmul.f32 %v7944_v43, %v1024_v53  ;;  %v821_v17 = vand.u32 2147483647, %v7968_v35  ;;  %vm1042_vm3 = vweird.f32 %v7946_v44  ;;  %v1049_v45 = vor.u32 1.1754944e-38, %v1048_v11 }
 0x150   : > { %v798_v62 = vmul.f32 %v6809_v14, %v7935_v38  ;;  %vm803_vm0 = vweird.f32 %v6809_v14  ;;  %vm817_vm15 = vweird.f32 %v7968_v35  ;;  %v5411_v7 = vmul.f32 -1.442695, %v7974_v56 }
 0x151   : > { %v1026_v40 = vadd.f32 %v7944_v43, %v1025_v2  ;;  %v6811_v12 = vpop.eup %6810  ;;  %v7995_v46 = vadd.f32 %v7891_v60, %v509_v26  ;;  %v5529_v0 = vor.u32 %v6444_v15, %v5528_v36  ;;  %vm7999_vm4 = vcmp.eq.f32.partialorder %v1046_v32, 8.507059e+37 }
 0x152   : > { %v799_v29 = vsub.f32 1.0, %v798_v62  ;;  %v1038_v27 = vmul.f32 %v6811_v12, %v7946_v44  ;;  %v823_v31 = vand.u32 2147483648, %v7968_v35  ;;  %6816 = vpow2.f32 %v5395_v13  ;;  %v6813_v61 = vpop.eup %6812  ;;  %v1697_v44 = vld [vmem:[#allocation2 + $0x120] sm:$0xf] }
 0x153   : > { %v1030_v30 = vsel %vm1029_vm14, %v7944_v43, %v1026_v40  ;;  %vm8007_vm9 = vcmp.eq.f32.partialorder %v821_v17, 8.507059e+37  ;;  %v5396_v43 = vmul.f32 -1.442695, %v7995_v46  ;;  %v8013_v55 = vadd.f32 1.0, %v6813_v61 }
 0x154   : > { %v1035_v24 = vsel %vm7954_vm8, %v7941_v33, %v1030_v30  ;;  %v800_v42 = vmul.f32 %v6809_v14, %v799_v29  ;;  %2671 = vmatmul.bf16.gmra.mxu3 %v5529_v0  ;;  %v6815_v48 = vpop.eup %6814  ;;  %v1039_v52 = vsub.f32 1.0, %v1038_v27  ;;  %v5449_v1 = vor.u32 %v6422_v18, %v5446_v37  ;;  %vm804_vm8 = vmor %vm802_vm11, %vm803_vm0 }
 0x155   : > { %v1194_v50 = vmul.f32 %v1035_v24, %v7698_v20  ;;  %vm1043_vm13 = vweird.f32 %v6811_v12  ;;  %v813_v33 = vmul.f32 %v6815_v48, %v7968_v35  ;;  %6818 = vpow2.f32 %v5411_v7 }
 0x156   : > { %v801_v58 = vadd.f32 %v6809_v14, %v800_v42  ;;  %v1040_v19 = vmul.f32 %v6811_v12, %v1039_v52  ;;  %v824_v59 = vor.u32 1.1754944e-38, %v823_v31  ;;  %6820 = vrcp.f32 %v8013_v55  ;;  %2725 = vmatmul.bf16.gmra.mxu2 %v5449_v1  ;;  %vm1044_vm11 = vmor %vm1042_vm3, %vm1043_vm13 }
 0x157   : > { %v1226_v63 = vpack.c.bf16 %v1194_v50, %v1194_v50  ;;  %v814_v10 = vsub.f32 1.0, %v813_v33  ;;  %vm818_vm14 = vweird.f32 %v6815_v48  ;;  %6822 = vpow2.f32 %v5396_v43 }
 0x158   : > { %v805_v20 = vsel %vm804_vm8, %v6809_v14, %v801_v58  ;;  %v6817_v22 = vpop.eup %6816  ;;  %v1041_v15 = vadd.f32 %v6811_v12, %v1040_v19  ;;  %v1061_v14 = vand.u32 2147483647, %v8013_v55  ;;  %v1063_v32 = vand.u32 2147483648, %v8013_v55 }
 0x159   : > { %v1538_v53 = vshrl.u32 %v1226_v63, 16  ;;  %v1541_v11 = vshll.u32 %v1226_v63, 16  ;;  %1739 = vst [vmem:[#allocation2 + $0x124] sm:$0xf] %v1226_v63  ;;  %v810_v3 = vsel %vm7981_vm12, %v809_v16, %v805_v20  ;;  %v815_v2 = vmul.f32 %v6815_v48, %v814_v10  ;;  %vm8033_vm12 = vmor %vm817_vm15, %vm818_vm14 }
 0x15a   : > { %v1179_v38 = vmul.f32 %v810_v3, %v7895_v4  ;;  %v1045_v17 = vsel %vm1044_vm11, %v6811_v12, %v1041_v15  ;;  %v8041_v29 = vadd.f32 1.0, %v6817_v22  ;;  %vm1057_vm0 = vweird.f32 %v8013_v55  ;;  %v1974_v3 = vld [vmem:[#allocation2 + $0x134] sm:$0xf] }
 0x15b   : > { %v8028_v13 = vrot.slane %v1538_v53, 7  ;;  %v1851_v26 = vrot.slane %v1538_v53, 4  ;;  %v1852_v62 = vrot.slane %v1541_v11, 5  ;;  %v8037_v4 = vpop.eup %6818  ;;  %v1050_v40 = vsel %vm7999_vm4, %v1049_v45, %v1045_v17  ;;  %v6407_v17 = vld [vmem:[#allocation8 + $0x78] sm:$0xff] }
 0x15c   : > { %v1211_v16 = vpack.c.bf16 %v1179_v38, %v1179_v38  ;;  %v816_v36 = vadd.f32 %v6815_v48, %v815_v2  ;;  %v8043_v7 = vpop.eup %6820  ;;  %v1195_v37 = vmul.f32 %v1050_v40, %v7902_v57  ;;  %vm1062_vm4 = vcmp.eq.f32.partialorder %v1061_v14, 8.507059e+37  ;;  %3374 = vmatpush.bf16.msrb.mxu1 %v6407_v17 }
 0x15d   : > { %v1543_v12 = vor.u32 %v1541_v11, %v8028_v13  ;;  %v1544_v35 = vrot.slane %v8028_v13, 4  ;;  %v1853_v0 = vor.u32 %v1852_v62, %v1851_v26  ;;  %v8049_v30 = vpop.eup %6822  ;;  %v1053_v49 = vmul.f32 %v8043_v7, %v8013_v55  ;;  %v1669_v26 = vld [vmem:[#allocation2 + $0x78] sm:$0xf] }
 0x15e   : > { %v1418_v27 = vshrl.u32 %v1211_v16, 16  ;;  %v1421_v31 = vshll.u32 %v1211_v16, 16  ;;  %1724 = vst [vmem:[#allocation2 + $0x70] sm:$0xf] %v1211_v16  ;;  %v820_v45 = vsel %vm8033_vm12, %v6815_v48, %v816_v36  ;;  %v1227_v42 = vpack.c.bf16 %v1195_v37, %v1195_v37  ;;  %v549_v16 = vpop.f32.mrf.mxu2 }
 0x15f   : > { %v1698_v61 = vsel %vm7502_vm6, %v1543_v12, %v1697_v44  ;;  %v1854_v24 = vrot.slane %v1853_v0, 4  ;;  %v825_v57 = vsel %vm8007_vm9, %v824_v59, %v820_v45  ;;  %v1054_v48 = vsub.f32 1.0, %v1053_v49  ;;  %v1320_v0 = vld [vmem:[#allocation2 + $0x8c] sm:$0x8]  ;;  %v1266_v49 = vld [vmem:[#allocation2 + $0x90] sm:$0x1] }
 0x160   : > { %1699 = vst [vmem:[#allocation2 + $0x120] sm:$0xf] %v1698_v61  ;;  %v1420_v43 = vrot.slane %v1418_v27, 7  ;;  %v1783_v18 = vrot.slane %v1421_v31, 5  ;;  %v1785_v50 = vrot.slane %v1418_v27, 4  ;;  %v1180_v52 = vmul.f32 %v825_v57, %v7905_v6 }
 0x161   : > { %v1546_v1 = vshrl.u32 %v1227_v42, 16  ;;  %v1549_v58 = vshll.u32 %v1227_v42, 16  ;;  %1740 = vst [vmem:[#allocation2 + $0x130] sm:$0xf] %v1227_v42  ;;  %vm1058_vm3 = vweird.f32 %v8043_v7  ;;  %v1055_v6 = vmul.f32 %v8043_v7, %v1054_v48  ;;  %v1344_v27 = vld [vmem:[#allocation2 + $0x14c] sm:$0x8] }
 0x162   : > { %v1423_v33 = vor.u32 %v1421_v31, %v1420_v43  ;;  %v1784_v63 = vsel %vm7570_vm7, %v7965_v39, %v1783_v18  ;;  %v1786_v19 = vor.u32 %v1785_v50, %v1783_v18  ;;  %v1212_v59 = vpack.c.bf16 %v1180_v52, %v1180_v52  ;;  %vm8080_vm15 = vmor %vm1057_vm0, %vm1058_vm3  ;;  %v511_v31 = vpop.f32.mrf.mxu0 }
 0x163   : > { %1941 = vst [vmem:[#allocation2 + $0x68] sm:$0xf] %v1784_v63  ;;  %v1548_v20 = vrot.slane %v1546_v1, 7  ;;  %v1855_v10 = vrot.slane %v1549_v58, 5  ;;  %v1857_v22 = vrot.slane %v1546_v1, 4  ;;  %v1056_v62 = vadd.f32 %v8043_v7, %v1055_v6 }
 0x164   : > { %v1424_v53 = vsel %vm7582_vm10, %v1416_v41, %v1423_v33  ;;  %v1787_v11 = vrot.slane %v1786_v19, 4  ;;  %v1426_v15 = vshrl.u32 %v1212_v59, 16  ;;  %v1429_v38 = vshll.u32 %v1212_v59, 16  ;;  %1725 = vst [vmem:[#allocation2 + $0x7c] sm:$0xf] %v1212_v59  ;;  %v6486_v33 = vld [vmem:[#allocation8 + $0x170] sm:$0xff] }
 0x165   : > { %1668 = vst [vmem:[#allocation2 + $0x6c] sm:$0xf] %v1424_v53  ;;  %v1551_v39 = vor.u32 %v1549_v58, %v1548_v20  ;;  %v1856_v2 = vsel %vm7570_vm7, %v1854_v24, %v1855_v10  ;;  %v1858_v13 = vor.u32 %v1857_v22, %v1855_v10  ;;  %v1064_v44 = vor.u32 1.1754944e-38, %v1063_v32  ;;  %2797 = vmatpush.bf16.msrb.mxu3 %v6486_v33 }
 0x166   : > { %v1943_v21 = vsel %vm7593_vm1, %v1787_v11, %v1942_v51  ;;  %1973 = vst [vmem:[#allocation2 + $0x128] sm:$0xf] %v1856_v2  ;;  %v8074_v41 = vrot.slane %v1426_v15, 7  ;;  %v1060_v12 = vsel %vm8080_vm15, %v8043_v7, %v1056_v62  ;;  %6824 = vrcp.f32 %v8041_v29  ;;  %v1701_v51 = vld [vmem:[#allocation2 + $0x138] sm:$0xf]  ;;  %v551_v6 = vpop.f32.mrf.mxu2 }
 0x167   : > { %1944 = vst [vmem:[#allocation2 + $0x74] sm:$0xf] %v1943_v21  ;;  %v1552_v40 = vsel %vm7582_vm10, %v1544_v35, %v1551_v39  ;;  %v1859_v36 = vrot.slane %v1858_v13, 4  ;;  %v1788_v37 = vrot.slane %v1426_v15, 4  ;;  %v1789_v55 = vrot.slane %v1429_v38, 5 }
 0x168   : > { %1700 = vst [vmem:[#allocation2 + $0x12c] sm:$0xf] %v1552_v40  ;;  %v1431_v14 = vor.u32 %v1429_v38, %v8074_v41  ;;  %v1065_v32 = vsel %vm1062_vm4, %v1064_v44, %v1060_v12  ;;  %v1321_v61 = vsel %vm7367_vm5, 0, %v1320_v0  ;;  %v8103_v42 = vadd.f32 1.0, %v8037_v4  ;;  %v6423_v15 = vld [vmem:[#allocation2 + $0x50] sm:$0xf0] }
 0x169   : > { %v1975_v35 = vsel %vm7593_vm1, %v1859_v36, %v1974_v3  ;;  %v1196_v45 = vmul.f32 %v1065_v32, %v7931_v5  ;;  %v1345_v57 = vsel %vm7367_vm5, 0, %v1344_v27  ;;  %v1790_v43 = vor.u32 %v1789_v55, %v1788_v37  ;;  %1322 = vst [vmem:[#allocation2 + $0x8c] sm:$0x8] %v1321_v61  ;;  %v6354_v38 = vld [vmem:[#allocation2 + $0x50] sm:$0xf0] }
 0x16a   : > { %1976 = vst [vmem:[#allocation2 + $0x134] sm:$0xf] %v1975_v35  ;;  %v1670_v7 = vsel %vm7502_vm6, %v1431_v14, %v1669_v26  ;;  %v836_v18 = vand.u32 2147483647, %v8041_v29  ;;  %v8109_v5 = vadd.f32 1.0, %v8049_v30  ;;  %v1267_v50 = vsel %vm7347_vm2, 0, %v1266_v49  ;;  %v514_v17 = vpop.f32.mrf.mxu0 }
 0x16b   : > { %1671 = vst [vmem:[#allocation2 + $0x78] sm:$0xf] %v1670_v7  ;;  %v1228_v24 = vpack.c.bf16 %v1196_v45, %v1196_v45  ;;  %v838_v4 = vand.u32 2147483648, %v8041_v29  ;;  %6826 = vrcp.f32 %v8103_v42  ;;  %v1432_v58 = vrot.slane %v8074_v41, 4  ;;  %v1290_v26 = vld [vmem:[#allocation2 + $0x150] sm:$0x1] }
 0x16c   : > { %v8113_v52 = vpop.eup %6824  ;;  %1346 = vst [vmem:[#allocation2 + $0x14c] sm:$0x8] %v1345_v57  ;;  %v8121_v30 = vadd.f32 %v7891_v60, %v549_v16  ;;  %vm832_vm9 = vweird.f32 %v8041_v29  ;;  %6828 = vrcp.f32 %v8109_v5  ;;  %v8127_v59 = vrot.slane %v1790_v43, 4  ;;  %v5444_v40 = vld [vmem:[#allocation2 + $0x48] sm:$0xf] }
 0x16d   : > { %v1554_v1 = vshrl.u32 %v1228_v24, 16  ;;  %1741 = vst [vmem:[#allocation2 + $0x13c] sm:$0xf] %v1228_v24  ;;  %v828_v48 = vmul.f32 %v8113_v52, %v8041_v29  ;;  %v1557_v19 = vshll.u32 %v1228_v24, 16  ;;  %vm8129_vm13 = vcmp.eq.f32.partialorder %v836_v18, 8.507059e+37 }
 0x16e   : > { %1268 = vst [vmem:[#allocation2 + $0x90] sm:$0x1] %v1267_v50  ;;  %v1076_v22 = vand.u32 2147483647, %v8103_v42  ;;  %vm833_vm8 = vweird.f32 %v8113_v52  ;;  %v839_v11 = vor.u32 1.1754944e-38, %v838_v4  ;;  %v1078_v3 = vand.u32 2147483648, %v8103_v42 }
 0x16f   : > { %v8123_v63 = vrot.slane %v1554_v1, 7  ;;  %v829_v20 = vsub.f32 1.0, %v828_v48  ;;  %v8137_v39 = vrot.slane %v1554_v1, 4  ;;  %vm1072_vm14 = vweird.f32 %v8103_v42  ;;  %v5744_v36 = vld [vmem:[#allocation2 + $0x48] sm:$0xf]  ;;  %vm834_vm0 = vmor %vm832_vm9, %vm833_vm8 }
 0x170   : > { %v5412_v13 = vmul.f32 -1.442695, %v8121_v30  ;;  %v8143_v62 = vadd.f32 %v7891_v60, %v511_v31  ;;  %v8149_v44 = vrot.slane %v1557_v19, 5  ;;  %vm847_vm11 = vweird.f32 %v8109_v5  ;;  %v6447_v45 = vld [vmem:[#allocation2 + $0x110] sm:$0xf0] }
 0x171   : > { %v1559_v53 = vor.u32 %v1557_v19, %v8123_v63  ;;  %v830_v2 = vmul.f32 %v8113_v52, %v829_v20  ;;  %v8145_v21 = vpop.eup %6826  ;;  %v1291_v16 = vsel %vm7347_vm2, 0, %v1290_v26  ;;  %vm8157_vm12 = vcmp.eq.f32.partialorder %v1076_v22, 8.507059e+37  ;;  %v1323_v24 = vld [vmem:[#allocation2 + $0xa4] sm:$0x8]  ;;  %v5458_v57 = vld [vmem:[#allocation2 + $0x6c] sm:$0xf0] }
 0x172   : > { %v1068_v0 = vmul.f32 %v8145_v21, %v8103_v42  ;;  %v851_v37 = vand.u32 2147483647, %v8109_v5  ;;  %v853_v55 = vand.u32 2147483648, %v8109_v5  ;;  %v8163_v32 = vpop.eup %6828  ;;  %6830 = vpow2.f32 %v5412_v13  ;;  %1292 = vst [vmem:[#allocation2 + $0x150] sm:$0x1] %v1291_v16 }
 0x173   : > { %v1702_v54 = vsel %vm7502_vm6, %v1559_v53, %v1701_v51  ;;  %v831_v12 = vadd.f32 %v8113_v52, %v830_v2  ;;  %v5397_v27 = vmul.f32 -1.442695, %v8143_v62  ;;  %v5445_v31 = vor.u32 %v6423_v15, %v5444_v40  ;;  %v5540_v50 = vld [vmem:[#allocation2 + $0x108] sm:$0xf]  ;;  %v6425_v48 = vld [vmem:[#allocation2 + $0x64] sm:$0xf] }
 0x174   : > { %1703 = vst [vmem:[#allocation2 + $0x138] sm:$0xf] %v1702_v54  ;;  %v5745_v35 = vor.u32 %v6354_v38, %v5744_v36  ;;  %v1069_v7 = vsub.f32 1.0, %v1068_v0  ;;  %vm1073_vm3 = vweird.f32 %v8145_v21  ;;  %v843_v61 = vmul.f32 %v8163_v32, %v8109_v5 }
 0x175   : > { %v835_v49 = vsel %vm834_vm0, %v8113_v52, %v831_v12  ;;  %vm848_vm15 = vweird.f32 %v8163_v32  ;;  %v1324_v43 = vsel %vm7367_vm5, 0, %v1323_v24  ;;  %2636 = vmatmul.bf16.gmra.mxu1 %v5445_v31  ;;  %v8180_v18 = vadd.f32 %v7891_v60, %v551_v6  ;;  %vm1074_vm4 = vmor %vm1072_vm14, %vm1073_vm3 }
 0x176   : > { %v840_v29 = vsel %vm8129_vm13, %v839_v11, %v835_v49  ;;  %3308 = vmatmul.bf16.gmra.mxu0 %v5745_v35  ;;  %v1070_v1 = vmul.f32 %v8145_v21, %v1069_v7  ;;  %v844_v4 = vsub.f32 1.0, %v843_v61  ;;  %6832 = vpow2.f32 %v5397_v27  ;;  %1325 = vst [vmem:[#allocation2 + $0xa4] sm:$0x8] %v1324_v43  ;;  %vm8206_vm13 = vmor %vm847_vm11, %vm848_vm15  ;;  %v5456_v7 = vld [vmem:[#allocation2 + $0x60] sm:$0xf] }
 0x177   : > { %v1181_v52 = vmul.f32 %v840_v29, %v7959_v8  ;;  %v5413_v33 = vmul.f32 -1.442695, %v8180_v18  ;;  %v8186_v19 = vadd.f32 %v7891_v60, %v514_v17  ;;  %v5541_v51 = vor.u32 %v6447_v45, %v5540_v50  ;;  %v554_v8 = vpop.f32.mrf.mxu2  ;;  %v516_v17 = vpop.f32.mrf.mxu0  ;;  %v1946_v45 = vld [vmem:[#allocation2 + $0x8c] sm:$0xf]  ;;  %v6406_v50 = vld [vmem:[#allocation8 + $0x70] sm:$0xff] }
 0x178   : > { %v5461_v20 = vor.u32 %v6425_v48, %v5458_v57  ;;  %v1071_v22 = vadd.f32 %v8145_v21, %v1070_v1  ;;  %v1079_v6 = vor.u32 1.1754944e-38, %v1078_v3  ;;  %v845_v53 = vmul.f32 %v8163_v32, %v844_v4  ;;  %v6831_v11 = vpop.eup %6830  ;;  %3375 = vmatpush.bf16.msrb.mxu1 %v6406_v50 }
 0x179   : > { %v1213_v10 = vpack.c.bf16 %v1181_v52, %v1181_v52  ;;  %v1862_v15 = vor.u32 %v8149_v44, %v8137_v39  ;;  %vm8196_vm9 = vcmp.eq.f32.partialorder %v851_v37, 8.507059e+37  ;;  %v854_v2 = vor.u32 1.1754944e-38, %v853_v55  ;;  %2676 = vmatmul.bf16.gmra.mxu3 %v5541_v51 }
 0x17a   : > { %6834 = vpow2.f32 %v5413_v33  ;;  %2730 = vmatmul.bf16.gmra.mxu2 %v5461_v20  ;;  %v1075_v26 = vsel %vm1074_vm4, %v8145_v21, %v1071_v22  ;;  %v846_v39 = vadd.f32 %v8163_v32, %v845_v53  ;;  %v8212_v44 = vadd.f32 1.0, %v6831_v11  ;;  %v1978_v11 = vld [vmem:[#allocation2 + $0x14c] sm:$0xf] }
 0x17b   : > { %v1434_v3 = vshrl.u32 %v1213_v10, 16  ;;  %v1437_v13 = vshll.u32 %v1213_v10, 16  ;;  %1726 = vst [vmem:[#allocation2 + $0x88] sm:$0xf] %v1213_v10  ;;  %v1080_v54 = vsel %vm8157_vm12, %v1079_v6, %v1075_v26  ;;  %v5398_v16 = vmul.f32 -1.442695, %v8186_v19 }
 0x17c   : > { %v8216_v21 = vadd.f32 %v7891_v60, %v554_v8  ;;  %v6833_v40 = vpop.eup %6832  ;;  %v1197_v5 = vmul.f32 %v1080_v54, %v7974_v56  ;;  %v1863_v37 = vrot.slane %v1862_v15, 4  ;;  %v850_v55 = vsel %vm8206_vm13, %v8163_v32, %v846_v39  ;;  %v6426_v56 = vld [vmem:[#allocation2 + $0x68] sm:$0xf0] }
 0x17d   : > { %v1436_v36 = vrot.slane %v1434_v3, 7  ;;  %v1792_v12 = vrot.slane %v1437_v13, 5  ;;  %v1794_v0 = vrot.slane %v1434_v3, 4  ;;  %6836 = vrcp.f32 %v8212_v44 }
 0x17e   : > { %v8224_v14 = vadd.f32 %v7891_v60, %v516_v17  ;;  %v1229_v49 = vpack.c.bf16 %v1197_v5, %v1197_v5  ;;  %v855_v32 = vsel %vm8196_vm9, %v854_v2, %v850_v55  ;;  %v8231_v24 = vadd.f32 1.0, %v6833_v40 }
 0x17f   : > { %v1439_v27 = vor.u32 %v1437_v13, %v1436_v36  ;;  %v1793_v31 = vsel %vm7570_vm7, %v8127_v59, %v1792_v12  ;;  %v1795_v35 = vor.u32 %v1794_v0, %v1792_v12  ;;  %6838 = vpow2.f32 %v5398_v16  ;;  %v1673_v12 = vld [vmem:[#allocation2 + $0x90] sm:$0xf] }
 0x180   : > { %v6835_v61 = vpop.eup %6834  ;;  %1945 = vst [vmem:[#allocation2 + $0x80] sm:$0xf] %v1793_v31  ;;  %v8234_v60 = vmul.f32 -1.442695, %v8216_v21  ;;  %v1562_v29 = vshrl.u32 %v1229_v49, 16  ;;  %v1565_v43 = vshll.u32 %v1229_v49, 16  ;;  %v1182_v52 = vmul.f32 %v855_v32, %v7995_v46 }
 0x181   : > { %v1440_v59 = vsel %vm7582_vm10, %v1432_v58, %v1439_v27  ;;  %v1796_v57 = vrot.slane %v1795_v35, 4  ;;  %1742 = vst [vmem:[#allocation2 + $0x148] sm:$0xf] %v1229_v49  ;;  %6840 = vrcp.f32 %v8231_v24  ;;  %v8243_v1 = vmul.f32 -1.442695, %v8224_v14 }
 0x182   : > { %1672 = vst [vmem:[#allocation2 + $0x84] sm:$0xf] %v1440_v59  ;;  %v5457_v4 = vor.u32 %v6426_v56, %v5456_v7  ;;  %v1564_v48 = vrot.slane %v1562_v29, 7  ;;  %v1864_v33 = vrot.slane %v1565_v43, 5  ;;  %v1866_v58 = vrot.slane %v1562_v29, 4  ;;  %v6485_v56 = vld [vmem:[#allocation8 + $0x168] sm:$0xff] }
 0x183   : > { %v1947_v41 = vsel %vm7593_vm1, %v1796_v57, %v1946_v45  ;;  %v6837_v51 = vpop.eup %6836  ;;  %v1560_v20 = vrot.slane %v8123_v63, 4  ;;  %v1214_v10 = vpack.c.bf16 %v1182_v52, %v1182_v52  ;;  %v1091_v46 = vand.u32 2147483647, %v8212_v44  ;;  %v1269_v52 = vld [vmem:[#allocation2 + $0xa8] sm:$0x1]  ;;  %2798 = vmatpush.bf16.msrb.mxu3 %v6485_v56 }
 0x184   : > { %1948 = vst [vmem:[#allocation2 + $0x8c] sm:$0xf] %v1947_v41  ;;  %v8249_v22 = vadd.f32 1.0, %v6835_v61  ;;  %v1567_v6 = vor.u32 %v1565_v43, %v1564_v48  ;;  %v1865_v53 = vsel %vm7570_vm7, %v1863_v37, %v1864_v33  ;;  %v1867_v8 = vor.u32 %v1866_v58, %v1864_v33  ;;  %v1347_v37 = vld [vmem:[#allocation2 + $0x164] sm:$0x8] }
 0x185   : > { %v1083_v15 = vmul.f32 %v6837_v51, %v8212_v44  ;;  %v6839_v38 = vpop.eup %6838  ;;  %1977 = vst [vmem:[#allocation2 + $0x140] sm:$0xf] %v1865_v53  ;;  %v1442_v2 = vshrl.u32 %v1214_v10, 16  ;;  %v1445_v3 = vshll.u32 %v1214_v10, 16  ;;  %vm1087_vm8 = vweird.f32 %v8212_v44  ;;  %2641 = vmatmul.bf16.gmra.mxu1 %v5457_v4  ;;  %v1293_v33 = vld [vmem:[#allocation2 + $0x168] sm:$0x1] }
 0x186   : > { %v1093_v63 = vand.u32 2147483648, %v8212_v44  ;;  %v1568_v13 = vsel %vm7582_vm10, %v1560_v20, %v1567_v6  ;;  %v1868_v26 = vrot.slane %v1867_v8, 4  ;;  %1727 = vst [vmem:[#allocation2 + $0x94] sm:$0xf] %v1214_v10  ;;  %v866_v42 = vand.u32 2147483647, %v8231_v24 }
 0x187   : > { %v1084_v39 = vsub.f32 1.0, %v1083_v15  ;;  %v6841_v17 = vpop.eup %6840  ;;  %1704 = vst [vmem:[#allocation2 + $0x144] sm:$0xf] %v1568_v13  ;;  %v8259_v54 = vrot.slane %v1442_v2, 7  ;;  %v1797_v16 = vrot.slane %v1442_v2, 4  ;;  %v1798_v40 = vrot.slane %v1445_v3, 5  ;;  %v556_v13 = vpop.f32.mrf.mxu2 }
 0x188   : > { %6842 = vrcp.f32 %v8249_v22  ;;  %v1979_v36 = vsel %vm7593_vm1, %v1868_v26, %v1978_v11  ;;  %vm1088_vm14 = vweird.f32 %v6837_v51  ;;  %v858_v5 = vmul.f32 %v6841_v17, %v8231_v24  ;;  %v5756_v8 = vld [vmem:[#allocation2 + $0x60] sm:$0xf]  ;;  %v6450_v2 = vld [vmem:[#allocation2 + $0x128] sm:$0xf0] }
 0x189   : > { %v1085_v0 = vmul.f32 %v6837_v51, %v1084_v39  ;;  %1980 = vst [vmem:[#allocation2 + $0x14c] sm:$0xf] %v1979_v36  ;;  %v1447_v55 = vor.u32 %v1445_v3, %v8259_v54  ;;  %vm8266_vm11 = vcmp.eq.f32.partialorder %v1091_v46, 8.507059e+37  ;;  %v1094_v31 = vor.u32 1.1754944e-38, %v1093_v63  ;;  %vm1089_vm3 = vmor %vm1087_vm8, %vm1088_vm14  ;;  %v6357_v46 = vld [vmem:[#allocation2 + $0x68] sm:$0xf0] }
 0x18a   : > { %v868_v35 = vand.u32 2147483648, %v8231_v24  ;;  %v859_v49 = vsub.f32 1.0, %v858_v5  ;;  %vm862_vm12 = vweird.f32 %v8231_v24  ;;  %vm8272_vm0 = vcmp.eq.f32.partialorder %v866_v42, 8.507059e+37  ;;  %v5552_v26 = vld [vmem:[#allocation2 + $0x120] sm:$0xf] }
 0x18b   : > { %v1086_v45 = vadd.f32 %v6837_v51, %v1085_v0  ;;  %v1674_v61 = vsel %vm7502_vm6, %v1447_v55, %v1673_v12  ;;  %v1799_v32 = vor.u32 %v1798_v40, %v1797_v16  ;;  %v1348_v59 = vsel %vm7367_vm5, 0, %v1347_v37  ;;  %v1326_v40 = vld [vmem:[#allocation2 + $0xbc] sm:$0x8] }
 0x18c   : > { %v8283_v57 = vadd.f32 1.0, %v6839_v38  ;;  %1675 = vst [vmem:[#allocation2 + $0x90] sm:$0xf] %v1674_v61  ;;  %v860_v43 = vmul.f32 %v6841_v17, %v859_v49  ;;  %vm863_vm15 = vweird.f32 %v6841_v17  ;;  %v1106_v50 = vand.u32 2147483647, %v8249_v22 }
 0x18d   : > { %v1090_v29 = vsel %vm1089_vm3, %v6837_v51, %v1086_v45  ;;  %v869_v44 = vor.u32 1.1754944e-38, %v868_v35  ;;  %v1108_v48 = vand.u32 2147483648, %v8249_v22  ;;  %1349 = vst [vmem:[#allocation2 + $0x164] sm:$0x8] %v1348_v59  ;;  %v1448_v58 = vrot.slane %v8259_v54, 4  ;;  %vm864_vm4 = vmor %vm862_vm12, %vm863_vm15  ;;  %v6405_v54 = vld [vmem:[#allocation8 + $0x68] sm:$0xff] }
 0x18e   : > { %v8286_v4 = vpop.eup %6842  ;;  %v1095_v41 = vsel %vm8266_vm11, %v1094_v31, %v1090_v29  ;;  %6844 = vrcp.f32 %v8283_v57  ;;  %v861_v20 = vadd.f32 %v6841_v17, %v860_v43  ;;  %v8296_v6 = vrot.slane %v1799_v32, 4  ;;  %3376 = vmatpush.bf16.msrb.mxu1 %v6405_v54  ;;  %v6429_v54 = vld [vmem:[#allocation2 + $0x80] sm:$0xf0] }
 0x18f   : > { %v1198_v51 = vmul.f32 %v1095_v41, %v8121_v30  ;;  %v1098_v10 = vmul.f32 %v8286_v4, %v8249_v22  ;;  %vm1102_vm9 = vweird.f32 %v8249_v22  ;;  %v1270_v53 = vsel %vm7347_vm2, 0, %v1269_v52 }
 0x190   : > { %6846 = vpow2.f32 %v8234_v60  ;;  %v865_v11 = vsel %vm864_vm4, %v6841_v17, %v861_v20  ;;  %vm8305_vm13 = vcmp.eq.f32.partialorder %v1106_v50, 8.507059e+37  ;;  %1271 = vst [vmem:[#allocation2 + $0xa8] sm:$0x1] %v1270_v53  ;;  %v1294_v24 = vsel %vm7347_vm2, 0, %v1293_v33 }
 0x191   : > { %v1230_v30 = vpack.c.bf16 %v1198_v51, %v1198_v51  ;;  %v1099_v15 = vsub.f32 1.0, %v1098_v10  ;;  %v870_v3 = vsel %vm8272_vm0, %v869_v44, %v865_v11  ;;  %v1109_v63 = vor.u32 1.1754944e-38, %v1108_v48  ;;  %1295 = vst [vmem:[#allocation2 + $0x168] sm:$0x1] %v1294_v24  ;;  %v1950_v24 = vld [vmem:[#allocation2 + $0xa4] sm:$0xf] }
 0x192   : > { %vm877_vm8 = vweird.f32 %v8283_v57  ;;  %v5757_v60 = vor.u32 %v6357_v46, %v5756_v8  ;;  %v1183_v17 = vmul.f32 %v870_v3, %v8143_v62  ;;  %vm1103_vm14 = vweird.f32 %v8286_v4  ;;  %v8328_v62 = vld [vmem:[%s9555_s2] ss:$0 sm:$0xff] }
 0x193   : > { %v1570_v39 = vshrl.u32 %v1230_v30, 16  ;;  %v1573_v42 = vshll.u32 %v1230_v30, 16  ;;  %1743 = vst [vmem:[#allocation2 + $0x154] sm:$0xf] %v1230_v30  ;;  %v1100_v16 = vmul.f32 %v8286_v4, %v1099_v15  ;;  %6848 = vpow2.f32 %v8243_v1  ;;  %v1705_v1 = vld [vmem:[#allocation2 + $0x150] sm:$0xf]  ;;  %vm1104_vm11 = vmor %vm1102_vm9, %vm1103_vm14 }
 0x194   : > { %v8316_v36 = vpop.eup %6844  ;;  %v1327_v12 = vsel %vm7367_vm5, 0, %v1326_v40  ;;  %3313 = vmatmul.bf16.gmra.mxu0 %v5757_v60  ;;  %v5553_v0 = vor.u32 %v6450_v2, %v5552_v26  ;;  %v1215_v37 = vpack.c.bf16 %v1183_v17, %v1183_v17  ;;  %v881_v55 = vand.u32 2147483647, %v8283_v57 }
 0x195   : > { %v8322_v5 = vrot.slane %v1570_v39, 7  ;;  %v8331_v27 = vadd.f32 %v8328_v62, %v556_v13  ;;  %v1869_v35 = vrot.slane %v1570_v39, 4  ;;  %v1101_v45 = vadd.f32 %v8286_v4, %v1100_v16  ;;  %1328 = vst [vmem:[#allocation2 + $0xbc] sm:$0x8] %v1327_v12 }
 0x196   : > { %v6847_v31 = vpop.eup %6846  ;;  %v873_v49 = vmul.f32 %v8316_v36, %v8283_v57  ;;  %v883_v7 = vand.u32 2147483648, %v8283_v57  ;;  %2681 = vmatmul.bf16.gmra.mxu3 %v5553_v0  ;;  %v1870_v61 = vrot.slane %v1573_v42, 5  ;;  %v1450_v32 = vshrl.u32 %v1215_v37, 16  ;;  %1728 = vst [vmem:[#allocation2 + $0xa0] sm:$0xf] %v1215_v37 }
 0x197   : > { %v1575_v56 = vor.u32 %v1573_v42, %v8322_v5  ;;  %vm878_vm12 = vweird.f32 %v8316_v36  ;;  %v1453_v59 = vshll.u32 %v1215_v37, 16  ;;  %v1105_v29 = vsel %vm1104_vm11, %v8286_v4, %v1101_v45  ;;  %v519_v4 = vpop.f32.mrf.mxu0 }
 0x198   : > { %v874_v43 = vsub.f32 1.0, %v873_v49  ;;  %v8344_v50 = vadd.f32 1.0, %v6847_v31  ;;  %v1452_v41 = vrot.slane %v1450_v32, 7  ;;  %v1803_v44 = vrot.slane %v1450_v32, 4  ;;  %vm8358_vm0 = vmor %vm877_vm8, %vm878_vm12 }
 0x199   : > { %v1706_v52 = vsel %vm7502_vm6, %v1575_v56, %v1705_v1  ;;  %v5415_v48 = vmul.f32 -1.442695, %v8331_v27  ;;  %v6849_v33 = vpop.eup %6848  ;;  %v1801_v51 = vrot.slane %v1453_v59, 5  ;;  %v1110_v22 = vsel %vm8305_vm13, %v1109_v63, %v1105_v29 }
 0x19a   : > { %1707 = vst [vmem:[#allocation2 + $0x150] sm:$0xf] %v1706_v52  ;;  %v875_v20 = vmul.f32 %v8316_v36, %v874_v43  ;;  %6850 = vrcp.f32 %v8344_v50  ;;  %v1455_v10 = vor.u32 %v1453_v59, %v1452_v41  ;;  %v1199_v46 = vmul.f32 %v1110_v22, %v8180_v18 }
 0x19b   : > { %vm8362_vm3 = vcmp.eq.f32.partialorder %v881_v55, 8.507059e+37  ;;  %v884_v30 = vor.u32 1.1754944e-38, %v883_v7  ;;  %v1871_v11 = vor.u32 %v1870_v61, %v1869_v35  ;;  %v1802_v15 = vsel %vm7570_vm7, %v8296_v6, %v1801_v51  ;;  %v1982_v7 = vld [vmem:[#allocation2 + $0x164] sm:$0xf] }
 0x19c   : > { %v1804_v38 = vor.u32 %v1803_v44, %v1801_v51  ;;  %v876_v18 = vadd.f32 %v8316_v36, %v875_v20  ;;  %v1456_v57 = vsel %vm7582_vm10, %v1448_v58, %v1455_v10  ;;  %1949 = vst [vmem:[#allocation2 + $0x98] sm:$0xf] %v1802_v15  ;;  %v1231_v2 = vpack.c.bf16 %v1199_v46, %v1199_v46  ;;  %v1677_v10 = vld [vmem:[#allocation2 + $0xa8] sm:$0xf] }
 0x19d   : > { %v8374_v3 = vadd.f32 1.0, %v6849_v33  ;;  %v8377_v63 = vadd.f32 %v8328_v62, %v519_v4  ;;  %v1576_v60 = vrot.slane %v8322_v5, 4  ;;  %1676 = vst [vmem:[#allocation2 + $0x9c] sm:$0xf] %v1456_v57  ;;  %6852 = vpow2.f32 %v5415_v48  ;;  %v5470_v57 = vld [vmem:[#allocation2 + $0x84] sm:$0xf0] }
 0x19e   : > { %v1805_v6 = vrot.slane %v1804_v38, 4  ;;  %v880_v13 = vsel %vm8358_vm0, %v8316_v36, %v876_v18  ;;  %v1578_v26 = vshrl.u32 %v1231_v2, 16  ;;  %v1581_v58 = vshll.u32 %v1231_v2, 16  ;;  %1744 = vst [vmem:[#allocation2 + $0x160] sm:$0xf] %v1231_v2 }
 0x19f   : > { %v885_v39 = vsel %vm8362_vm3, %v884_v30, %v880_v13  ;;  %6854 = vrcp.f32 %v8374_v3  ;;  %v1872_v17 = vrot.slane %v1871_v11, 4  ;;  %vm1117_vm15 = vweird.f32 %v8344_v50  ;;  %v1350_v36 = vld [vmem:[#allocation2 + $0x17c] sm:$0x8]  ;;  %v1272_v18 = vld [vmem:[#allocation2 + $0xc0] sm:$0x1]  ;;  %v521_v13 = vpop.f32.mrf.mxu0 }
 0x1a0   : > { %v6851_v42 = vpop.eup %6850  ;;  %v1951_v16 = vsel %vm7593_vm1, %v1805_v6, %v1950_v24  ;;  %v1184_v40 = vmul.f32 %v885_v39, %v8186_v19  ;;  %v1580_v12 = vrot.slane %v1578_v26, 7  ;;  %v1873_v0 = vrot.slane %v1581_v58, 5  ;;  %v559_v24 = vpop.f32.mrf.mxu2  ;;  %v6428_v6 = vld [vmem:[#allocation2 + $0x7c] sm:$0xf]  ;;  %v5564_v38 = vld [vmem:[#allocation2 + $0x138] sm:$0xf] }
 0x1a1   : > { %1952 = vst [vmem:[#allocation2 + $0xa4] sm:$0xf] %v1951_v16  ;;  %v1875_v5 = vrot.slane %v1578_v26, 4  ;;  %v1113_v37 = vmul.f32 %v6851_v42, %v8344_v50  ;;  %v1121_v31 = vand.u32 2147483647, %v8344_v50  ;;  %v1123_v1 = vand.u32 2147483648, %v8344_v50 }
 0x1a2   : > { %v1216_v55 = vpack.c.bf16 %v1184_v40, %v1184_v40  ;;  %v896_v35 = vand.u32 2147483647, %v8374_v3  ;;  %v1583_v45 = vor.u32 %v1581_v58, %v1580_v12  ;;  %v1874_v19 = vsel %vm7570_vm7, %v1872_v17, %v1873_v0  ;;  %v5468_v12 = vld [vmem:[#allocation2 + $0x78] sm:$0xf] }
 0x1a3   : > { %v1876_v49 = vor.u32 %v1875_v5, %v1873_v0  ;;  %v1114_v56 = vsub.f32 1.0, %v1113_v37  ;;  %v6853_v61 = vpop.eup %6852  ;;  %1981 = vst [vmem:[#allocation2 + $0x158] sm:$0xf] %v1874_v19  ;;  %vm1118_vm4 = vweird.f32 %v6851_v42  ;;  %v1351_v29 = vsel %vm7367_vm5, 0, %v1350_v36  ;;  %v1296_v19 = vld [vmem:[#allocation2 + $0x180] sm:$0x1] }
 0x1a4   : > { %v1458_v32 = vshrl.u32 %v1216_v55, 16  ;;  %v1461_v59 = vshll.u32 %v1216_v55, 16  ;;  %v1584_v52 = vsel %vm7582_vm10, %v1576_v60, %v1583_v45  ;;  %1729 = vst [vmem:[#allocation2 + $0xac] sm:$0xf] %v1216_v55  ;;  %v8402_v48 = vadd.f32 1.0, %v6853_v61  ;;  %vm1119_vm9 = vmor %vm1117_vm15, %vm1118_vm4 }
 0x1a5   : > { %v8398_v43 = vpop.eup %6854  ;;  %v1877_v41 = vrot.slane %v1876_v49, 4  ;;  %v1115_v44 = vmul.f32 %v6851_v42, %v1114_v56  ;;  %1708 = vst [vmem:[#allocation2 + $0x15c] sm:$0xf] %v1584_v52  ;;  %v898_v20 = vand.u32 2147483648, %v8374_v3  ;;  %v1124_v30 = vor.u32 1.1754944e-38, %v1123_v1 }
 0x1a6   : > { %v8404_v33 = vrot.slane %v1458_v32, 7  ;;  %v8406_v51 = vrot.slane %v1458_v32, 4  ;;  %v888_v22 = vmul.f32 %v8398_v43, %v8374_v3  ;;  %v1807_v46 = vrot.slane %v1461_v59, 5  ;;  %1352 = vst [vmem:[#allocation2 + $0x17c] sm:$0x8] %v1351_v29 }
 0x1a7   : > { %v1983_v4 = vsel %vm7593_vm1, %v1877_v41, %v1982_v7  ;;  %v1116_v53 = vadd.f32 %v6851_v42, %v1115_v44  ;;  %6856 = vrcp.f32 %v8402_v48  ;;  %vm1122_vm13 = vcmp.eq.f32.partialorder %v1121_v31, 8.507059e+37  ;;  %v6360_v31 = vld [vmem:[#allocation2 + $0x80] sm:$0xf0]  ;;  %v5768_v49 = vld [vmem:[#allocation2 + $0x78] sm:$0xf] }
 0x1a8   : > { %1984 = vst [vmem:[#allocation2 + $0x164] sm:$0xf] %v1983_v4  ;;  %v1463_v8 = vor.u32 %v1461_v59, %v8404_v33  ;;  %v889_v11 = vsub.f32 1.0, %v888_v22  ;;  %vm892_vm8 = vweird.f32 %v8374_v3  ;;  %vm8419_vm14 = vcmp.eq.f32.partialorder %v896_v35, 8.507059e+37  ;;  %v1709_v22 = vld [vmem:[#allocation2 + $0x168] sm:$0xf] }
 0x1a9   : > { %v1120_v15 = vsel %vm1119_vm9, %v6851_v42, %v1116_v53  ;;  %vm893_vm11 = vweird.f32 %v8398_v43  ;;  %v1808_v26 = vor.u32 %v1807_v46, %v8406_v51  ;;  %v899_v39 = vor.u32 1.1754944e-38, %v898_v20  ;;  %v6453_v46 = vld [vmem:[#allocation2 + $0x140] sm:$0xf0] }
 0x1aa   : > { %v1678_v2 = vsel %vm7502_vm6, %v1463_v8, %v1677_v10  ;;  %v1125_v60 = vsel %vm1122_vm13, %v1124_v30, %v1120_v15  ;;  %v890_v50 = vmul.f32 %v8398_v43, %v889_v11  ;;  %v5400_v42 = vmul.f32 -1.442695, %v8377_v63  ;;  %vm8443_vm0 = vmor %vm892_vm8, %vm893_vm11  ;;  %v1329_v10 = vld [vmem:[#allocation2 + $0xd4] sm:$0x8] }
 0x1ab   : > { %1679 = vst [vmem:[#allocation2 + $0xa8] sm:$0xf] %v1678_v2  ;;  %v1200_v58 = vmul.f32 %v1125_v60, %v8216_v21  ;;  %vm1132_vm12 = vweird.f32 %v8402_v48  ;;  %v1273_v16 = vsel %vm7347_vm2, 0, %v1272_v18  ;;  %v5473_v40 = vor.u32 %v6428_v6, %v5470_v57  ;;  %v6484_v11 = vld [vmem:[#allocation8 + $0x160] sm:$0xff] }
 0x1ac   : > { %v891_v17 = vadd.f32 %v8398_v43, %v890_v50  ;;  %v8435_v36 = vadd.f32 %v8328_v62, %v559_v24  ;;  %6858 = vpow2.f32 %v5400_v42  ;;  %1274 = vst [vmem:[#allocation2 + $0xc0] sm:$0x1] %v1273_v16  ;;  %v8448_v37 = vadd.f32 %v8328_v62, %v521_v13  ;;  %2799 = vmatpush.bf16.msrb.mxu3 %v6484_v11 }
 0x1ad   : > { %v8437_v0 = vpop.eup %6856  ;;  %v1232_v5 = vpack.c.bf16 %v1200_v58, %v1200_v58  ;;  %v5469_v55 = vor.u32 %v6429_v54, %v5468_v12  ;;  %v1136_v3 = vand.u32 2147483647, %v8402_v48  ;;  %2735 = vmatmul.bf16.gmra.mxu2 %v5473_v40  ;;  %v1138_v61 = vand.u32 2147483648, %v8402_v48 }
 0x1ae   : > { %v895_v1 = vsel %vm8443_vm0, %v8398_v43, %v891_v17  ;;  %v1128_v35 = vmul.f32 %v8437_v0, %v8402_v48  ;;  %v5416_v45 = vmul.f32 -1.442695, %v8435_v36  ;;  %v1297_v32 = vsel %vm7347_vm2, 0, %v1296_v19  ;;  %v561_v17 = vpop.f32.mrf.mxu2  ;;  %v5482_v48 = vld [vmem:[#allocation2 + $0x9c] sm:$0xf0] }
 0x1af   : > { %v1586_v7 = vshrl.u32 %v1232_v5, 16  ;;  %1745 = vst [vmem:[#allocation2 + $0x16c] sm:$0xf] %v1232_v5  ;;  %v900_v56 = vsel %vm8419_vm14, %v899_v39, %v895_v1  ;;  %2646 = vmatmul.bf16.gmra.mxu1 %v5469_v55  ;;  %v5401_v43 = vmul.f32 -1.442695, %v8448_v37  ;;  %v1809_v52 = vrot.slane %v1808_v26, 4 }
 0x1b0   : > { %v1185_v59 = vmul.f32 %v900_v56, %v8224_v14  ;;  %v1129_v29 = vsub.f32 1.0, %v1128_v35  ;;  %6860 = vpow2.f32 %v5416_v45  ;;  %1298 = vst [vmem:[#allocation2 + $0x180] sm:$0x1] %v1297_v32  ;;  %v1589_v44 = vshll.u32 %v1232_v5, 16  ;;  %v6431_v1 = vld [vmem:[#allocation2 + $0x94] sm:$0xf] }
 0x1b1   : > { %v8464_v41 = vrot.slane %v1586_v7, 7  ;;  %v5769_v51 = vor.u32 %v6360_v31, %v5768_v49  ;;  %vm1133_vm3 = vweird.f32 %v8437_v0  ;;  %6862 = vpow2.f32 %v5401_v43  ;;  %v1954_v35 = vld [vmem:[#allocation2 + $0xbc] sm:$0xf] }
 0x1b2   : > { %v1217_v20 = vpack.c.bf16 %v1185_v59, %v1185_v59  ;;  %v1130_v4 = vmul.f32 %v8437_v0, %v1129_v29  ;;  %v6859_v14 = vpop.eup %6858  ;;  %vm8469_vm15 = vcmp.eq.f32.partialorder %v1136_v3, 8.507059e+37  ;;  %v1139_v30 = vor.u32 1.1754944e-38, %v1138_v61  ;;  %vm1134_vm4 = vmor %vm1132_vm12, %vm1133_vm3  ;;  %v6404_v59 = vld [vmem:[#allocation8 + $0x60] sm:$0xff] }
 0x1b3   : > { %v1591_v53 = vor.u32 %v1589_v44, %v8464_v41  ;;  %v1330_v15 = vsel %vm7367_vm5, 0, %v1329_v10  ;;  %3318 = vmatmul.bf16.gmra.mxu0 %v5769_v51  ;;  %v8476_v2 = vadd.f32 1.0, %v6859_v14  ;;  %v1878_v50 = vrot.slane %v1586_v7, 4  ;;  %3377 = vmatpush.bf16.msrb.mxu1 %v6404_v59  ;;  %v6432_v10 = vld [vmem:[#allocation2 + $0x98] sm:$0xf0] }
 0x1b4   : > { %v1466_v18 = vshrl.u32 %v1217_v20, 16  ;;  %v1469_v57 = vshll.u32 %v1217_v20, 16  ;;  %1730 = vst [vmem:[#allocation2 + $0xb8] sm:$0xf] %v1217_v20  ;;  %v1131_v24 = vadd.f32 %v8437_v0, %v1130_v4  ;;  %v1879_v6 = vrot.slane %v1589_v44, 5 }
 0x1b5   : > { %v1710_v60 = vsel %vm7502_vm6, %v1591_v53, %v1709_v22  ;;  %1331 = vst [vmem:[#allocation2 + $0xd4] sm:$0x8] %v1330_v15  ;;  %v5565_v13 = vor.u32 %v6453_v46, %v5564_v38  ;;  %v1464_v16 = vrot.slane %v8404_v33, 4  ;;  %6864 = vrcp.f32 %v8476_v2  ;;  %v5480_v4 = vld [vmem:[#allocation2 + $0x90] sm:$0xf] }
 0x1b6   : > { %v6861_v54 = vpop.eup %6860  ;;  %1711 = vst [vmem:[#allocation2 + $0x168] sm:$0xf] %v1710_v60  ;;  %v1468_v26 = vrot.slane %v1466_v18, 7  ;;  %v1810_v58 = vrot.slane %v1469_v57, 5  ;;  %v1812_v39 = vrot.slane %v1466_v18, 4  ;;  %v1135_v42 = vsel %vm1134_vm4, %v8437_v0, %v1131_v24 }
 0x1b7   : > { %v1140_v40 = vsel %vm8469_vm15, %v1139_v30, %v1135_v42  ;;  %2686 = vmatmul.bf16.gmra.mxu3 %v5565_v13  ;;  %v6863_v12 = vpop.eup %6862  ;;  %v1880_v0 = vor.u32 %v1879_v6, %v1878_v50  ;;  %v8492_v33 = vadd.f32 1.0, %v6861_v54  ;;  %v8497_v45 = vadd.f32 %v8328_v62, %v561_v17  ;;  %v1353_v14 = vld [vmem:[#allocation2 + $0x194] sm:$0x8]  ;;  %v5780_v15 = vld [vmem:[#allocation2 + $0x90] sm:$0xf]  ;;  %v6401_v42 = vld [vmem:[#allocation8 + $0x48] sm:$0xff] }
 0x1b8   : > { %v1471_v5 = vor.u32 %v1469_v57, %v1468_v26  ;;  %v1811_v21 = vsel %vm7570_vm7, %v1809_v52, %v1810_v58  ;;  %v1813_v55 = vor.u32 %v1812_v39, %v1810_v58  ;;  %v1201_v31 = vmul.f32 %v1140_v40, %v8331_v27  ;;  %v6363_v38 = vld [vmem:[#allocation2 + $0x98] sm:$0xf0]  ;;  %v5576_v58 = vld [vmem:[#allocation2 + $0x150] sm:$0xf] }
 0x1b9   : > { %1953 = vst [vmem:[#allocation2 + $0xb0] sm:$0xf] %v1811_v21  ;;  %v8494_v3 = vadd.f32 1.0, %v6863_v12  ;;  %v5485_v56 = vor.u32 %v6431_v1, %v5482_v48  ;;  %6866 = vrcp.f32 %v8492_v33  ;;  %v1592_v62 = vrot.slane %v8464_v41, 4  ;;  %v6456_v18 = vld [vmem:[#allocation2 + $0x158] sm:$0xf0] }
 0x1ba   : > { %v1472_v19 = vsel %vm7582_vm10, %v1464_v16, %v1471_v5  ;;  %v1814_v49 = vrot.slane %v1813_v55, 4  ;;  %v1233_v7 = vpack.c.bf16 %v1201_v31, %v1201_v31  ;;  %v1881_v43 = vrot.slane %v1880_v0, 4  ;;  %v1986_v24 = vld [vmem:[#allocation2 + $0x17c] sm:$0xf] }
 0x1bb   : > { %1680 = vst [vmem:[#allocation2 + $0xb4] sm:$0xf] %v1472_v19  ;;  %v8504_v29 = vpop.eup %6864  ;;  %6868 = vrcp.f32 %v8494_v3  ;;  %v5417_v52 = vmul.f32 -1.442695, %v8497_v45  ;;  %vm907_vm9 = vweird.f32 %v8476_v2  ;;  %v911_v41 = vand.u32 2147483647, %v8476_v2 }
 0x1bc   : > { %v1955_v27 = vsel %vm7593_vm1, %v1814_v49, %v1954_v35  ;;  %v1594_v61 = vshrl.u32 %v1233_v7, 16  ;;  %v1597_v32 = vshll.u32 %v1233_v7, 16  ;;  %1746 = vst [vmem:[#allocation2 + $0x178] sm:$0xf] %v1233_v7  ;;  %v903_v20 = vmul.f32 %v8504_v29, %v8476_v2  ;;  %v5494_v19 = vld [vmem:[#allocation2 + $0xb4] sm:$0xf0] }
 0x1bd   : > { %1956 = vst [vmem:[#allocation2 + $0xbc] sm:$0xf] %v1955_v27  ;;  %2740 = vmatmul.bf16.gmra.mxu2 %v5485_v56  ;;  %vm908_vm13 = vweird.f32 %v8504_v29  ;;  %v913_v46 = vand.u32 2147483648, %v8476_v2  ;;  %6870 = vpow2.f32 %v5417_v52  ;;  %v1354_v60 = vsel %vm7367_vm5, 0, %v1353_v14  ;;  %v6483_v52 = vld [vmem:[#allocation8 + $0x158] sm:$0xff] }
 0x1be   : > { %v1596_v44 = vrot.slane %v1594_v61, 7  ;;  %v1882_v51 = vrot.slane %v1597_v32, 5  ;;  %v1884_v22 = vrot.slane %v1594_v61, 4  ;;  %v904_v11 = vsub.f32 1.0, %v903_v20  ;;  %1355 = vst [vmem:[#allocation2 + $0x194] sm:$0x8] %v1354_v60  ;;  %vm8527_vm8 = vmor %vm907_vm9, %vm908_vm13  ;;  %2800 = vmatpush.bf16.msrb.mxu3 %v6483_v52 }
 0x1bf   : > { %v6867_v57 = vpop.eup %6866  ;;  %v5481_v50 = vor.u32 %v6432_v10, %v5480_v4  ;;  %vm8531_vm14 = vcmp.eq.f32.partialorder %v911_v41, 8.507059e+37  ;;  %v914_v16 = vor.u32 1.1754944e-38, %v913_v46  ;;  %v5781_v40 = vor.u32 %v6363_v38, %v5780_v15  ;;  %v6402_v41 = vld [vmem:[#allocation8 + $0x50] sm:$0xff]  ;;  %v5492_v15 = vld [vmem:[#allocation2 + $0xa8] sm:$0xf] }
 0x1c0   : > { %v1599_v53 = vor.u32 %v1597_v32, %v1596_v44  ;;  %v1883_v8 = vsel %vm7570_vm7, %v1881_v43, %v1882_v51  ;;  %v1885_v30 = vor.u32 %v1884_v22, %v1882_v51  ;;  %v905_v54 = vmul.f32 %v8504_v29, %v904_v11  ;;  %v6403_v44 = vld [vmem:[#allocation8 + $0x58] sm:$0xff]  ;;  %v1681_v60 = vld [vmem:[#allocation2 + $0xc0] sm:$0xf] }
 0x1c1   : > { %1985 = vst [vmem:[#allocation2 + $0x170] sm:$0xf] %v1883_v8  ;;  %v1143_v26 = vmul.f32 %v6867_v57, %v8492_v33  ;;  %v6869_v39 = vpop.eup %6868  ;;  %2651 = vmatmul.bf16.gmra.mxu1 %v5481_v50  ;;  %v5577_v48 = vor.u32 %v6456_v18, %v5576_v58  ;;  %vm1147_vm11 = vweird.f32 %v8492_v33  ;;  %v1151_v55 = vand.u32 2147483647, %v8492_v33 }
 0x1c2   : > { %v1600_v6 = vsel %vm7582_vm10, %v1592_v62, %v1599_v53  ;;  %v1886_v13 = vrot.slane %v1885_v30, 4  ;;  %v906_v5 = vadd.f32 %v8504_v29, %v905_v54  ;;  %v918_v2 = vmul.f32 %v6869_v39, %v8494_v3  ;;  %3378 = vmatpush.bf16.msrb.mxu1 %v6403_v44  ;;  %v6435_v30 = vld [vmem:[#allocation2 + $0xb0] sm:$0xf0] }
 0x1c3   : > { %1712 = vst [vmem:[#allocation2 + $0x174] sm:$0xf] %v1600_v6  ;;  %v1144_v21 = vsub.f32 1.0, %v1143_v26  ;;  %v1153_v31 = vand.u32 2147483648, %v8492_v33  ;;  %vm922_vm12 = vweird.f32 %v8494_v3  ;;  %3323 = vmatmul.bf16.gmra.mxu0 %v5781_v40  ;;  %vm1148_vm0 = vweird.f32 %v6867_v57  ;;  %v6871_v49 = vpop.eup %6870  ;;  %v6482_v33 = vld [vmem:[#allocation8 + $0x150] sm:$0xff] }
 0x1c4   : > { %v1987_v12 = vsel %vm7593_vm1, %v1886_v13, %v1986_v24  ;;  %v910_v1 = vsel %vm8527_vm8, %v8504_v29, %v906_v5  ;;  %v919_v35 = vsub.f32 1.0, %v918_v2  ;;  %vm923_vm3 = vweird.f32 %v6869_v39  ;;  %v6434_v29 = vld [vmem:[#allocation2 + $0xac] sm:$0xf]  ;;  %vm1149_vm15 = vmor %vm1147_vm11, %vm1148_vm0  ;;  %v6366_v24 = vld [vmem:[#allocation2 + $0xb0] sm:$0xf0]  ;;  %2801 = vmatpush.bf16.msrb.mxu3 %v6482_v33 }
 0x1c5   : > { %1988 = vst [vmem:[#allocation2 + $0x17c] sm:$0xf] %v1987_v12  ;;  %v1145_v0 = vmul.f32 %v6867_v57, %v1144_v21  ;;  %v915_v7 = vsel %vm8531_vm14, %v914_v16, %v910_v1  ;;  %v926_v56 = vand.u32 2147483647, %v8494_v3  ;;  %v928_v27 = vand.u32 2147483648, %v8494_v3  ;;  %vm924_vm9 = vmor %vm922_vm12, %vm923_vm3  ;;  %v2627_v12 = vpop.f32.mrf.mxu1  ;;  %v8577_v1 = vpop.f32.mrf.mxu0 }
 0x1c6   : > { %v1186_v61 = vmul.f32 %v915_v7, %v8377_v63  ;;  %v920_v59 = vmul.f32 %v6869_v39, %v919_v35  ;;  %v8551_v62 = vadd.f32 1.0, %v6871_v49  ;;  %vm1152_vm4 = vcmp.eq.f32.partialorder %v1151_v55, 8.507059e+37  ;;  %3379 = vmatpush.bf16.msrb.mxu1 %v6402_v41  ;;  %v5792_v13 = vld [vmem:[#allocation2 + $0xa8] sm:$0xf]  ;;  %v1713_v55 = vld [vmem:[#allocation2 + $0x180] sm:$0xf] }
 0x1c7   : > { %2691 = vmatmul.bf16.gmra.mxu3 %v5577_v48  ;;  %v1146_v32 = vadd.f32 %v6867_v57, %v1145_v0  ;;  %v1154_v43 = vor.u32 1.1754944e-38, %v1153_v31  ;;  %v5497_v51 = vor.u32 %v6434_v29, %v5494_v19  ;;  %vm927_vm13 = vcmp.eq.f32.partialorder %v926_v56, 8.507059e+37  ;;  %v2716_v48 = vpop.f32.mrf.mxu2  ;;  %v5588_v31 = vld [vmem:[#allocation2 + $0x168] sm:$0xf]  ;;  %v1958_v33 = vld [vmem:[#allocation2 + $0xd4] sm:$0xf] }
 0x1c8   : > { %v1218_v22 = vpack.c.bf16 %v1186_v61, %v1186_v61  ;;  %v921_v4 = vadd.f32 %v6869_v39, %v920_v59  ;;  %6872 = vrcp.f32 %v8551_v62  ;;  %v929_v63 = vor.u32 1.1754944e-38, %v928_v27  ;;  %v6480_v27 = vld [vmem:[#allocation8 + $0x140] sm:$0xff] }
 0x1c9   : > { %v1150_v20 = vsel %vm1149_vm15, %v6867_v57, %v1146_v32  ;;  %v5493_v6 = vor.u32 %v6435_v30, %v5492_v15  ;;  %v5793_v40 = vor.u32 %v6366_v24, %v5792_v13  ;;  %v1168_v56 = vand.u32 2147483648, %v8551_v62  ;;  %v6400_v32 = vld [vmem:[#allocation8 + $0x40] sm:$0xff] }
 0x1ca   : > { %v1155_v10 = vsel %vm1152_vm4, %v1154_v43, %v1150_v20  ;;  %v1474_v46 = vshrl.u32 %v1218_v22, 16  ;;  %v1477_v14 = vshll.u32 %v1218_v22, 16  ;;  %1731 = vst [vmem:[#allocation2 + $0xc4] sm:$0xf] %v1218_v22  ;;  %v925_v8 = vsel %vm924_vm9, %v6869_v39, %v921_v4  ;;  %v6459_v39 = vld [vmem:[#allocation2 + $0x170] sm:$0xf0]  ;;  %3380 = vmatpush.bf16.msrb.mxu1 %v6401_v42 }
 0x1cb   : > { %v1202_v53 = vmul.f32 %v1155_v10, %v8435_v36  ;;  %v930_v11 = vsel %vm927_vm13, %v929_v63, %v925_v8  ;;  %v6481_v36 = vld [vmem:[#allocation8 + $0x148] sm:$0xff]  ;;  %v5589_v49 = vor.u32 %v6459_v39, %v5588_v31  ;;  %v8581_v61 = vadd.f32 %v2716_v48, %v2627_v12  ;;  %v6415_v12 = vld [vmem:[#allocation8 + $0xb8] sm:$0xff] }
 0x1cc   : > { %v8560_v38 = vrot.slane %v1474_v46, 7  ;;  %v1815_v18 = vrot.slane %v1474_v46, 4  ;;  %v1816_v3 = vrot.slane %v1477_v14, 5  ;;  %v1187_v50 = vmul.f32 %v930_v11, %v8448_v37  ;;  %2802 = vmatpush.bf16.msrb.mxu3 %v6481_v36  ;;  %3463 = vmatpush.bf16.msra.mxu2 %v6415_v12 }
 0x1cd   : > { %v8562_v57 = vpack.c.bf16 %v1202_v53, %v1202_v53  ;;  %2745 = vmatmul.bf16.gmra.mxu2 %v5497_v51  ;;  %v1166_v22 = vand.u32 2147483647, %v8551_v62  ;;  %v1169_v41 = vor.u32 1.1754944e-38, %v1168_v56  ;;  %v8599_v11 = vpop.f32.mrf.mxu1  ;;  %v1990_v56 = vld [vmem:[#allocation2 + $0x194] sm:$0xf] }
 0x1ce   : > { %v8565_v54 = vpop.eup %6872  ;;  %v1479_v26 = vor.u32 %v1477_v14, %v8560_v38  ;;  %v1817_v17 = vor.u32 %v1816_v3, %v1815_v18  ;;  %v1219_v16 = vpack.c.bf16 %v1187_v50, %v1187_v50  ;;  %v1480_v20 = vrot.slane %v8560_v38, 4  ;;  %3381 = vmatpush.bf16.msrb.mxu1 %v6400_v32 }
 0x1cf   : > { %v1602_v58 = vshrl.u32 %v8562_v57, 16  ;;  %1747 = vst [vmem:[#allocation2 + $0x184] sm:$0xf] %v8562_v57  ;;  %v1158_v37 = vmul.f32 %v8565_v54, %v8551_v62  ;;  %v1605_v2 = vshll.u32 %v8562_v57, 16  ;;  %vm1163_vm8 = vweird.f32 %v8565_v54  ;;  %v8597_v30 = vpop.f32.mrf.mxu2 }
 0x1d0   : > { %v1682_v5 = vsel %vm7502_vm6, %v1479_v26, %v1681_v60  ;;  %v1482_v0 = vshrl.u32 %v1219_v16, 16  ;;  %v1485_v35 = vshll.u32 %v1219_v16, 16  ;;  %1732 = vst [vmem:[#allocation2 + $0xd0] sm:$0xf] %v1219_v16  ;;  %v1818_v59 = vrot.slane %v1817_v17, 4  ;;  %2803 = vmatpush.bf16.msrb.mxu3 %v6480_v27  ;;  %v8605_v60 = vpop.f32.mrf.mxu0  ;;  %v6543_v17 = vld [vmem:[#allocation8 + $0x1b8] sm:$0xff] }
 0x1d1   : > { %v8574_v21 = vrot.slane %v1602_v58, 7  ;;  %1683 = vst [vmem:[#allocation2 + $0xc0] sm:$0xf] %v1682_v5  ;;  %v1159_v19 = vsub.f32 1.0, %v1158_v37  ;;  %2656 = vmatmul.bf16.gmra.mxu1 %v5493_v6  ;;  %v1887_v46 = vrot.slane %v1602_v58, 4  ;;  %v1888_v14 = vrot.slane %v1605_v2, 5 }
 0x1d2   : > { %v1484_v29 = vrot.slane %v1482_v0, 7  ;;  %v1819_v43 = vrot.slane %v1485_v35, 5  ;;  %v1821_v52 = vrot.slane %v1482_v0, 4  ;;  %vm1167_vm11 = vcmp.eq.f32.partialorder %v1166_v22, 8.507059e+37  ;;  %v6437_v18 = vld [vmem:[#allocation2 + $0xc4] sm:$0xf] }
 0x1d3   : > { %v1607_v7 = vor.u32 %v1605_v2, %v8574_v21  ;;  %3328 = vmatmul.bf16.gmra.mxu0 %v5793_v40  ;;  %v1160_v51 = vmul.f32 %v8565_v54, %v1159_v19  ;;  %v1889_v50 = vor.u32 %v1888_v14, %v1887_v46  ;;  %v6551_v5 = vld [vmem:[#allocation8 + $0x1f8] sm:$0xff]  ;;  %v5710_v22 = vld [vmem:[#allocation2 + $0xc] sm:$0xf0] }
 0x1d4   : > { %v1487_v4 = vor.u32 %v1485_v35, %v1484_v29  ;;  %v1820_v10 = vsel %vm7570_vm7, %v1818_v59, %v1819_v43  ;;  %v1822_v63 = vor.u32 %v1821_v52, %v1819_v43  ;;  %4066 = vmatpush.bf16.msra.mxu3 %v6543_v17  ;;  %v1608_v35 = vrot.slane %v8574_v21, 4  ;;  %4155 = vmatpush.bf16.msra.mxu0 %v6551_v5  ;;  %v8620_v43 = vpop.f32.mrf.mxu3  ;;  %v6550_v17 = vld [vmem:[#allocation8 + $0x1f0] sm:$0xff] }
 0x1d5   : > { %v1714_v44 = vsel %vm7502_vm6, %v1607_v7, %v1713_v55  ;;  %1957 = vst [vmem:[#allocation2 + $0xc8] sm:$0xf] %v1820_v10  ;;  %v1161_v25 = vadd.f32 %v8565_v54, %v1160_v51  ;;  %vm1162_vm6 = vweird.f32 %v8551_v62  ;;  %v1890_v58 = vrot.slane %v1889_v50, 4  ;;  %v2632_v2 = vpop.f32.mrf.mxu1  ;;  %v6559_v55 = vld [vmem:[#allocation8 + $0x238] sm:$0xff]  ;;  %v5428_v50 = vld [vmem:[#allocation2 + $0x20] sm:$0xf] }
 0x1d6   : > { %1715 = vst [vmem:[#allocation2 + $0x180] sm:$0xf] %v1714_v44  ;;  %v1488_v53 = vsel %vm7582_vm10, %v1480_v20, %v1487_v4  ;;  %v1823_v8 = vrot.slane %v1822_v63, 4  ;;  %vm1164_vm14 = vmor %vm1162_vm6, %vm1163_vm8  ;;  %4244 = vmatpush.bf16.msra.mxu1 %v6559_v55  ;;  %v6440_v44 = vld [vmem:[#allocation2 + $0xdc] sm:$0xf] }
 0x1d7   : > { %2696 = vmatmul.bf16.gmra.mxu3 %v5589_v49  ;;  %1684 = vst [vmem:[#allocation2 + $0xcc] sm:$0xf] %v1488_v53  ;;  %v1165_v15 = vsel %vm1164_vm14, %v8565_v54, %v1161_v25  ;;  %v5506_v3 = vld [vmem:[#allocation2 + $0xcc] sm:$0xf0]  ;;  %v2721_v16 = vpop.f32.mrf.mxu2  ;;  %v5521_v51 = vor.u32 %v6440_v44, %v5518_v9  ;;  %v6372_v63 = vld [vmem:[#allocation2 + $0xe0] sm:$0xf0] }
 0x1d8   : > { %v1959_v62 = vsel %vm7593_vm1, %v1823_v8, %v1958_v33  ;;  %v1170_v38 = vsel %vm1167_vm11, %v1169_v41, %v1165_v15  ;;  %v5509_v24 = vor.u32 %v6437_v18, %v5506_v3  ;;  %v5504_v13 = vld [vmem:[#allocation2 + $0xc0] sm:$0xf]  ;;  %v8607_v0 = vadd.f32 %v2721_v16, %v2632_v2  ;;  %v8614_v59 = vpop.f32.mrf.mxu0  ;;  %v5816_v41 = vld [vmem:[#allocation2 + $0xd8] sm:$0xf]  ;;  %v6443_v18 = vld [vmem:[#allocation2 + $0xf4] sm:$0xf]  ;;  %4156 = vmatpush.bf16.msra.mxu0 %v6550_v17 }
 0x1d9   : > { %1960 = vst [vmem:[#allocation2 + $0xd4] sm:$0xf] %v1959_v62  ;;  %v1203_v57 = vmul.f32 %v1170_v38, %v8497_v45  ;;  %v5804_v54 = vld [vmem:[#allocation2 + $0xc0] sm:$0xf]  ;;  %v5713_v33 = vor.u32 %v6344_v23, %v5710_v22  ;;  %v5817_v46 = vor.u32 %v6372_v63, %v5816_v41  ;;  %v5828_v16 = vld [vmem:[#allocation2 + $0xf0] sm:$0xf] }
 0x1da   : > { %v5530_v15 = vld [vmem:[#allocation2 + $0xfc] sm:$0xf0]  ;;  %v5542_v55 = vld [vmem:[#allocation2 + $0x114] sm:$0xf0]  ;;  %v5840_v9 = vld [vmem:[#allocation2 + $0x108] sm:$0xf] }
 0x1db   : > { %v1235_v6 = vpack.c.bf16 %v1203_v57, %v1203_v57  ;;  %v6418_v57 = vld [vmem:[#allocation2 + $0x28] sm:$0xf0]  ;;  %v5566_v17 = vld [vmem:[#allocation2 + $0x144] sm:$0xf0] }
 0x1dc   : > { %v8626_v53 = vpop.f32.mrf.mxu3 }
 0x1dd   : > { %2750 = vmatmul.bf16.gmra.mxu2 %v5509_v24  ;;  %v1610_v36 = vshrl.u32 %v1235_v6, 16  ;;  %v1613_v26 = vshll.u32 %v1235_v6, 16  ;;  %1748 = vst [vmem:[#allocation2 + $0x190] sm:$0xf] %v1235_v6  ;;  %v8622_v52 = vpop.f32.mrf.mxu1  ;;  %v5600_v20 = vld [vmem:[#allocation2 + $0x180] sm:$0xf]  ;;  %v5533_v24 = vor.u32 %v6443_v18, %v5530_v15 }
 0x1de   : > { %v6438_v39 = vld [vmem:[#allocation2 + $0xc8] sm:$0xf0]  ;;  %v6541_v18 = vld [vmem:[#allocation8 + $0x1a8] sm:$0xff] }
 0x1df   : > { %v6369_v42 = vld [vmem:[#allocation2 + $0xc8] sm:$0xf0]  ;;  %v1612_v37 = vrot.slane %v1610_v36, 7  ;;  %v1891_v40 = vrot.slane %v1613_v26, 5  ;;  %v1893_v48 = vrot.slane %v1610_v36, 4  ;;  %v5505_v45 = vor.u32 %v6438_v39, %v5504_v13  ;;  %v8618_v29 = vpop.f32.mrf.mxu2  ;;  %v6414_v39 = vld [vmem:[#allocation8 + $0xb0] sm:$0xff] }
 0x1e0   : > { %v5805_v31 = vor.u32 %v6369_v42, %v5804_v54  ;;  %v8624_v34 = vpop.f32.mrf.mxu0  ;;  %v5429_v13 = vor.u32 %v6418_v57, %v5428_v50  ;;  %v5722_v36 = vld [vmem:[#allocation2 + $0x24] sm:$0xf0]  ;;  %v6347_v54 = vld [vmem:[#allocation2 + $0x1c] sm:$0xf]  ;;  %3464 = vmatpush.bf16.msra.mxu2 %v6414_v39  ;;  %v6353_v15 = vld [vmem:[#allocation2 + $0x4c] sm:$0xf] }
 0x1e1   : > { %v1615_v19 = vor.u32 %v1613_v26, %v1612_v37  ;;  %v1892_v49 = vsel %vm7570_vm7, %v1890_v58, %v1891_v40  ;;  %v1894_v7 = vor.u32 %v1893_v48, %v1891_v40  ;;  %2661 = vmatmul.bf16.gmra.mxu1 %v5505_v45  ;;  %v6375_v26 = vld [vmem:[#allocation2 + $0xf8] sm:$0xf0]  ;;  %v6542_v58 = vld [vmem:[#allocation8 + $0x1b0] sm:$0xff]  ;;  %v5725_v37 = vor.u32 %v6347_v54, %v5722_v36 }
 0x1e2   : > { %1989 = vst [vmem:[#allocation2 + $0x188] sm:$0xf] %v1892_v49  ;;  %v6558_v40 = vld [vmem:[#allocation8 + $0x230] sm:$0xff]  ;;  %v5829_v48 = vor.u32 %v6375_v26, %v5828_v16  ;;  %4067 = vmatpush.bf16.msra.mxu3 %v6542_v58  ;;  %v5440_v49 = vld [vmem:[#allocation2 + $0x38] sm:$0xf] }
 0x1e3   : > { %3333 = vmatmul.bf16.gmra.mxu0 %v5805_v31  ;;  %v1616_v27 = vsel %vm7582_vm10, %v1608_v35, %v1615_v19  ;;  %v1895_v32 = vrot.slane %v1894_v7, 4  ;;  %4245 = vmatpush.bf16.msra.mxu1 %v6558_v40  ;;  %v6446_v31 = vld [vmem:[#allocation2 + $0x10c] sm:$0xf]  ;;  %v6421_v35 = vld [vmem:[#allocation2 + $0x40] sm:$0xf0]  ;;  %v6413_v57 = vld [vmem:[#allocation8 + $0xa8] sm:$0xff] }
 0x1e4   : > { %1716 = vst [vmem:[#allocation2 + $0x18c] sm:$0xf] %v1616_v27  ;;  %v8636_v6 = vpop.f32.mrf.mxu3  ;;  %v5545_v19 = vor.u32 %v6446_v31, %v5542_v55  ;;  %v5734_v27 = vld [vmem:[#allocation2 + $0x3c] sm:$0xf0]  ;;  %v6557_v54 = vld [vmem:[#allocation8 + $0x228] sm:$0xff]  ;;  %3465 = vmatpush.bf16.msra.mxu2 %v6413_v57 }
 0x1e5   : > { %v1991_v21 = vsel %vm7593_vm1, %v1895_v32, %v1990_v56  ;;  %v5441_v56 = vor.u32 %v6421_v35, %v5440_v49  ;;  %v6378_v32 = vld [vmem:[#allocation2 + $0x110] sm:$0xf0]  ;;  %v6452_v16 = vld [vmem:[#allocation2 + $0x13c] sm:$0xf]  ;;  %v5464_v55 = vld [vmem:[#allocation2 + $0x68] sm:$0xf] }
 0x1e6   : > { %1992 = vst [vmem:[#allocation2 + $0x194] sm:$0xf] %v1991_v21  ;;  %v6350_v21 = vld [vmem:[#allocation2 + $0x34] sm:$0xf]  ;;  %v5841_v23 = vor.u32 %v6378_v32, %v5840_v9  ;;  %4068 = vmatpush.bf16.msra.mxu3 %v6541_v18  ;;  %v5758_v35 = vld [vmem:[#allocation2 + $0x6c] sm:$0xf0] }
 0x1e7   : > { %v2726_v25 = vpop.f32.mrf.mxu2  ;;  %v5737_v44 = vor.u32 %v6350_v21, %v5734_v27  ;;  %4246 = vmatpush.bf16.msra.mxu1 %v6557_v54  ;;  %v6427_v40 = vld [vmem:[#allocation2 + $0x70] sm:$0xf0]  ;;  %v6356_v27 = vld [vmem:[#allocation2 + $0x64] sm:$0xf]  ;;  %v5864_v21 = vld [vmem:[#allocation2 + $0x138] sm:$0xf] }
 0x1e8   : > { %v8632_v38 = vpop.f32.mrf.mxu0  ;;  %v5465_v31 = vor.u32 %v6427_v40, %v5464_v55  ;;  %v5761_v9 = vor.u32 %v6356_v27, %v5758_v35  ;;  %v6430_v18 = vld [vmem:[#allocation2 + $0x88] sm:$0xf0]  ;;  %v6545_v55 = vld [vmem:[#allocation8 + $0x1c8] sm:$0xff]  ;;  %v5876_v35 = vld [vmem:[#allocation2 + $0x150] sm:$0xf] }
 0x1eb   : > { %v6462_v4 = vld [vmem:[#allocation2 + $0x188] sm:$0xf0] }
 0x1ec   : > { %v5601_v10 = vor.u32 %v6462_v4, %v5600_v20  ;;  %v8642_v2 = vpop.f32.mrf.mxu3  ;;  %v5554_v20 = vld [vmem:[#allocation2 + $0x12c] sm:$0xf0]  ;;  %v6449_v4 = vld [vmem:[#allocation2 + $0x124] sm:$0xf] }
 0x1ed   : > { %2755 = vmatmul.bf16.gmra.mxu2 %v5521_v51  ;;  %v5557_v63 = vor.u32 %v6449_v4, %v5554_v20  ;;  %v6547_v20 = vld [vmem:[#allocation8 + $0x1d8] sm:$0xff] }
 0x1ee   : > { %2701 = vmatmul.bf16.gmra.mxu3 %v5601_v10  ;;  %v6424_v10 = vld [vmem:[#allocation2 + $0x58] sm:$0xf0] }
 0x1ef   : > { %v8630_v62 = vpop.f32.mrf.mxu2 }
 0x1f0   : > { %v8638_v12 = vpop.f32.mrf.mxu0 }
 0x1f1   : > { %3382 = vmatmul.bf16.vlgmr.msrb.gmra.mxu1 %v5713_v33 }
 0x1f2   : > { %v2637_v14 = vpop.f32.mrf.mxu1 }
 0x1f3   : > { %v8628_v8 = vadd.f32 %v2726_v25, %v2637_v14  ;;  %3338 = vmatmul.bf16.gmra.mxu0 %v5817_v46  ;;  %v5452_v25 = vld [vmem:[#allocation2 + $0x50] sm:$0xf]  ;;  %v5746_v46 = vld [vmem:[#allocation2 + $0x54] sm:$0xf0]  ;;  %v6381_v14 = vld [vmem:[#allocation2 + $0x128] sm:$0xf0] }
 0x1f4   : > { %v5453_v41 = vor.u32 %v6424_v10, %v5452_v25  ;;  %v5749_v36 = vor.u32 %v6353_v15, %v5746_v46  ;;  %v5578_v25 = vld [vmem:[#allocation2 + $0x15c] sm:$0xf0]  ;;  %v6455_v15 = vld [vmem:[#allocation2 + $0x154] sm:$0xf] }
 0x1f5   : > { %v5581_v57 = vor.u32 %v6455_v15, %v5578_v25  ;;  %v6458_v15 = vld [vmem:[#allocation2 + $0x16c] sm:$0xf] }
 0x1f8   : > { %v8644_v7 = vpop.f32.mrf.mxu0 }
 0x1fa   : > { %v8634_v3 = vpop.f32.mrf.mxu1 }
 0x1fc   : > { %v8646_v51 = vpop.f32.mrf.mxu3 }
 0x1fd   : > { %2760 = vmatmul.bf16.gmra.mxu2 %v5533_v24  ;;  %v2731_v42 = vpop.f32.mrf.mxu2  ;;  %v6549_v24 = vld [vmem:[#allocation8 + $0x1e8] sm:$0xff] }
 0x1fe   : > { %2804 = vmatmul.bf16.vlgmr.msrb.gmra.mxu3 %v5429_v13  ;;  %v5852_v13 = vld [vmem:[#allocation2 + $0x120] sm:$0xf]  ;;  %4157 = vmatpush.bf16.msra.mxu0 %v6549_v24 }
 0x1ff   : > { %v5853_v58 = vor.u32 %v6381_v14, %v5852_v13  ;;  %v6546_v14 = vld [vmem:[#allocation8 + $0x1d0] sm:$0xff] }
 0x200   : > { %v8648_v22 = vpop.f32.mrf.mxu0  ;;  %v5476_v24 = vld [vmem:[#allocation2 + $0x80] sm:$0xf] }
 0x201   : > { %3387 = vmatmul.bf16.gmra.mxu1 %v5725_v37  ;;  %9662 = vst [vmem:[#allocation15_spill] sm:$0xff] %v8648_v22  ;;  %v5477_v13 = vor.u32 %v6430_v18, %v5476_v24  ;;  %v6409_v18 = vld [vmem:[#allocation8 + $0x88] sm:$0xff] }
 0x202   : > { %v2642_v45 = vpop.f32.mrf.mxu1 }
 0x203   : > { %v8640_v5 = vadd.f32 %v2731_v42, %v2642_v45  ;;  %3343 = vmatmul.bf16.gmra.mxu0 %v5829_v48  ;;  %v5569_v48 = vor.u32 %v6452_v16, %v5566_v17  ;;  %v6387_v17 = vld [vmem:[#allocation2 + $0x158] sm:$0xf0] }
 0x204   : > { %v8650_v33 = vpop.f32.mrf.mxu3  ;;  %v6359_v16 = vld [vmem:[#allocation2 + $0x7c] sm:$0xf]  ;;  %v5877_v27 = vor.u32 %v6387_v17, %v5876_v35  ;;  %v5782_v17 = vld [vmem:[#allocation2 + $0x9c] sm:$0xf0] }
 0x205   : > { %9663 = vst [vmem:[#allocation16_spill] sm:$0xff] %v8650_v33  ;;  %v8658_v42 = vpop.f32.mrf.mxu2 }
 0x20a   : > { %v8654_v26 = vpop.f32.mrf.mxu1 }
 0x20d   : > { %2765 = vmatmul.bf16.gmra.mxu2 %v5545_v19  ;;  %v6384_v19 = vld [vmem:[#allocation2 + $0x140] sm:$0xf0] }
 0x20e   : > { %2809 = vmatmul.bf16.gmra.mxu3 %v5441_v56 }
 0x211   : > { %3392 = vmatmul.bf16.gmra.mxu1 %v5737_v44  ;;  %v8652_v50 = vpop.f32.mrf.mxu0  ;;  %v6548_v44 = vld [vmem:[#allocation8 + $0x1e0] sm:$0xff] }
 0x212   : > { %9664 = vst [vmem:[#allocation17_spill] sm:$0xff] %v8652_v50  ;;  %4158 = vmatpush.bf16.msra.mxu0 %v6548_v44  ;;  %v6544_v44 = vld [vmem:[#allocation8 + $0x1c0] sm:$0xff] }
 0x213   : > { %3348 = vmatmul.bf16.gmra.mxu0 %v5841_v23  ;;  %v5865_v23 = vor.u32 %v6384_v19, %v5864_v21  ;;  %v6411_v21 = vld [vmem:[#allocation8 + $0x98] sm:$0xff] }
 0x216   : > { %4159 = vmatpush.bf16.msra.mxu0 %v6547_v20 }
 0x219   : > { %v8656_v39 = vpop.f32.mrf.mxu3  ;;  %v8660_v37 = vpop.f32.mrf.mxu0 }
 0x21a   : > { %9665 = vst [vmem:[#allocation18_spill] sm:$0xff] %v8656_v39  ;;  %4160 = vmatpush.bf16.msra.mxu0 %v6546_v14 }
 0x21b   : > { %9666 = vst [vmem:[#allocation19_spill] sm:$0xff] %v8660_v37  ;;  %v6494_v37 = vld [vmem:[#allocation2 + $0x64] sm:$0xf] }
 0x21d   : > { %2770 = vmatmul.bf16.gmra.mxu2 %v5557_v63 }
 0x21e   : > { %2814 = vmatmul.bf16.gmra.mxu3 %v5453_v41  ;;  %4161 = vmatpush.bf16.msra.mxu0 %v6545_v55  ;;  %v6408_v55 = vld [vmem:[#allocation8 + $0x80] sm:$0xff] }
 0x221   : > { %3397 = vmatmul.bf16.gmra.mxu1 %v5749_v36  ;;  %v8662_v49 = vpop.f32.mrf.mxu3  ;;  %v5770_v36 = vld [vmem:[#allocation2 + $0x84] sm:$0xf0] }
 0x222   : > { %9667 = vst [vmem:[#allocation20_spill] sm:$0xff] %v8662_v49  ;;  %v5773_v19 = vor.u32 %v6359_v16, %v5770_v36  ;;  %4162 = vmatpush.bf16.msra.mxu0 %v6544_v44  ;;  %v5488_v36 = vld [vmem:[#allocation2 + $0x98] sm:$0xf]  ;;  %v1305_v44 = vld [vmem:[#allocation2 + $0x14] sm:$0x8] }
 0x223   : > { %3353 = vmatmul.bf16.gmra.mxu0 %v5853_v58  ;;  %v6500_v49 = vld [vmem:[#allocation2 + $0x94] sm:$0xf] }
 0x22c   : > { %v2647_v45 = vpop.f32.mrf.mxu1 }
 0x22d   : > { %2775 = vmatmul.bf16.gmra.mxu2 %v5569_v48  ;;  %v6412_v48 = vld [vmem:[#allocation8 + $0xa0] sm:$0xff] }
 0x22e   : > { %2819 = vmatmul.bf16.gmra.mxu3 %v5465_v31  ;;  %3466 = vmatpush.bf16.msra.mxu2 %v6412_v48 }
 0x230   : > { %v2736_v56 = vpop.f32.mrf.mxu2  ;;  %v8666_v4 = vpop.f32.mrf.mxu0 }
 0x231   : > { %v8664_v32 = vadd.f32 %v2736_v56, %v2647_v45  ;;  %3402 = vmatmul.bf16.gmra.mxu1 %v5761_v9  ;;  %9668 = vst [vmem:[#allocation21_spill] sm:$0xff] %v8666_v4  ;;  %v6540_v45 = vld [vmem:[#allocation8 + $0x1a0] sm:$0xff] }
 0x232   : > { %4069 = vmatpush.bf16.msra.mxu3 %v6540_v45  ;;  %v6556_v9 = vld [vmem:[#allocation8 + $0x220] sm:$0xff]  ;;  %3467 = vmatpush.bf16.msra.mxu2 %v6411_v21 }
 0x233   : > { %3358 = vmatmul.bf16.gmra.mxu0 %v5865_v23  ;;  %4247 = vmatpush.bf16.msra.mxu1 %v6556_v9  ;;  %v6410_v23 = vld [vmem:[#allocation8 + $0x90] sm:$0xff]  ;;  %v6362_v45 = vld [vmem:[#allocation2 + $0x94] sm:$0xf] }
 0x234   : > { %v2649_v10 = vpop.f32.mrf.mxu1 }
 0x236   : > { %3468 = vmatpush.bf16.msra.mxu2 %v6410_v23  ;;  %v1306_v23 = vsel %vm7367_vm5, 0, %v1305_v44 }
 0x237   : > { %1307 = vst [vmem:[#allocation2 + $0x14] sm:$0x8] %v1306_v23 }
 0x238   : > { %v2738_v63 = vpop.f32.mrf.mxu2  ;;  %v8672_v54 = vpop.f32.mrf.mxu0 }
 0x239   : > { %v8668_v41 = vadd.f32 %v2738_v63, %v2649_v10  ;;  %9670 = vst [vmem:[#allocation23_spill] sm:$0xff] %v8672_v54  ;;  %v5590_v63 = vld [vmem:[#allocation2 + $0x174] sm:$0xf0]  ;;  %v6538_v54 = vld [vmem:[#allocation8 + $0x190] sm:$0xff] }
 0x23a   : > { %v8670_v46 = vpop.f32.mrf.mxu3  ;;  %3469 = vmatpush.bf16.msra.mxu2 %v6409_v18 }
 0x23b   : > { %9669 = vst [vmem:[#allocation22_spill] sm:$0xff] %v8670_v46 }
 0x23d   : > { %2780 = vmatmul.bf16.gmra.mxu2 %v5581_v57  ;;  %v6433_v57 = vld [vmem:[#allocation2 + $0xa0] sm:$0xf0] }
 0x23e   : > { %v2652_v58 = vpop.f32.mrf.mxu1  ;;  %2824 = vmatmul.bf16.gmra.mxu3 %v5477_v13  ;;  %v5593_v13 = vor.u32 %v6458_v15, %v5590_v63  ;;  %3470 = vmatpush.bf16.msra.mxu2 %v6408_v55  ;;  %v5602_v15 = vld [vmem:[#allocation2 + $0x18c] sm:$0xf0] }
 0x240   : > { %v2741_v40 = vpop.f32.mrf.mxu2  ;;  %v8678_v25 = vpop.f32.mrf.mxu0 }
 0x241   : > { %v8674_v31 = vadd.f32 %v2741_v40, %v2652_v58  ;;  %3407 = vmatmul.bf16.gmra.mxu1 %v5773_v19  ;;  %9672 = vst [vmem:[#allocation25_spill] sm:$0xff] %v8678_v25  ;;  %v5489_v58 = vor.u32 %v6433_v57, %v5488_v36  ;;  %v6390_v40 = vld [vmem:[#allocation2 + $0x170] sm:$0xf0]  ;;  %v5888_v19 = vld [vmem:[#allocation2 + $0x168] sm:$0xf] }
 0x242   : > { %v8676_v56 = vpop.f32.mrf.mxu3  ;;  %v5889_v21 = vor.u32 %v6390_v40, %v5888_v19  ;;  %v6461_v57 = vld [vmem:[#allocation2 + $0x184] sm:$0xf]  ;;  %v5794_v40 = vld [vmem:[#allocation2 + $0xb4] sm:$0xf0] }
 0x243   : > { %9671 = vst [vmem:[#allocation24_spill] sm:$0xff] %v8676_v56  ;;  %3363 = vmatmul.bf16.gmra.mxu0 %v5877_v27  ;;  %v5785_v27 = vor.u32 %v6362_v45, %v5782_v17  ;;  %v5605_v36 = vor.u32 %v6461_v57, %v5602_v15  ;;  %v5500_v17 = vld [vmem:[#allocation2 + $0xb0] sm:$0xf]  ;;  %v5998_v45 = vld [vmem:[#allocation2 + $0x3c] sm:$0xf0]  ;;  %v6537_v56 = vld [vmem:[#allocation8 + $0x188] sm:$0xff] }
 0x244   : > { %v5716_v15 = vld [vmem:[#allocation2 + $0x8] sm:$0xf]  ;;  %v6346_v57 = vld [vmem:[#allocation2 + $0x10] sm:$0xf0] }
 0x246   : > { %v2654_v20 = vpop.f32.mrf.mxu1 }
 0x248   : > { %v2743_v10 = vpop.f32.mrf.mxu2  ;;  %v8686_v9 = vpop.f32.mrf.mxu0 }
 0x249   : > { %v8680_v14 = vadd.f32 %v2743_v10, %v2654_v20  ;;  %9674 = vst [vmem:[#allocation27_spill] sm:$0xff] %v8686_v9 }
 0x24a   : > { %v8682_v24 = vpop.f32.mrf.mxu3 }
 0x24b   : > { %9673 = vst [vmem:[#allocation26_spill] sm:$0xff] %v8682_v24  ;;  %v6448_v24 = vld [vmem:[#allocation2 + $0x118] sm:$0xf0] }
 0x24d   : > { %2785 = vmatmul.bf16.gmra.mxu2 %v5593_v13  ;;  %v6436_v13 = vld [vmem:[#allocation2 + $0xb8] sm:$0xf0] }
 0x24e   : > { %v2657_v16 = vpop.f32.mrf.mxu1  ;;  %2829 = vmatmul.bf16.gmra.mxu3 %v5489_v58 }
 0x250   : > { %v2746_v48 = vpop.f32.mrf.mxu2  ;;  %v8694_v58 = vpop.f32.mrf.mxu0 }
 0x251   : > { %v8684_v35 = vadd.f32 %v2746_v48, %v2657_v16  ;;  %3412 = vmatmul.bf16.gmra.mxu1 %v5785_v27  ;;  %9676 = vst [vmem:[#allocation29_spill] sm:$0xff] %v8694_v58  ;;  %v5501_v16 = vor.u32 %v6436_v13, %v5500_v17  ;;  %v6365_v27 = vld [vmem:[#allocation2 + $0xac] sm:$0xf] }
 0x252   : > { %v8690_v20 = vpop.f32.mrf.mxu3  ;;  %v5797_v23 = vor.u32 %v6365_v27, %v5794_v40  ;;  %v6555_v13 = vld [vmem:[#allocation8 + $0x218] sm:$0xff]  ;;  %v5806_v27 = vld [vmem:[#allocation2 + $0xcc] sm:$0xf0] }
 0x253   : > { %3368 = vmatmul.bf16.gmra.mxu0 %v5889_v21  ;;  %9675 = vst [vmem:[#allocation28_spill] sm:$0xff] %v8690_v20  ;;  %v6539_v21 = vld [vmem:[#allocation8 + $0x198] sm:$0xff]  ;;  %4248 = vmatpush.bf16.msra.mxu1 %v6555_v13 }
 0x254   : > { %4070 = vmatpush.bf16.msra.mxu3 %v6539_v21  ;;  %v5512_v40 = vld [vmem:[#allocation2 + $0xc8] sm:$0xf]  ;;  %v6010_v21 = vld [vmem:[#allocation2 + $0x54] sm:$0xf0]  ;;  %v6491_v58 = vld [vmem:[#allocation2 + $0x4c] sm:$0xf] }
 0x255   : > { %v6013_v9 = vor.u32 %v6491_v58, %v6010_v21  ;;  %v5818_v58 = vld [vmem:[#allocation2 + $0xe4] sm:$0xf0]  ;;  %v6022_v21 = vld [vmem:[#allocation2 + $0x6c] sm:$0xf0] }
 0x256   : > { %v2659_v10 = vpop.f32.mrf.mxu1  ;;  %v6025_v50 = vor.u32 %v6494_v37, %v6022_v21  ;;  %v6445_v37 = vld [vmem:[#allocation2 + $0x100] sm:$0xf0]  ;;  %v5536_v21 = vld [vmem:[#allocation2 + $0xf8] sm:$0xf] }
 0x258   : > { %v2748_v63 = vpop.f32.mrf.mxu2  ;;  %4071 = vmatpush.bf16.msra.mxu3 %v6538_v54 }
 0x259   : > { %v8692_v18 = vadd.f32 %v2748_v63, %v2659_v10  ;;  %v6488_v10 = vld [vmem:[#allocation2 + $0x34] sm:$0xf] }
 0x25a   : > { %v8696_v48 = vpop.f32.mrf.mxu3  ;;  %v6001_v63 = vor.u32 %v6488_v10, %v5998_v45 }
 0x25b   : > { %9677 = vst [vmem:[#allocation30_spill] sm:$0xff] %v8696_v48 }
 0x25c   : > { %4072 = vmatpush.bf16.msra.mxu3 %v6537_v56 }
 0x25d   : > { %2790 = vmatmul.bf16.gmra.mxu2 %v5605_v36  ;;  %v8700_v36 = vpop.f32.mrf.mxu0 }
 0x25e   : > { %2834 = vmatmul.bf16.gmra.mxu3 %v5501_v16  ;;  %v2662_v19 = vpop.f32.mrf.mxu1  ;;  %9678 = vst [vmem:[#allocation31_spill] sm:$0xff] %v8700_v36 }
 0x260   : > { %v2751_v55 = vpop.f32.mrf.mxu2 }
 0x261   : > { %v8698_v44 = vadd.f32 %v2751_v55, %v2662_v19  ;;  %3417 = vmatmul.bf16.gmra.mxu1 %v5797_v23  ;;  %v5717_v55 = vor.u32 %v6346_v57, %v5716_v15  ;;  %v6439_v19 = vld [vmem:[#allocation2 + $0xd0] sm:$0xf0] }
 0x262   : > { %v8702_v16 = vpop.f32.mrf.mxu3  ;;  %v5513_v45 = vor.u32 %v6439_v19, %v5512_v40 }
 0x263   : > { %4163 = vmatmul.bf16.vlgmr.msra.gmra.mxu0 %v6001_v63  ;;  %9679 = vst [vmem:[#allocation32_spill] sm:$0xff] %v8702_v16  ;;  %v6368_v63 = vld [vmem:[#allocation2 + $0xc4] sm:$0xf] }
 0x264   : > { %v5809_v13 = vor.u32 %v6368_v63, %v5806_v27 }
 0x265   : > { %v8710_v36 = vpop.f32.mrf.mxu0 }
 0x266   : > { %v2664_v47 = vpop.f32.mrf.mxu1  ;;  %9680 = vst [vmem:[#allocation33_spill] sm:$0xff] %v8710_v36  ;;  %v5524_v36 = vld [vmem:[#allocation2 + $0xe0] sm:$0xf] }
 0x268   : > { %v2753_v17 = vpop.f32.mrf.mxu2 }
 0x269   : > { %v8704_v28 = vadd.f32 %v2753_v17, %v2664_v47  ;;  %v6349_v17 = vld [vmem:[#allocation2 + $0x28] sm:$0xf0] }
 0x26d   : > { %3471 = vmatmul.bf16.vlgmr.msra.gmra.mxu2 %v5717_v55  ;;  %v5728_v55 = vld [vmem:[#allocation2 + $0x20] sm:$0xf]  ;;  %v8718_v19 = vpop.f32.mrf.mxu0 }
 0x26e   : > { %2839 = vmatmul.bf16.gmra.mxu3 %v5513_v45  ;;  %v8708_v10 = vpop.f32.mrf.mxu1  ;;  %9682 = vst [vmem:[#allocation35_spill] sm:$0xff] %v8718_v19  ;;  %v6442_v45 = vld [vmem:[#allocation2 + $0xe8] sm:$0xf0]  ;;  %v5729_v25 = vor.u32 %v6349_v17, %v5728_v55 }
 0x26f   : > { %v5525_v27 = vor.u32 %v6442_v45, %v5524_v36  ;;  %v6554_v36 = vld [vmem:[#allocation8 + $0x210] sm:$0xff] }
 0x270   : > { %v8706_v23 = vpop.f32.mrf.mxu2  ;;  %4249 = vmatpush.bf16.msra.mxu1 %v6554_v36  ;;  %v6497_v36 = vld [vmem:[#allocation2 + $0x7c] sm:$0xf] }
 0x271   : > { %v8712_v47 = vpop.f32.mrf.mxu3  ;;  %3422 = vmatmul.bf16.gmra.mxu1 %v5809_v13  ;;  %v6371_v13 = vld [vmem:[#allocation2 + $0xdc] sm:$0xf] }
 0x272   : > { %9681 = vst [vmem:[#allocation34_spill] sm:$0xff] %v8712_v47  ;;  %v5821_v4 = vor.u32 %v6371_v13, %v5818_v58  ;;  %v6374_v47 = vld [vmem:[#allocation2 + $0xf4] sm:$0xf] }
 0x273   : > { %4168 = vmatmul.bf16.gmra.mxu0 %v6013_v9 }
 0x276   : > { %v8716_v57 = vpop.f32.mrf.mxu1 }
 0x278   : > { %v8714_v15 = vpop.f32.mrf.mxu2 }
 0x279   : > { %v8720_v40 = vpop.f32.mrf.mxu3 }
 0x27a   : > { %9683 = vst [vmem:[#allocation36_spill] sm:$0xff] %v8720_v40  ;;  %v5740_v40 = vld [vmem:[#allocation2 + $0x38] sm:$0xf] }
 0x27d   : > { %3476 = vmatmul.bf16.gmra.mxu2 %v5729_v25  ;;  %v8729_v25 = vpop.f32.mrf.mxu0 }
 0x27e   : > { %2844 = vmatmul.bf16.gmra.mxu3 %v5525_v27  ;;  %v8724_v9 = vpop.f32.mrf.mxu1  ;;  %9684 = vst [vmem:[#allocation37_spill] sm:$0xff] %v8729_v25  ;;  %v6352_v27 = vld [vmem:[#allocation2 + $0x40] sm:$0xf0] }
 0x27f   : > { %v5741_v54 = vor.u32 %v6352_v27, %v5740_v40 }
 0x280   : > { %v8722_v63 = vpop.f32.mrf.mxu2 }
 0x281   : > { %v2805_v19 = vpop.f32.mrf.mxu3  ;;  %3427 = vmatmul.bf16.gmra.mxu1 %v5821_v4  ;;  %v5537_v4 = vor.u32 %v6445_v37, %v5536_v21 }
 0x282   : > { %v8727_v17 = vadd.f32 %v2805_v19, %v8581_v61  ;;  %v5830_v61 = vld [vmem:[#allocation2 + $0xfc] sm:$0xf0] }
 0x283   : > { %4173 = vmatmul.bf16.gmra.mxu0 %v6025_v50  ;;  %v6034_v50 = vld [vmem:[#allocation2 + $0x84] sm:$0xf0]  ;;  %v5833_v16 = vor.u32 %v6374_v47, %v5830_v61  ;;  %v5548_v61 = vld [vmem:[#allocation2 + $0x110] sm:$0xf] }
 0x284   : > { %v6037_v48 = vor.u32 %v6497_v36, %v6034_v50  ;;  %v5549_v50 = vor.u32 %v6448_v24, %v5548_v61  ;;  %v6046_v36 = vld [vmem:[#allocation2 + $0x9c] sm:$0xf0]  ;;  %v6553_v24 = vld [vmem:[#allocation8 + $0x208] sm:$0xff]  ;;  %v6358_v61 = vld [vmem:[#allocation2 + $0x70] sm:$0xf0] }
 0x285   : > { %v8737_v19 = vpop.f32.mrf.mxu0  ;;  %4250 = vmatpush.bf16.msra.mxu1 %v6553_v24  ;;  %v6503_v24 = vld [vmem:[#allocation2 + $0xac] sm:$0xf] }
 0x286   : > { %v8733_v45 = vpop.f32.mrf.mxu1  ;;  %9685 = vst [vmem:[#allocation38_spill] sm:$0xff] %v8737_v19 }
 0x288   : > { %v8731_v55 = vpop.f32.mrf.mxu2 }
 0x289   : > { %v8735_v58 = vpop.f32.mrf.mxu3 }
 0x28d   : > { %3481 = vmatmul.bf16.gmra.mxu2 %v5741_v54  ;;  %v6355_v54 = vld [vmem:[#allocation2 + $0x58] sm:$0xf0]  ;;  %v8750_v21 = vpop.f32.mrf.mxu0 }
 0x28e   : > { %2849 = vmatmul.bf16.gmra.mxu3 %v5537_v4  ;;  %v8741_v25 = vpop.f32.mrf.mxu1  ;;  %9688 = vst [vmem:[#allocation41_spill] sm:$0xff] %v8750_v21  ;;  %v5752_v4 = vld [vmem:[#allocation2 + $0x50] sm:$0xf]  ;;  %v6049_v21 = vor.u32 %v6500_v49, %v6046_v36  ;;  %v6451_v49 = vld [vmem:[#allocation2 + $0x130] sm:$0xf0] }
 0x28f   : > { %v5753_v47 = vor.u32 %v6355_v54, %v5752_v4 }
 0x290   : > { %v8739_v13 = vpop.f32.mrf.mxu2 }
 0x291   : > { %9686 = vst [vmem:[#allocation39_spill] sm:$0xff] %v8739_v13  ;;  %v2810_v20 = vpop.f32.mrf.mxu3  ;;  %3432 = vmatmul.bf16.gmra.mxu1 %v5833_v16  ;;  %v5842_v16 = vld [vmem:[#allocation2 + $0x114] sm:$0xf0] }
 0x292   : > { %v8744_v40 = vadd.f32 %v2810_v20, %v8607_v0 }
 0x293   : > { %4178 = vmatmul.bf16.gmra.mxu0 %v6037_v48  ;;  %v6377_v48 = vld [vmem:[#allocation2 + $0x10c] sm:$0xf] }
 0x294   : > { %v5845_v46 = vor.u32 %v6377_v48, %v5842_v16  ;;  %v5560_v48 = vld [vmem:[#allocation2 + $0x128] sm:$0xf] }
 0x295   : > { %v8758_v39 = vpop.f32.mrf.mxu0 }
 0x296   : > { %v8748_v37 = vpop.f32.mrf.mxu1  ;;  %9690 = vst [vmem:[#allocation43_spill] sm:$0xff] %v8758_v39 }
 0x298   : > { %v8746_v27 = vpop.f32.mrf.mxu2 }
 0x299   : > { %9687 = vst [vmem:[#allocation40_spill] sm:$0xff] %v8746_v27  ;;  %v8752_v19 = vpop.f32.mrf.mxu3 }
 0x29d   : > { %3486 = vmatmul.bf16.gmra.mxu2 %v5753_v47  ;;  %v8769_v36 = vpop.f32.mrf.mxu0 }
 0x29e   : > { %2854 = vmatmul.bf16.gmra.mxu3 %v5549_v50  ;;  %v8756_v20 = vpop.f32.mrf.mxu1  ;;  %v5764_v50 = vld [vmem:[#allocation2 + $0x68] sm:$0xf]  ;;  %9693 = vst [vmem:[#allocation46_spill] sm:$0xff] %v8769_v36 }
 0x29f   : > { %v5765_v56 = vor.u32 %v6358_v61, %v5764_v50 }
 0x2a0   : > { %v8754_v0 = vpop.f32.mrf.mxu2 }
 0x2a1   : > { %9689 = vst [vmem:[#allocation42_spill] sm:$0xff] %v8754_v0  ;;  %v2815_v27 = vpop.f32.mrf.mxu3  ;;  %3437 = vmatmul.bf16.gmra.mxu1 %v5845_v46  ;;  %v5561_v46 = vor.u32 %v6451_v49, %v5560_v48  ;;  %v6361_v48 = vld [vmem:[#allocation2 + $0x88] sm:$0xf0] }
 0x2a2   : > { %v8761_v54 = vadd.f32 %v2815_v27, %v8628_v8  ;;  %v5854_v8 = vld [vmem:[#allocation2 + $0x12c] sm:$0xf0]  ;;  %v6058_v27 = vld [vmem:[#allocation2 + $0xb4] sm:$0xf0] }
 0x2a3   : > { %4183 = vmatmul.bf16.gmra.mxu0 %v6049_v21  ;;  %v6061_v33 = vor.u32 %v6503_v24, %v6058_v27  ;;  %v6070_v24 = vld [vmem:[#allocation2 + $0xcc] sm:$0xf0] }
 0x2a5   : > { %v8778_v50 = vpop.f32.mrf.mxu0 }
 0x2a6   : > { %v8765_v47 = vpop.f32.mrf.mxu1  ;;  %9696 = vst [vmem:[#allocation49_spill] sm:$0xff] %v8778_v50  ;;  %v6536_v50 = vld [vmem:[#allocation8 + $0x180] sm:$0xff] }
 0x2a7   : > { %9692 = vst [vmem:[#allocation45_spill] sm:$0xff] %v8765_v47  ;;  %4073 = vmatpush.bf16.msra.mxu3 %v6536_v50 }
 0x2a8   : > { %v8763_v4 = vpop.f32.mrf.mxu2 }
 0x2a9   : > { %9691 = vst [vmem:[#allocation44_spill] sm:$0xff] %v8763_v4  ;;  %v8767_v16 = vpop.f32.mrf.mxu3  ;;  %v6380_v4 = vld [vmem:[#allocation2 + $0x124] sm:$0xf] }
 0x2aa   : > { %v5857_v0 = vor.u32 %v6380_v4, %v5854_v8  ;;  %v5572_v8 = vld [vmem:[#allocation2 + $0x140] sm:$0xf] }
 0x2ad   : > { %3491 = vmatmul.bf16.gmra.mxu2 %v5765_v56 }
 0x2ae   : > { %2859 = vmatmul.bf16.gmra.mxu3 %v5561_v46  ;;  %v8773_v39 = vpop.f32.mrf.mxu1  ;;  %v5776_v46 = vld [vmem:[#allocation2 + $0x80] sm:$0xf] }
 0x2af   : > { %9695 = vst [vmem:[#allocation48_spill] sm:$0xff] %v8773_v39  ;;  %v6454_v39 = vld [vmem:[#allocation2 + $0x148] sm:$0xf0]  ;;  %v5777_v4 = vor.u32 %v6361_v48, %v5776_v46 }
 0x2b0   : > { %v8771_v21 = vpop.f32.mrf.mxu2  ;;  %v5573_v27 = vor.u32 %v6454_v39, %v5572_v8  ;;  %v6552_v39 = vld [vmem:[#allocation8 + $0x200] sm:$0xff]  ;;  %v6364_v8 = vld [vmem:[#allocation2 + $0xa0] sm:$0xf0] }
 0x2b1   : > { %9694 = vst [vmem:[#allocation47_spill] sm:$0xff] %v8771_v21  ;;  %v2820_v47 = vpop.f32.mrf.mxu3  ;;  %3442 = vmatmul.bf16.gmra.mxu1 %v5857_v0  ;;  %v5866_v0 = vld [vmem:[#allocation2 + $0x144] sm:$0xf0]  ;;  %v6506_v21 = vld [vmem:[#allocation2 + $0xc4] sm:$0xf] }
 0x2b2   : > { %v8776_v61 = vadd.f32 %v2820_v47, %v8640_v5  ;;  %v6383_v47 = vld [vmem:[#allocation2 + $0x13c] sm:$0xf]  ;;  %v6073_v22 = vor.u32 %v6506_v21, %v6070_v24  ;;  %4251 = vmatpush.bf16.msra.mxu1 %v6552_v39  ;;  %v6386_v39 = vld [vmem:[#allocation2 + $0x154] sm:$0xf] }
 0x2b3   : > { %4188 = vmatmul.bf16.gmra.mxu0 %v6061_v33 }
 0x2b6   : > { %v8782_v56 = vpop.f32.mrf.mxu1 }
 0x2b7   : > { %9698 = vst [vmem:[#allocation51_spill] sm:$0xff] %v8782_v56  ;;  %v5869_v56 = vor.u32 %v6383_v47, %v5866_v0  ;;  %v6457_v47 = vld [vmem:[#allocation2 + $0x160] sm:$0xf0] }
 0x2b8   : > { %v8780_v49 = vpop.f32.mrf.mxu2 }
 0x2b9   : > { %9697 = vst [vmem:[#allocation50_spill] sm:$0xff] %v8780_v49  ;;  %v8784_v36 = vpop.f32.mrf.mxu3  ;;  %v8790_v49 = vpop.f32.mrf.mxu0 }
 0x2ba   : > { %9700 = vst [vmem:[#allocation53_spill] sm:$0xff] %v8790_v49 }
 0x2bd   : > { %3496 = vmatmul.bf16.gmra.mxu2 %v5777_v4 }
 0x2be   : > { %2864 = vmatmul.bf16.gmra.mxu3 %v5573_v27  ;;  %v8788_v33 = vpop.f32.mrf.mxu1  ;;  %v5788_v27 = vld [vmem:[#allocation2 + $0x98] sm:$0xf] }
 0x2bf   : > { %9699 = vst [vmem:[#allocation52_spill] sm:$0xff] %v8788_v33  ;;  %v5789_v21 = vor.u32 %v6364_v8, %v5788_v27 }
 0x2c0   : > { %v8786_v5 = vpop.f32.mrf.mxu2 }
 0x2c1   : > { %v2825_v13 = vpop.f32.mrf.mxu3  ;;  %3447 = vmatmul.bf16.gmra.mxu1 %v5869_v56  ;;  %v8799_v33 = vpop.f32.mrf.mxu0  ;;  %v5584_v56 = vld [vmem:[#allocation2 + $0x158] sm:$0xf] }
 0x2c2   : > { %v8793_v48 = vadd.f32 %v2825_v13, %v8664_v32  ;;  %9704 = vst [vmem:[#allocation57_spill] sm:$0xff] %v8799_v33  ;;  %v5585_v32 = vor.u32 %v6457_v47, %v5584_v56  ;;  %v6082_v13 = vld [vmem:[#allocation2 + $0xe4] sm:$0xf0]  ;;  %v6367_v47 = vld [vmem:[#allocation2 + $0xb8] sm:$0xf0] }
 0x2c3   : > { %4193 = vmatmul.bf16.gmra.mxu0 %v6073_v22  ;;  %v5878_v22 = vld [vmem:[#allocation2 + $0x15c] sm:$0xf0] }
 0x2c4   : > { %9701 = vst [vmem:[#allocation54_spill] sm:$0xff] %v8793_v48  ;;  %v6509_v48 = vld [vmem:[#allocation2 + $0xdc] sm:$0xf] }
 0x2c5   : > { %v6085_v33 = vor.u32 %v6509_v48, %v6082_v13  ;;  %v5596_v48 = vld [vmem:[#allocation2 + $0x170] sm:$0xf] }
 0x2c6   : > { %v8797_v4 = vpop.f32.mrf.mxu1 }
 0x2c7   : > { %9703 = vst [vmem:[#allocation56_spill] sm:$0xff] %v8797_v4  ;;  %v5881_v4 = vor.u32 %v6386_v39, %v5878_v22 }
 0x2c8   : > { %v8795_v46 = vpop.f32.mrf.mxu2 }
 0x2c9   : > { %9702 = vst [vmem:[#allocation55_spill] sm:$0xff] %v8795_v46  ;;  %v2827_v0 = vpop.f32.mrf.mxu3 }
 0x2ca   : > { %v8802_v50 = vadd.f32 %v2827_v0, %v8668_v41  ;;  %v8811_v41 = vpop.f32.mrf.mxu0 }
 0x2cb   : > { %9708 = vst [vmem:[#allocation61_spill] sm:$0xff] %v8811_v41  ;;  %v6389_v41 = vld [vmem:[#allocation2 + $0x16c] sm:$0xf] }
 0x2cc   : > { %9705 = vst [vmem:[#allocation58_spill] sm:$0xff] %v8802_v50 }
 0x2cd   : > { %3501 = vmatmul.bf16.gmra.mxu2 %v5789_v21  ;;  %v5800_v21 = vld [vmem:[#allocation2 + $0xb0] sm:$0xf] }
 0x2ce   : > { %2869 = vmatmul.bf16.gmra.mxu3 %v5585_v32  ;;  %v8806_v49 = vpop.f32.mrf.mxu1  ;;  %v6460_v32 = vld [vmem:[#allocation2 + $0x178] sm:$0xf0] }
 0x2cf   : > { %9706 = vst [vmem:[#allocation59_spill] sm:$0xff] %v8806_v49  ;;  %v5801_v49 = vor.u32 %v6367_v47, %v5800_v21 }
 0x2d0   : > { %v8804_v24 = vpop.f32.mrf.mxu2 }
 0x2d1   : > { %v2830_v46 = vpop.f32.mrf.mxu3  ;;  %3452 = vmatmul.bf16.gmra.mxu1 %v5881_v4  ;;  %v5597_v4 = vor.u32 %v6460_v32, %v5596_v48  ;;  %v5812_v48 = vld [vmem:[#allocation2 + $0xc8] sm:$0xf] }
 0x2d2   : > { %v8809_v8 = vadd.f32 %v2830_v46, %v8674_v31  ;;  %v5890_v31 = vld [vmem:[#allocation2 + $0x174] sm:$0xf0]  ;;  %v8820_v46 = vpop.f32.mrf.mxu0 }
 0x2d3   : > { %4198 = vmatmul.bf16.gmra.mxu0 %v6085_v33  ;;  %9710 = vst [vmem:[#allocation63_spill] sm:$0xff] %v8820_v46  ;;  %v6094_v33 = vld [vmem:[#allocation2 + $0xfc] sm:$0xf0] }
 0x2d4   : > { %9707 = vst [vmem:[#allocation60_spill] sm:$0xff] %v8809_v8  ;;  %v6512_v8 = vld [vmem:[#allocation2 + $0xf4] sm:$0xf] }
 0x2d5   : > { %v6097_v50 = vor.u32 %v6512_v8, %v6094_v33 }
 0x2d6   : > { %v8815_v0 = vpop.f32.mrf.mxu1 }
 0x2d7   : > { %9709 = vst [vmem:[#allocation62_spill] sm:$0xff] %v8815_v0  ;;  %v5893_v0 = vor.u32 %v6389_v41, %v5890_v31  ;;  %v6463_v31 = vld [vmem:[#allocation2 + $0x190] sm:$0xf0] }
 0x2d8   : > { %v8813_v27 = vpop.f32.mrf.mxu2 }
 0x2d9   : > { %v2832_v56 = vpop.f32.mrf.mxu3 }
 0x2da   : > { %v8818_v22 = vadd.f32 %v2832_v56, %v8680_v14  ;;  %v6370_v56 = vld [vmem:[#allocation2 + $0xd0] sm:$0xf0]  ;;  %v8833_v32 = vpop.f32.mrf.mxu0 }
 0x2db   : > { %9713 = vst [vmem:[#allocation66_spill] sm:$0xff] %v8833_v32  ;;  %v5813_v8 = vor.u32 %v6370_v56, %v5812_v48  ;;  %v6004_v56 = vld [vmem:[#allocation2 + $0x38] sm:$0xf] }
 0x2dd   : > { %3506 = vmatmul.bf16.gmra.mxu2 %v5801_v49 }
 0x2de   : > { %2874 = vmatmul.bf16.gmra.mxu3 %v5597_v4  ;;  %v8824_v39 = vpop.f32.mrf.mxu1  ;;  %v3295_v4 = vadd.f32 %v8577_v1, %v8727_v17 }
 0x2df   : > { %9711 = vst [vmem:[#allocation64_spill] sm:$0xff] %v8824_v39 }
 0x2e0   : > { %v8822_v13 = vpop.f32.mrf.mxu2  ;;  %v3384_v32 = vadd.f32 %v8708_v10, %v3295_v4 }
 0x2e1   : > { %v2835_v47 = vpop.f32.mrf.mxu3  ;;  %3457 = vmatmul.bf16.gmra.mxu1 %v5893_v0 }
 0x2e2   : > { %v8827_v14 = vadd.f32 %v2835_v47, %v8684_v35  ;;  %v2719_v35 = vadd.f32 %v8597_v30, %v8599_v11  ;;  %v6490_v47 = vld [vmem:[#allocation2 + $0x40] sm:$0xf0]  ;;  %v8849_v11 = vpop.f32.mrf.mxu0 }
 0x2e3   : > { %4203 = vmatmul.bf16.gmra.mxu0 %v6097_v50  ;;  %v5608_v50 = vld [vmem:[#allocation2 + $0x188] sm:$0xf]  ;;  %9714 = vst [vmem:[#allocation67_spill] sm:$0xff] %v8849_v11 }
 0x2e4   : > { %v5609_v33 = vor.u32 %v6463_v31, %v5608_v50  ;;  %v2808_v46 = vadd.f32 %v8735_v58, %v2719_v35  ;;  %v5824_v50 = vld [vmem:[#allocation2 + $0xe0] sm:$0xf] }
 0x2e6   : > { %v8831_v21 = vpop.f32.mrf.mxu1  ;;  %v3297_v30 = vadd.f32 %v8605_v60, %v2808_v46  ;;  %v3300_v60 = vadd.f32 %v8614_v59, %v8744_v40  ;;  %v6118_v59 = vld [vmem:[#allocation2 + $0x12c] sm:$0xf0] }
 0x2e7   : > { %9712 = vst [vmem:[#allocation65_spill] sm:$0xff] %v8831_v21  ;;  %v6106_v21 = vld [vmem:[#allocation2 + $0x114] sm:$0xf0] }
 0x2e8   : > { %v8829_v49 = vpop.f32.mrf.mxu2  ;;  %v3386_v10 = vadd.f32 %v8716_v57, %v3297_v30 }
 0x2e9   : > { %v2837_v41 = vpop.f32.mrf.mxu3 }
 0x2ea   : > { %v8838_v0 = vadd.f32 %v2837_v41, %v8692_v18  ;;  %v6515_v18 = vld [vmem:[#allocation2 + $0x10c] sm:$0xf]  ;;  %v6005_v41 = vor.u32 %v6490_v47, %v6004_v56  ;;  %v8866_v57 = vpop.f32.mrf.mxu0  ;;  %v6493_v56 = vld [vmem:[#allocation2 + $0x58] sm:$0xf0] }
 0x2eb   : > { %v6109_v39 = vor.u32 %v6515_v18, %v6106_v21  ;;  %v6489_v21 = vld [vmem:[#allocation2 + $0x38] sm:$0xf0]  ;;  %9715 = vst [vmem:[#allocation68_spill] sm:$0xff] %v8866_v57 }
 0x2ed   : > { %3511 = vmatmul.bf16.gmra.mxu2 %v5813_v8 }
 0x2ee   : > { %2879 = vmatmul.bf16.gmra.mxu3 %v5609_v33  ;;  %v8844_v17 = vpop.f32.mrf.mxu1 }
 0x2f0   : > { %v3472_v1 = vpop.f32.mrf.mxu2 }
 0x2f1   : > { %v8846_v48 = vadd.f32 %v3472_v1, %v3384_v32  ;;  %v2840_v31 = vpop.f32.mrf.mxu3  ;;  %4252 = vmatmul.bf16.vlgmr.msra.gmra.mxu1 %v6005_v41  ;;  %v6373_v32 = vld [vmem:[#allocation2 + $0xe8] sm:$0xf0]  ;;  %v3389_v41 = vadd.f32 %v8724_v9, %v3300_v60 }
 0x2f2   : > { %v8852_v58 = vadd.f32 %v2840_v31, %v8698_v44  ;;  %v5825_v33 = vor.u32 %v6373_v32, %v5824_v50  ;;  %v2724_v44 = vadd.f32 %v8618_v29, %v8622_v52  ;;  %v2757_v52 = vadd.f32 %v8706_v23, %v8620_v43  ;;  %v8879_v9 = vpop.f32.mrf.mxu0  ;;  %v5836_v23 = vld [vmem:[#allocation2 + $0xf8] sm:$0xf] }
 0x2f3   : > { %4208 = vmatmul.bf16.gmra.mxu0 %v6109_v39  ;;  %v5996_v39 = vld [vmem:[#allocation2 + $0x30] sm:$0xf]  ;;  %9716 = vst [vmem:[#allocation69_spill] sm:$0xff] %v8879_v9  ;;  %v2759_v43 = vadd.f32 %v8714_v15, %v8626_v53  ;;  %v6130_v15 = vld [vmem:[#allocation2 + $0x144] sm:$0xf0] }
 0x2f4   : > { %v5997_v1 = vor.u32 %v6489_v21, %v5996_v39  ;;  %v2813_v18 = vadd.f32 %v8752_v19, %v2724_v44 }
 0x2f6   : > { %v8855_v8 = vpop.f32.mrf.mxu1  ;;  %v3302_v32 = vadd.f32 %v8624_v34, %v2813_v18  ;;  %v3305_v34 = vadd.f32 %v8632_v38, %v8761_v54  ;;  %v6028_v54 = vld [vmem:[#allocation2 + $0x68] sm:$0xf] }
 0x2f8   : > { %v3474_v4 = vpop.f32.mrf.mxu2  ;;  %v3391_v60 = vadd.f32 %v8733_v45, %v3302_v32  ;;  %v2729_v45 = vadd.f32 %v8630_v62, %v8634_v3  ;;  %v3394_v53 = vadd.f32 %v8741_v25, %v3305_v34  ;;  %v2762_v62 = vadd.f32 %v8722_v63, %v8636_v6  ;;  %v5848_v63 = vld [vmem:[#allocation2 + $0x110] sm:$0xf] }
 0x2f9   : > { %v8857_v35 = vadd.f32 %v3474_v4, %v3386_v10  ;;  %v2842_v46 = vpop.f32.mrf.mxu3  ;;  %v6518_v10 = vld [vmem:[#allocation2 + $0x124] sm:$0xf]  ;;  %v2764_v6 = vadd.f32 %v8731_v55, %v8642_v2 }
 0x2fa   : > { %v8862_v47 = vadd.f32 %v2842_v46, %v8704_v28  ;;  %v6016_v28 = vld [vmem:[#allocation2 + $0x50] sm:$0xf]  ;;  %v6121_v4 = vor.u32 %v6518_v10, %v6118_v59  ;;  %v8902_v3 = vpop.f32.mrf.mxu0 }
 0x2fb   : > { %v6017_v29 = vor.u32 %v6493_v56, %v6016_v28  ;;  %v2818_v28 = vadd.f32 %v8767_v16, %v2729_v45 }
 0x2fd   : > { %3516 = vmatmul.bf16.gmra.mxu2 %v5825_v33  ;;  %v6376_v33 = vld [vmem:[#allocation2 + $0x100] sm:$0xf0]  ;;  %v3307_v16 = vadd.f32 %v8638_v12, %v2818_v28  ;;  %v3310_v12 = vadd.f32 %v8644_v7, %v8776_v61  ;;  %v6142_v28 = vld [vmem:[#allocation2 + $0x15c] sm:$0xf0] }
 0x2fe   : > { %4074 = vmatmul.bf16.vlgmr.msra.gmra.mxu3 %v5997_v1  ;;  %v8870_v30 = vpop.f32.mrf.mxu1  ;;  %v6492_v1 = vld [vmem:[#allocation2 + $0x50] sm:$0xf0]  ;;  %v5837_v56 = vor.u32 %v6376_v33, %v5836_v23 }
 0x2ff   : > { %v3399_v55 = vadd.f32 %v8756_v20, %v3310_v12 }
 0x300   : > { %v3477_v40 = vpop.f32.mrf.mxu2 }
 0x301   : > { %v8872_v31 = vadd.f32 %v3477_v40, %v3389_v41  ;;  %v2845_v50 = vpop.f32.mrf.mxu3  ;;  %4257 = vmatmul.bf16.gmra.mxu1 %v6017_v29  ;;  %v6008_v41 = vld [vmem:[#allocation2 + $0x48] sm:$0xf]  ;;  %v6496_v40 = vld [vmem:[#allocation2 + $0x70] sm:$0xf0] }
 0x302   : > { %v8877_v19 = vadd.f32 %v2845_v50, %v2757_v52  ;;  %v6009_v59 = vor.u32 %v6492_v1, %v6008_v41  ;;  %v6521_v52 = vld [vmem:[#allocation2 + $0x13c] sm:$0xf]  ;;  %v6020_v41 = vld [vmem:[#allocation2 + $0x60] sm:$0xf] }
 0x303   : > { %4213 = vmatmul.bf16.gmra.mxu0 %v6121_v4  ;;  %v6029_v4 = vor.u32 %v6496_v40, %v6028_v54  ;;  %v6133_v32 = vor.u32 %v6521_v52, %v6130_v15  ;;  %v6499_v40 = vld [vmem:[#allocation2 + $0x88] sm:$0xf0] }
 0x306   : > { %v8882_v21 = vpop.f32.mrf.mxu1 }
 0x308   : > { %v3479_v46 = vpop.f32.mrf.mxu2 }
 0x309   : > { %v8884_v44 = vadd.f32 %v3479_v46, %v3391_v60  ;;  %v2847_v39 = vpop.f32.mrf.mxu3  ;;  %v3396_v60 = vadd.f32 %v8748_v37, %v3307_v16  ;;  %v2734_v37 = vadd.f32 %v8658_v42, %v8654_v26  ;;  %v9717_v26 = vld [vmem:[#allocation39_spill] sm:$0xff]  ;;  %v9719_v16 = vld [vmem:[#allocation45_spill] sm:$0xff] }
 0x30a   : > { %v8890_v18 = vadd.f32 %v2847_v39, %v2759_v43  ;;  %v6379_v43 = vld [vmem:[#allocation2 + $0x118] sm:$0xf0]  ;;  %v6495_v39 = vld [vmem:[#allocation2 + $0x68] sm:$0xf0]  ;;  %v2767_v42 = vadd.f32 %v9717_v26, %v8646_v51 }
 0x30b   : > { %v5849_v1 = vor.u32 %v6379_v43, %v5848_v63  ;;  %v2823_v2 = vadd.f32 %v8784_v36, %v2734_v37  ;;  %v9720_v63 = vld [vmem:[#allocation16_spill] sm:$0xff]  ;;  %v9723_v26 = vld [vmem:[#allocation42_spill] sm:$0xff] }
 0x30c   : > { %v9721_v51 = vld [vmem:[#allocation40_spill] sm:$0xff] }
 0x30d   : > { %3521 = vmatmul.bf16.gmra.mxu2 %v5837_v56  ;;  %v8916_v56 = vpop.f32.mrf.mxu0  ;;  %v2769_v12 = vadd.f32 %v9721_v51, %v9720_v63  ;;  %v5872_v51 = vld [vmem:[#allocation2 + $0x140] sm:$0xf] }
 0x30e   : > { %4079 = vmatmul.bf16.gmra.mxu3 %v6009_v59  ;;  %v8896_v38 = vpop.f32.mrf.mxu1  ;;  %v6021_v59 = vor.u32 %v6495_v39, %v6020_v41 }
 0x310   : > { %v3482_v10 = vpop.f32.mrf.mxu2 }
 0x311   : > { %v8898_v29 = vadd.f32 %v3482_v10, %v3394_v53  ;;  %v2850_v50 = vpop.f32.mrf.mxu3  ;;  %4262 = vmatmul.bf16.gmra.mxu1 %v6029_v4  ;;  %v6040_v53 = vld [vmem:[#allocation2 + $0x80] sm:$0xf]  ;;  %v6524_v10 = vld [vmem:[#allocation2 + $0x154] sm:$0xf] }
 0x312   : > { %v8905_v25 = vadd.f32 %v2850_v50, %v2762_v62  ;;  %v6041_v54 = vor.u32 %v6499_v40, %v6040_v53  ;;  %v6145_v52 = vor.u32 %v6524_v10, %v6142_v28  ;;  %v9718_v4 = vld [vmem:[#allocation15_spill] sm:$0xff]  ;;  %v6527_v53 = vld [vmem:[#allocation2 + $0x16c] sm:$0xf] }
 0x313   : > { %4218 = vmatmul.bf16.gmra.mxu0 %v6133_v32  ;;  %v3312_v62 = vadd.f32 %v9718_v4, %v2823_v2  ;;  %v6502_v2 = vld [vmem:[#allocation2 + $0xa0] sm:$0xf0] }
 0x315   : > { %v8933_v20 = vpop.f32.mrf.mxu0  ;;  %v3401_v50 = vadd.f32 %v9719_v16, %v3312_v62  ;;  %v6385_v16 = vld [vmem:[#allocation2 + $0x148] sm:$0xf0] }
 0x316   : > { %v8908_v33 = vpop.f32.mrf.mxu1 }
 0x318   : > { %v3484_v46 = vpop.f32.mrf.mxu2 }
 0x319   : > { %v8910_v23 = vadd.f32 %v3484_v46, %v3396_v60  ;;  %v2852_v34 = vpop.f32.mrf.mxu3  ;;  %v6382_v46 = vld [vmem:[#allocation2 + $0x130] sm:$0xf0] }
 0x31a   : > { %v8918_v45 = vadd.f32 %v2852_v34, %v2764_v6  ;;  %v5860_v34 = vld [vmem:[#allocation2 + $0x128] sm:$0xf] }
 0x31b   : > { %v5861_v37 = vor.u32 %v6382_v46, %v5860_v34  ;;  %v6501_v34 = vld [vmem:[#allocation2 + $0x98] sm:$0xf0] }
 0x31d   : > { %3526 = vmatmul.bf16.gmra.mxu2 %v5849_v1  ;;  %v6498_v1 = vld [vmem:[#allocation2 + $0x80] sm:$0xf0]  ;;  %v8944_v28 = vpop.f32.mrf.mxu0 }
 0x31e   : > { %4084 = vmatmul.bf16.gmra.mxu3 %v6021_v59  ;;  %v8924_v61 = vpop.f32.mrf.mxu1  ;;  %v6032_v59 = vld [vmem:[#allocation2 + $0x78] sm:$0xf] }
 0x31f   : > { %v6033_v40 = vor.u32 %v6498_v1, %v6032_v59  ;;  %v6044_v59 = vld [vmem:[#allocation2 + $0x90] sm:$0xf] }
 0x320   : > { %v3487_v7 = vpop.f32.mrf.mxu2 }
 0x321   : > { %v8926_v15 = vadd.f32 %v3487_v7, %v3399_v55  ;;  %v2855_v32 = vpop.f32.mrf.mxu3  ;;  %4267 = vmatmul.bf16.gmra.mxu1 %v6041_v54  ;;  %v6154_v55 = vld [vmem:[#allocation2 + $0x174] sm:$0xf0] }
 0x322   : > { %v8931_v36 = vadd.f32 %v2855_v32, %v2767_v42  ;;  %v6052_v7 = vld [vmem:[#allocation2 + $0x98] sm:$0xf] }
 0x323   : > { %4223 = vmatmul.bf16.gmra.mxu0 %v6145_v52  ;;  %v6053_v10 = vor.u32 %v6502_v2, %v6052_v7  ;;  %v9722_v54 = vld [vmem:[#allocation18_spill] sm:$0xff]  ;;  %v6157_v52 = vor.u32 %v6527_v53, %v6154_v55  ;;  %v6166_v55 = vld [vmem:[#allocation2 + $0x18c] sm:$0xf0]  ;;  %v6530_v53 = vld [vmem:[#allocation2 + $0x184] sm:$0xf] }
 0x324   : > { %v2772_v42 = vadd.f32 %v9723_v26, %v9722_v54  ;;  %v6505_v2 = vld [vmem:[#allocation2 + $0xb8] sm:$0xf0]  ;;  %v6064_v7 = vld [vmem:[#allocation2 + $0xb0] sm:$0xf]  ;;  %v9727_v26 = vld [vmem:[#allocation47_spill] sm:$0xff] }
 0x325   : > { %v8954_v63 = vpop.f32.mrf.mxu0  ;;  %v9726_v54 = vld [vmem:[#allocation22_spill] sm:$0xff] }
 0x326   : > { %v8938_v6 = vpop.f32.mrf.mxu1 }
 0x328   : > { %v3489_v60 = vpop.f32.mrf.mxu2 }
 0x329   : > { %v8936_v43 = vadd.f32 %v3489_v60, %v3401_v50  ;;  %v2857_v39 = vpop.f32.mrf.mxu3  ;;  %v9724_v50 = vld [vmem:[#allocation20_spill] sm:$0xff] }
 0x32a   : > { %v8942_v41 = vadd.f32 %v2857_v39, %v2769_v12  ;;  %v9725_v60 = vld [vmem:[#allocation44_spill] sm:$0xff]  ;;  %v5873_v39 = vor.u32 %v6385_v16, %v5872_v51 }
 0x32b   : > { %v2774_v46 = vadd.f32 %v9725_v60, %v9724_v50  ;;  %v9728_v51 = vld [vmem:[#allocation24_spill] sm:$0xff] }
 0x32d   : > { %3531 = vmatmul.bf16.gmra.mxu2 %v5861_v37  ;;  %v8962_v16 = vpop.f32.mrf.mxu0 }
 0x32e   : > { %4089 = vmatmul.bf16.gmra.mxu3 %v6033_v40  ;;  %v8948_v62 = vpop.f32.mrf.mxu1  ;;  %v6045_v40 = vor.u32 %v6501_v34, %v6044_v59 }
 0x331   : > { %v2860_v4 = vpop.f32.mrf.mxu3  ;;  %4272 = vmatmul.bf16.gmra.mxu1 %v6053_v10  ;;  %v6065_v10 = vor.u32 %v6505_v2, %v6064_v7 }
 0x332   : > { %v8950_v32 = vadd.f32 %v2860_v4, %v2772_v42  ;;  %v2777_v42 = vadd.f32 %v9727_v26, %v9726_v54  ;;  %v6076_v54 = vld [vmem:[#allocation2 + $0xc8] sm:$0xf] }
 0x333   : > { %4228 = vmatmul.bf16.gmra.mxu0 %v6157_v52  ;;  %v6169_v52 = vor.u32 %v6530_v53, %v6166_v55  ;;  %v6056_v55 = vld [vmem:[#allocation2 + $0xa8] sm:$0xf] }
 0x336   : > { %v8958_v37 = vpop.f32.mrf.mxu1 }
 0x339   : > { %v2862_v12 = vpop.f32.mrf.mxu3 }
 0x33a   : > { %v8956_v1 = vadd.f32 %v2862_v12, %v2774_v46  ;;  %v6388_v46 = vld [vmem:[#allocation2 + $0x160] sm:$0xf0]  ;;  %v9729_v12 = vld [vmem:[#allocation50_spill] sm:$0xff] }
 0x33b   : > { %v2779_v34 = vadd.f32 %v9729_v12, %v9728_v51  ;;  %v6391_v12 = vld [vmem:[#allocation2 + $0x178] sm:$0xf0] }
 0x33d   : > { %3536 = vmatmul.bf16.gmra.mxu2 %v5873_v39  ;;  %v5884_v39 = vld [vmem:[#allocation2 + $0x158] sm:$0xf] }
 0x33e   : > { %4094 = vmatmul.bf16.gmra.mxu3 %v6045_v40  ;;  %v8966_v60 = vpop.f32.mrf.mxu1  ;;  %v6504_v40 = vld [vmem:[#allocation2 + $0xb0] sm:$0xf0]  ;;  %v5885_v2 = vor.u32 %v6388_v46, %v5884_v39  ;;  %v9732_v46 = vld [vmem:[#allocation28_spill] sm:$0xff] }
 0x33f   : > { %v6057_v53 = vor.u32 %v6504_v40, %v6056_v55  ;;  %v6507_v55 = vld [vmem:[#allocation2 + $0xc8] sm:$0xf0] }
 0x341   : > { %v2865_v4 = vpop.f32.mrf.mxu3  ;;  %4277 = vmatmul.bf16.gmra.mxu1 %v6065_v10  ;;  %v6508_v10 = vld [vmem:[#allocation2 + $0xd0] sm:$0xf0] }
 0x342   : > { %v8964_v50 = vadd.f32 %v2865_v4, %v2777_v42  ;;  %v6077_v42 = vor.u32 %v6508_v10, %v6076_v54  ;;  %v6068_v10 = vld [vmem:[#allocation2 + $0xc0] sm:$0xf] }
 0x343   : > { %4233 = vmatmul.bf16.gmra.mxu0 %v6169_v52  ;;  %v9731_v52 = vld [vmem:[#allocation26_spill] sm:$0xff]  ;;  %v6069_v54 = vor.u32 %v6507_v55, %v6068_v10  ;;  %v6514_v10 = vld [vmem:[#allocation2 + $0x100] sm:$0xf0] }
 0x344   : > { %v2782_v4 = vadd.f32 %v8786_v5, %v9731_v52  ;;  %v6511_v5 = vld [vmem:[#allocation2 + $0xe8] sm:$0xf0]  ;;  %v9735_v52 = vld [vmem:[#allocation30_spill] sm:$0xff] }
 0x345   : > { %v6080_v55 = vld [vmem:[#allocation2 + $0xd8] sm:$0xf] }
 0x346   : > { %v8972_v26 = vpop.f32.mrf.mxu1 }
 0x347   : > { %9730 = vst [vmem:[#allocation39_spill] sm:$0xff] %v8972_v26 }
 0x349   : > { %v2867_v59 = vpop.f32.mrf.mxu3 }
 0x34a   : > { %v8970_v7 = vadd.f32 %v2867_v59, %v2779_v34  ;;  %v9733_v34 = vld [vmem:[#allocation55_spill] sm:$0xff]  ;;  %v5896_v59 = vld [vmem:[#allocation2 + $0x170] sm:$0xf] }
 0x34b   : > { %v2784_v39 = vadd.f32 %v9733_v34, %v9732_v46 }
 0x34d   : > { %3541 = vmatmul.bf16.gmra.mxu2 %v5885_v2 }
 0x34e   : > { %4099 = vmatmul.bf16.gmra.mxu3 %v6057_v53  ;;  %v8980_v2 = vpop.f32.mrf.mxu1  ;;  %v5897_v53 = vor.u32 %v6391_v12, %v5896_v59  ;;  %v6510_v59 = vld [vmem:[#allocation2 + $0xe0] sm:$0xf0] }
 0x34f   : > { %9734 = vst [vmem:[#allocation15_spill] sm:$0xff] %v8980_v2  ;;  %v9738_v2 = vld [vmem:[#allocation32_spill] sm:$0xff] }
 0x350   : > { %v2789_v12 = vadd.f32 %v8813_v27, %v9738_v2  ;;  %v9744_v2 = vld [vmem:[#allocation36_spill] sm:$0xff] }
 0x351   : > { %v2870_v9 = vpop.f32.mrf.mxu3  ;;  %4282 = vmatmul.bf16.gmra.mxu1 %v6077_v42  ;;  %v6088_v42 = vld [vmem:[#allocation2 + $0xe0] sm:$0xf] }
 0x352   : > { %v8976_v51 = vadd.f32 %v2870_v9, %v2782_v4  ;;  %v6089_v9 = vor.u32 %v6511_v5, %v6088_v42  ;;  %v2787_v4 = vadd.f32 %v8804_v24, %v9735_v52  ;;  %v6100_v24 = vld [vmem:[#allocation2 + $0xf8] sm:$0xf] }
 0x353   : > { %v6101_v5 = vor.u32 %v6514_v10, %v6100_v24  ;;  %v9741_v42 = vld [vmem:[#allocation34_spill] sm:$0xff]  ;;  %v6112_v10 = vld [vmem:[#allocation2 + $0x110] sm:$0xf] }
 0x356   : > { %v8988_v34 = vpop.f32.mrf.mxu1 }
 0x357   : > { %9737 = vst [vmem:[#allocation16_spill] sm:$0xff] %v8988_v34 }
 0x359   : > { %v2872_v40 = vpop.f32.mrf.mxu3 }
 0x35a   : > { %v8982_v57 = vadd.f32 %v2872_v40, %v2784_v39 }
 0x35d   : > { %3546 = vmatmul.bf16.gmra.mxu2 %v5897_v53  ;;  %v6081_v53 = vor.u32 %v6510_v59, %v6080_v55  ;;  %v6092_v55 = vld [vmem:[#allocation2 + $0xf0] sm:$0xf] }
 0x35e   : > { %4104 = vmatmul.bf16.gmra.mxu3 %v6069_v54  ;;  %v8994_v54 = vpop.f32.mrf.mxu1 }
 0x35f   : > { %9740 = vst [vmem:[#allocation18_spill] sm:$0xff] %v8994_v54  ;;  %v6517_v54 = vld [vmem:[#allocation2 + $0x118] sm:$0xf0] }
 0x360   : > { %v6113_v24 = vor.u32 %v6517_v54, %v6112_v10 }
 0x361   : > { %v2875_v11 = vpop.f32.mrf.mxu3  ;;  %4287 = vmatmul.bf16.gmra.mxu1 %v6089_v9 }
 0x362   : > { %v8986_v46 = vadd.f32 %v2875_v11, %v2787_v4  ;;  %v2792_v11 = vadd.f32 %v8822_v13, %v9741_v42  ;;  %v2794_v4 = vadd.f32 %v8829_v49, %v9744_v2  ;;  %v9010_v49 = vld [vmem:[%s9557_s4] ss:$0 sm:$0xff] }
 0x364   : > { %9736 = vst [vmem:[#allocation45_spill] sm:$0xff] %v8986_v46 }
 0x366   : > { %v9000_v27 = vpop.f32.mrf.mxu1 }
 0x367   : > { %9743 = vst [vmem:[#allocation20_spill] sm:$0xff] %v9000_v27 }
 0x369   : > { %v2877_v39 = vpop.f32.mrf.mxu3 }
 0x36a   : > { %v8992_v40 = vadd.f32 %v2877_v39, %v2789_v12  ;;  %v6513_v39 = vld [vmem:[#allocation2 + $0xf8] sm:$0xf0] }
 0x36c   : > { %9739 = vst [vmem:[#allocation40_spill] sm:$0xff] %v8992_v40 }
 0x36e   : > { %4109 = vmatmul.bf16.gmra.mxu3 %v6081_v53  ;;  %v6093_v53 = vor.u32 %v6513_v39, %v6092_v55  ;;  %v4253_v13 = vpop.f32.mrf.mxu1 }
 0x371   : > { %v2880_v9 = vpop.f32.mrf.mxu3  ;;  %4292 = vmatmul.bf16.gmra.mxu1 %v6101_v5 }
 0x372   : > { %v8998_v52 = vadd.f32 %v2880_v9, %v2792_v11 }
 0x374   : > { %9742 = vst [vmem:[#allocation42_spill] sm:$0xff] %v8998_v52 }
 0x376   : > { %v4255_v55 = vpop.f32.mrf.mxu1 }
 0x379   : > { %v2882_v12 = vpop.f32.mrf.mxu3 }
 0x37a   : > { %v9004_v59 = vadd.f32 %v2882_v12, %v2794_v4  ;;  %v6516_v12 = vld [vmem:[#allocation2 + $0x110] sm:$0xf0] }
 0x37c   : > { %9745 = vst [vmem:[#allocation44_spill] sm:$0xff] %v9004_v59 }
 0x37e   : > { %4114 = vmatmul.bf16.gmra.mxu3 %v6093_v53  ;;  %v6104_v53 = vld [vmem:[#allocation2 + $0x108] sm:$0xf] }
 0x37f   : > { %v6105_v10 = vor.u32 %v6516_v12, %v6104_v53 }
 0x381   : > { %v4075_v42 = vpop.f32.mrf.mxu3  ;;  %4297 = vmatmul.bf16.gmra.mxu1 %v6113_v24  ;;  %v6520_v24 = vld [vmem:[#allocation2 + $0x130] sm:$0xf0] }
 0x382   : > { %v4165_v5 = vadd.f32 %v8902_v3, %v4075_v42  ;;  %v6124_v42 = vld [vmem:[#allocation2 + $0x128] sm:$0xf] }
 0x384   : > { %v4254_v11 = vadd.f32 %v4253_v13, %v4165_v5 }
 0x386   : > { %v4333_v9 = vadd.f32 %v4254_v11, %v8846_v48  ;;  %v6125_v48 = vor.u32 %v6520_v24, %v6124_v42 }
 0x388   : > { %v9014_v2 = vadd.f32 %v9010_v49, %v4333_v9 }
 0x389   : > { %v4077_v4 = vpop.f32.mrf.mxu3 }
 0x38a   : > { %v6282_v54 = vmul.f32 -1.442695, %v9014_v2  ;;  %v4167_v39 = vadd.f32 %v8916_v56, %v4077_v4  ;;  %v4258_v56 = vpop.f32.mrf.mxu1 }
 0x38c   : > { %6874 = vpow2.f32 %v6282_v54  ;;  %v4256_v3 = vadd.f32 %v4255_v55, %v4167_v39  ;;  %v6519_v39 = vld [vmem:[#allocation2 + $0x128] sm:$0xf0] }
 0x38e   : > { %v4334_v13 = vadd.f32 %v4256_v3, %v8857_v35  ;;  %4119 = vmatmul.bf16.gmra.mxu3 %v6105_v10  ;;  %v6116_v10 = vld [vmem:[#allocation2 + $0x120] sm:$0xf] }
 0x38f   : > { %v6117_v42 = vor.u32 %v6519_v39, %v6116_v10 }
 0x390   : > { %v9020_v5 = vadd.f32 %v9010_v49, %v4334_v13 }
 0x391   : > { %4302 = vmatmul.bf16.gmra.mxu1 %v6125_v48  ;;  %v4080_v4 = vpop.f32.mrf.mxu3  ;;  %v6523_v48 = vld [vmem:[#allocation2 + $0x148] sm:$0xf0] }
 0x392   : > { %v6875_v11 = vpop.eup %6874  ;;  %v6283_v9 = vmul.f32 -1.442695, %v9020_v5  ;;  %v4170_v12 = vadd.f32 %v8933_v20, %v4080_v4  ;;  %v4260_v4 = vpop.f32.mrf.mxu1 }
 0x393   : > { %v4497_v27 = vadd.f32 1.0, %v6875_v11 }
 0x394   : > { %6876 = vpow2.f32 %v6283_v9  ;;  %v4259_v54 = vadd.f32 %v4258_v56, %v4170_v12  ;;  %v6136_v56 = vld [vmem:[#allocation2 + $0x140] sm:$0xf] }
 0x395   : > { %6878 = vrcp.f32 %v4497_v27  ;;  %v4538_v10 = vand.u32 2147483647, %v4497_v27  ;;  %vm4534_vm10 = vweird.f32 %v4497_v27 }
 0x396   : > { %v4335_v55 = vadd.f32 %v4259_v54, %v8872_v31  ;;  %v6137_v31 = vor.u32 %v6523_v48, %v6136_v56 }
 0x397   : > { %vm4539_vm12 = vcmp.eq.f32.partialorder %v4538_v10, 8.507059e+37 }
 0x398   : > { %v9026_v13 = vadd.f32 %v9010_v49, %v4335_v55 }
 0x399   : > { %v4082_v11 = vpop.f32.mrf.mxu3 }
 0x39a   : > { %v6877_v35 = vpop.eup %6876  ;;  %v6284_v59 = vmul.f32 -1.442695, %v9026_v13  ;;  %v4172_v20 = vadd.f32 %v8944_v28, %v4082_v11 }
 0x39b   : > { %v6879_v53 = vpop.eup %6878  ;;  %v4498_v3 = vadd.f32 1.0, %v6877_v35 }
 0x39c   : > { %v4530_v24 = vmul.f32 %v6879_v53, %v4497_v27  ;;  %v4261_v54 = vadd.f32 %v4260_v4, %v4172_v20  ;;  %vm4535_vm7 = vweird.f32 %v6879_v53 }
 0x39d   : > { %6880 = vrcp.f32 %v4498_v3  ;;  %vm9034_vm1 = vmor %vm4534_vm10, %vm4535_vm7  ;;  %v4555_v20 = vand.u32 2147483648, %v4498_v3  ;;  %vm4549_vm3 = vweird.f32 %v4498_v3 }
 0x39e   : > { %v4531_v9 = vsub.f32 1.0, %v4530_v24  ;;  %4124 = vmatmul.bf16.gmra.mxu3 %v6117_v42  ;;  %6882 = vpow2.f32 %v6284_v59  ;;  %v4336_v39 = vadd.f32 %v4261_v54, %v8884_v44  ;;  %v4540_v24 = vand.u32 2147483648, %v4497_v27  ;;  %v279_v27 = vld [vmem:[%s7315_s28] sm:$0xff]  }
 0x39f   : > { %v5041_v10 = vunpack.c.l.bf16 %v279_v27 }
 0x3a0   : > { %v4532_v12 = vmul.f32 %v6879_v53, %v4531_v9  ;;  %v9032_v28 = vadd.f32 %v9010_v49, %v4336_v39  ;;  %v4541_v9 = vor.u32 1.1754944e-38, %v4540_v24  ;;  %v4556_v24 = vor.u32 1.1754944e-38, %v4555_v20 }
 0x3a1   : > { %4307 = vmatmul.bf16.gmra.mxu1 %v6137_v31  ;;  %v4553_v31 = vand.u32 2147483647, %v4498_v3  ;;  %v4085_v39 = vpop.f32.mrf.mxu3 }
 0x3a2   : > { %v4533_v35 = vadd.f32 %v6879_v53, %v4532_v12  ;;  %v6285_v44 = vmul.f32 -1.442695, %v9032_v28  ;;  %v6522_v12 = vld [vmem:[#allocation2 + $0x140] sm:$0xf0] }
 0x3a3   : > { %v6881_v55 = vpop.eup %6880  ;;  %vm4554_vm4 = vcmp.eq.f32.partialorder %v4553_v31, 8.507059e+37 }
 0x3a4   : > { %v4545_v52 = vmul.f32 %v6881_v55, %v4498_v3  ;;  %v6883_v59 = vpop.eup %6882  ;;  %v4537_v48 = vsel %vm9034_vm1, %v6879_v53, %v4533_v35  ;;  %vm4550_vm0 = vweird.f32 %v6881_v55  ;;  %6884 = vpow2.f32 %v6285_v44  ;;  %v6128_v35 = vld [vmem:[#allocation2 + $0x138] sm:$0xf] }
 0x3a5   : > { %v9041_v56 = vadd.f32 1.0, %v6883_v59  ;;  %v4542_v54 = vsel %vm4539_vm12, %v4541_v9, %v4537_v48  ;;  %v4175_v53 = vadd.f32 %v8954_v63, %v4085_v39  ;;  %vm4551_vm15 = vmor %vm4549_vm3, %vm4550_vm0  ;;  %v5042_v59 = vunpack.c.h.bf16 %v279_v27  ;;  %v6526_v48 = vld [vmem:[#allocation2 + $0x160] sm:$0xf0]  ;;  %v6148_v63 = vld [vmem:[#allocation2 + $0x158] sm:$0xf] }
 0x3a6   : > { %v4546_v11 = vsub.f32 1.0, %v4545_v52  ;;  %v4263_v52 = vpop.f32.mrf.mxu1  ;;  %v6129_v34 = vor.u32 %v6522_v12, %v6128_v35  ;;  %v6149_v20 = vor.u32 %v6526_v48, %v6148_v63  ;;  %v6140_v48 = vld [vmem:[#allocation2 + $0x150] sm:$0xf] }
 0x3a7   : > { %6886 = vrcp.f32 %v9041_v56  ;;  %v4264_v44 = vadd.f32 %v4263_v52, %v4175_v53  ;;  %v4570_v35 = vand.u32 2147483648, %v9041_v56  ;;  %vm4564_vm13 = vweird.f32 %v9041_v56 }
 0x3a8   : > { %v4547_v4 = vmul.f32 %v6881_v55, %v4546_v11  ;;  %v5009_v11 = vmul.f32 %v4542_v54, %v9014_v2 }
 0x3a9   : > { %v4337_v3 = vadd.f32 %v4264_v44, %v8898_v29  ;;  %v4571_v63 = vor.u32 1.1754944e-38, %v4570_v35 }
 0x3aa   : > { %v4548_v42 = vadd.f32 %v6881_v55, %v4547_v4  ;;  %v6885_v46 = vpop.eup %6884  ;;  %v5073_v27 = vadd.f32 %v5041_v10, %v5009_v11 }
 0x3ab   : > { %v9049_v26 = vadd.f32 1.0, %v6885_v46 }
 0x3ac   : > { %v4552_v40 = vsel %vm4551_vm15, %v6881_v55, %v4548_v42  ;;  %v9053_v55 = vadd.f32 %v9010_v49, %v4337_v3 }
 0x3ad   : > { %v4557_v9 = vsel %vm4554_vm4, %v4556_v24, %v4552_v40  ;;  %v6887_v39 = vpop.eup %6886  ;;  %6888 = vrcp.f32 %v9049_v26  ;;  %v4087_v40 = vpop.f32.mrf.mxu3  ;;  %v6525_v24 = vld [vmem:[#allocation2 + $0x158] sm:$0xf0]  ;;  %vm4579_vm11 = vweird.f32 %v9049_v26 }
 0x3ae   : > { %v5010_v4 = vmul.f32 %v4557_v9, %v9020_v5  ;;  %4129 = vmatmul.bf16.gmra.mxu3 %v6129_v34  ;;  %v4560_v2 = vmul.f32 %v6887_v39, %v9041_v56  ;;  %v6286_v34 = vmul.f32 -1.442695, %v9053_v55  ;;  %v4177_v31 = vadd.f32 %v8962_v16, %v4087_v40  ;;  %v4265_v54 = vpop.f32.mrf.mxu1 }
 0x3af   : > { %vm4565_vm9 = vweird.f32 %v6887_v39  ;;  %v4568_v16 = vand.u32 2147483647, %v9041_v56  ;;  %v6141_v3 = vor.u32 %v6525_v24, %v6140_v48  ;;  %v4583_v40 = vand.u32 2147483647, %v9049_v26 }
 0x3b0   : > { %v5074_v12 = vadd.f32 %v5042_v59, %v5010_v4  ;;  %v4561_v29 = vsub.f32 1.0, %v4560_v2  ;;  %6890 = vpow2.f32 %v6286_v34  ;;  %v4266_v42 = vadd.f32 %v4265_v54, %v4177_v31  ;;  %vm9068_vm8 = vmor %vm4564_vm13, %vm4565_vm9  ;;  %v6160_v31 = vld [vmem:[#allocation2 + $0x170] sm:$0xf] }
 0x3b1   : > { %4312 = vmatmul.bf16.gmra.mxu1 %v6149_v20  ;;  %v4585_v20 = vand.u32 2147483648, %v9049_v26  ;;  %vm4569_vm6 = vcmp.eq.f32.partialorder %v4568_v16, 8.507059e+37  ;;  %vm4584_vm10 = vcmp.eq.f32.partialorder %v4583_v40, 8.507059e+37 }
 0x3b2   : > { %v6564_v5 = vpack.c.bf16 %v5074_v12, %v5073_v27  ;;  %v4562_v46 = vmul.f32 %v6887_v39, %v4561_v29  ;;  %v4338_v10 = vadd.f32 %v4266_v42, %v8910_v23  ;;  %v281_v12 = vld [vmem:[%s7315_s28 + $0x8] sm:$0xff]   ;;  %v4179_v29 = vpop.f32.mrf.mxu0 }
 0x3b3   : > { %v6889_v53 = vpop.eup %6888  ;;  %v4586_v54 = vor.u32 1.1754944e-38, %v4585_v20  ;;  %v5044_v42 = vunpack.c.h.bf16 %v281_v12 }
 0x3b4   : > { %6565 = vst [vmem:[%s9060_s30] sm:$0xff] %v6564_v5   ;;  %v4563_v52 = vadd.f32 %v6887_v39, %v4562_v46  ;;  %v4575_v59 = vmul.f32 %v6889_v53, %v9049_v26  ;;  %v9073_v44 = vadd.f32 %v9010_v49, %v4338_v10  ;;  %vm4580_vm14 = vweird.f32 %v6889_v53  ;;  %v6529_v5 = vld [vmem:[#allocation2 + $0x178] sm:$0xf0] }
 0x3b5   : > { %v5043_v46 = vunpack.c.l.bf16 %v281_v12  ;;  %vm4581_vm7 = vmor %vm4579_vm11, %vm4580_vm14  ;;  %v4090_v35 = vpop.f32.mrf.mxu3  ;;  %v6161_v10 = vor.u32 %v6529_v5, %v6160_v31  ;;  %v6152_v31 = vld [vmem:[#allocation2 + $0x168] sm:$0xf] }
 0x3b6   : > { %v6891_v9 = vpop.eup %6890  ;;  %v4567_v23 = vsel %vm9068_vm8, %v6887_v39, %v4563_v52  ;;  %v4576_v4 = vsub.f32 1.0, %v4575_v59  ;;  %v6287_v27 = vmul.f32 -1.442695, %v9073_v44  ;;  %v4268_v52 = vpop.f32.mrf.mxu1  ;;  %v4180_v59 = vadd.f32 %v4179_v29, %v4090_v35 }
 0x3b7   : > { %v9078_v56 = vadd.f32 1.0, %v6891_v9  ;;  %v4572_v34 = vsel %vm4569_vm6, %v4571_v63, %v4567_v23 }
 0x3b8   : > { %v4577_v2 = vmul.f32 %v6889_v53, %v4576_v4  ;;  %v5011_v24 = vmul.f32 %v4572_v34, %v9026_v13  ;;  %v4269_v48 = vadd.f32 %v4268_v52, %v4180_v59  ;;  %v6532_v52 = vld [vmem:[#allocation2 + $0x190] sm:$0xf0] }
 0x3b9   : > { %6892 = vrcp.f32 %v9078_v56  ;;  %vm4594_vm12 = vweird.f32 %v9078_v56 }
 0x3ba   : > { %v4578_v39 = vadd.f32 %v6889_v53, %v4577_v2  ;;  %6894 = vpow2.f32 %v6287_v27  ;;  %v5075_v4 = vadd.f32 %v5043_v46, %v5011_v24  ;;  %v4339_v20 = vadd.f32 %v4269_v48, %v8926_v15  ;;  %v4181_v2 = vpop.f32.mrf.mxu0  ;;  %v9751_v48 = vld [vmem:[#allocation17_spill] sm:$0xff] }
 0x3bb   : > { %v4600_v24 = vand.u32 2147483648, %v9078_v56 }
 0x3bc   : > { %v4582_v16 = vsel %vm4581_vm7, %v6889_v53, %v4578_v39  ;;  %v9092_v12 = vadd.f32 %v9010_v49, %v4339_v20  ;;  %v6528_v39 = vld [vmem:[#allocation2 + $0x170] sm:$0xf0] }
 0x3bd   : > { %v4587_v11 = vsel %vm4584_vm10, %v4586_v54, %v4582_v16 }
 0x3be   : > { %4134 = vmatmul.bf16.gmra.mxu3 %v6141_v3  ;;  %v5012_v26 = vmul.f32 %v4587_v11, %v9032_v28  ;;  %v4092_v28 = vpop.f32.mrf.mxu3  ;;  %v6288_v5 = vmul.f32 -1.442695, %v9092_v12  ;;  %v4270_v34 = vpop.f32.mrf.mxu1  ;;  %v6172_v11 = vld [vmem:[#allocation2 + $0x188] sm:$0xf] }
 0x3bf   : > { %v6893_v9 = vpop.eup %6892  ;;  %v4182_v29 = vadd.f32 %v4181_v2, %v4092_v28 }
 0x3c0   : > { %v6895_v23 = vpop.eup %6894  ;;  %v5076_v3 = vadd.f32 %v5044_v42, %v5012_v26  ;;  %v4590_v63 = vmul.f32 %v6893_v9, %v9078_v56  ;;  %vm4595_vm1 = vweird.f32 %v6893_v9  ;;  %v6153_v42 = vor.u32 %v6528_v39, %v6152_v31  ;;  %v9750_v26 = vld [vmem:[#allocation54_spill] sm:$0xff]  ;;  %v9754_v39 = vld [vmem:[#allocation48_spill] sm:$0xff] }
 0x3c1   : > { %4317 = vmatmul.bf16.gmra.mxu1 %v6161_v10  ;;  %v9089_v27 = vadd.f32 1.0, %v6895_v23  ;;  %v4271_v15 = vadd.f32 %v4270_v34, %v4182_v29  ;;  %v4598_v10 = vand.u32 2147483647, %v9078_v56  ;;  %vm9107_vm0 = vmor %vm4594_vm12, %vm4595_vm1 }
 0x3c2   : > { %v6569_v13 = vpack.c.bf16 %v5076_v3, %v5075_v4  ;;  %v4591_v53 = vsub.f32 1.0, %v4590_v63  ;;  %v6173_v4 = vor.u32 %v6532_v52, %v6172_v11  ;;  %v4184_v28 = vpop.f32.mrf.mxu0 }
 0x3c3   : > { %6896 = vrcp.f32 %v9089_v27  ;;  %v4340_v54 = vadd.f32 %v4271_v15, %v8936_v43  ;;  %v3315_v43 = vadd.f32 %v9751_v48, %v9750_v26  ;;  %vm4599_vm3 = vcmp.eq.f32.partialorder %v4598_v10, 8.507059e+37 }
 0x3c4   : > { %6641 = vst [vmem:[%s9060_s30 + $0x8] sm:$0xff] %v6569_v13   ;;  %v4592_v40 = vmul.f32 %v6893_v9, %v4591_v53  ;;  %6898 = vpow2.f32 %v6288_v5  ;;  %v4601_v13 = vor.u32 1.1754944e-38, %v4600_v24  ;;  %v4615_v53 = vand.u32 2147483648, %v9089_v27  ;;  %v283_v5 = vld [vmem:[%s7315_s28 + $0x10] sm:$0xff]  }
 0x3c5   : > { %v9103_v59 = vadd.f32 %v9010_v49, %v4340_v54  ;;  %v4613_v34 = vand.u32 2147483647, %v9089_v27  ;;  %vm4609_vm4 = vweird.f32 %v9089_v27  ;;  %v5045_v10 = vunpack.c.l.bf16 %v283_v5 }
 0x3c6   : > { %v4593_v46 = vadd.f32 %v6893_v9, %v4592_v40  ;;  %v3492_v40 = vpop.f32.mrf.mxu2  ;;  %v4095_v31 = vpop.f32.mrf.mxu3  ;;  %v4616_v24 = vor.u32 1.1754944e-38, %v4615_v53 }
 0x3c7   : > { %v6289_v20 = vmul.f32 -1.442695, %v9103_v59  ;;  %v4273_v54 = vpop.f32.mrf.mxu1  ;;  %vm4614_vm13 = vcmp.eq.f32.partialorder %v4613_v34, 8.507059e+37 }
 0x3c8   : > { %v4597_v56 = vsel %vm9107_vm0, %v6893_v9, %v4593_v46  ;;  %v3404_v9 = vadd.f32 %v9754_v39, %v3315_v43 }
 0x3c9   : > { %v6897_v35 = vpop.eup %6896  ;;  %6900 = vpow2.f32 %v6289_v20  ;;  %v4602_v15 = vsel %vm4599_vm3, %v4601_v13, %v4597_v56 }
 0x3ca   : > { %v4605_v16 = vmul.f32 %v6897_v35, %v9089_v27  ;;  %v6899_v3 = vpop.eup %6898  ;;  %vm4610_vm15 = vweird.f32 %v6897_v35  ;;  %v3493_v52 = vadd.f32 %v3492_v40, %v3404_v9  ;;  %v5013_v11 = vmul.f32 %v4602_v15, %v9053_v55  ;;  %v9756_v27 = vld [vmem:[#allocation19_spill] sm:$0xff] }
 0x3cb   : > { %v9115_v2 = vadd.f32 1.0, %v6899_v3  ;;  %vm4611_vm9 = vmor %vm4609_vm4, %vm4610_vm15 }
 0x3cc   : > { %v4606_v63 = vsub.f32 1.0, %v4605_v16  ;;  %v5046_v16 = vunpack.c.h.bf16 %v283_v5  ;;  %v5077_v53 = vadd.f32 %v5045_v10, %v5013_v11 }
 0x3cd   : > { %6902 = vrcp.f32 %v9115_v2  ;;  %vm4624_vm6 = vweird.f32 %v9115_v2 }
 0x3ce   : > { %4139 = vmatmul.bf16.gmra.mxu3 %v6153_v42  ;;  %v4607_v29 = vmul.f32 %v6897_v35, %v4606_v63  ;;  %v4185_v42 = vadd.f32 %v4184_v28, %v4095_v31  ;;  %v9755_v63 = vld [vmem:[#allocation58_spill] sm:$0xff]  ;;  %v6531_v28 = vld [vmem:[#allocation2 + $0x188] sm:$0xf0]  ;;  %v4097_v5 = vpop.f32.mrf.mxu3  ;;  %v3494_v34 = vpop.f32.mrf.mxu2 }
 0x3cf   : > { %v6901_v23 = vpop.eup %6900  ;;  %v3317_v20 = vadd.f32 %v9756_v27, %v9755_v63  ;;  %v4275_v10 = vpop.f32.mrf.mxu1 }
 0x3d0   : > { %v4608_v46 = vadd.f32 %v6897_v35, %v4607_v29  ;;  %v4274_v48 = vadd.f32 %v4273_v54, %v4185_v42  ;;  %v9126_v13 = vadd.f32 1.0, %v6901_v23  ;;  %v4186_v29 = vpop.f32.mrf.mxu0  ;;  %v4628_v23 = vand.u32 2147483647, %v9115_v2 }
 0x3d1   : > { %4322 = vmatmul.bf16.gmra.mxu1 %v6173_v4  ;;  %v4187_v42 = vadd.f32 %v4186_v29, %v4097_v5 }
 0x3d2   : > { %v4612_v26 = vsel %vm4611_vm9, %v6897_v35, %v4608_v46  ;;  %v4341_v3 = vadd.f32 %v4274_v48, %v3493_v52  ;;  %6904 = vrcp.f32 %v9126_v13  ;;  %v9757_v46 = vld [vmem:[#allocation51_spill] sm:$0xff]  ;;  %v4630_v48 = vand.u32 2147483648, %v9115_v2 }
 0x3d3   : > { %v4617_v43 = vsel %vm4614_vm13, %v4616_v24, %v4612_v26  ;;  %v6903_v56 = vpop.eup %6902  ;;  %v3406_v54 = vadd.f32 %v9757_v46, %v3317_v20  ;;  %v9760_v20 = vld [vmem:[#allocation60_spill] sm:$0xff]  ;;  %vm4629_vm11 = vcmp.eq.f32.partialorder %v4628_v23, 8.507059e+37  ;;  %vm4639_vm10 = vweird.f32 %v9126_v13 }
 0x3d4   : > { %v5014_v4 = vmul.f32 %v4617_v43, %v9073_v44  ;;  %v4620_v55 = vmul.f32 %v6903_v56, %v9115_v2  ;;  %v9130_v35 = vadd.f32 %v9010_v49, %v4341_v3  ;;  %v6164_v44 = vld [vmem:[#allocation2 + $0x180] sm:$0xf]  ;;  %vm4625_vm8 = vweird.f32 %v6903_v56 }
 0x3d5   : > { %v6165_v31 = vor.u32 %v6531_v28, %v6164_v44  ;;  %v3495_v24 = vadd.f32 %v3494_v34, %v3406_v54  ;;  %vm9140_vm14 = vmor %vm4624_vm6, %vm4625_vm8  ;;  %v9761_v28 = vld [vmem:[#allocation21_spill] sm:$0xff]  ;;  %v4631_v5 = vor.u32 1.1754944e-38, %v4630_v48  ;;  %v4645_v2 = vand.u32 2147483648, %v9126_v13  ;;  %v9762_v54 = vld [vmem:[#allocation52_spill] sm:$0xff] }
 0x3d6   : > { %v5078_v40 = vadd.f32 %v5046_v16, %v5014_v4  ;;  %v4621_v9 = vsub.f32 1.0, %v4620_v55  ;;  %v6290_v15 = vmul.f32 -1.442695, %v9130_v35  ;;  %v4276_v16 = vadd.f32 %v4275_v10, %v4187_v42 }
 0x3d7   : > { %v4646_v10 = vor.u32 1.1754944e-38, %v4645_v2 }
 0x3d8   : > { %v6574_v39 = vpack.c.bf16 %v5078_v40, %v5077_v53  ;;  %v4622_v52 = vmul.f32 %v6903_v56, %v4621_v9  ;;  %6906 = vpow2.f32 %v6290_v15  ;;  %v6905_v26 = vpop.eup %6904  ;;  %v4342_v43 = vadd.f32 %v4276_v16, %v3495_v24  ;;  %v4189_v34 = vpop.f32.mrf.mxu0 }
 0x3d9   : > { %v4635_v4 = vmul.f32 %v6905_v26, %v9126_v13  ;;  %v3320_v53 = vadd.f32 %v9761_v28, %v9760_v20  ;;  %vm4640_vm7 = vweird.f32 %v6905_v26  ;;  %v4643_v15 = vand.u32 2147483647, %v9126_v13  ;;  %v4278_v16 = vpop.f32.mrf.mxu1  ;;  %v9763_v28 = vld [vmem:[#allocation23_spill] sm:$0xff] }
 0x3da   : > { %6642 = vst [vmem:[%s9060_s30 + $0x10] sm:$0xff] %v6574_v39   ;;  %v4623_v11 = vadd.f32 %v6903_v56, %v4622_v52  ;;  %v9145_v63 = vadd.f32 %v9010_v49, %v4342_v43  ;;  %v285_v39 = vld [vmem:[%s7315_s28 + $0x18] sm:$0xff]   ;;  %vm4641_vm1 = vmor %vm4639_vm10, %vm4640_vm7 }
 0x3db   : > { %v4636_v55 = vsub.f32 1.0, %v4635_v4  ;;  %v3409_v42 = vadd.f32 %v9762_v54, %v3320_v53  ;;  %v5047_v52 = vunpack.c.l.bf16 %v285_v39  ;;  %v5048_v24 = vunpack.c.h.bf16 %v285_v39 }
 0x3dc   : > { %v4627_v40 = vsel %vm9140_vm14, %v6903_v56, %v4623_v11  ;;  %v6291_v29 = vmul.f32 -1.442695, %v9145_v63  ;;  %v4100_v11 = vpop.f32.mrf.mxu3  ;;  %vm4644_vm12 = vcmp.eq.f32.partialorder %v4643_v15, 8.507059e+37  ;;  %v3322_v53 = vadd.f32 %v9763_v28, %v8818_v22 }
 0x3dd   : > { %v4637_v9 = vmul.f32 %v6905_v26, %v4636_v55  ;;  %v4632_v46 = vsel %vm4629_vm11, %v4631_v5, %v4627_v40  ;;  %v4190_v23 = vadd.f32 %v4189_v34, %v4100_v11 }
 0x3de   : > { %4144 = vmatmul.bf16.gmra.mxu3 %v6165_v31  ;;  %v6907_v27 = vpop.eup %6906  ;;  %v3497_v31 = vpop.f32.mrf.mxu2  ;;  %v5015_v48 = vmul.f32 %v4632_v46, %v9092_v12 }
 0x3df   : > { %v9152_v44 = vadd.f32 1.0, %v6907_v27  ;;  %v4638_v56 = vadd.f32 %v6905_v26, %v4637_v9  ;;  %v3498_v3 = vadd.f32 %v3497_v31, %v3409_v42  ;;  %v4279_v20 = vadd.f32 %v4278_v16, %v4190_v23  ;;  %v9764_v31 = vld [vmem:[#allocation56_spill] sm:$0xff] }
 0x3e0   : > { %v5079_v55 = vadd.f32 %v5047_v52, %v5015_v48  ;;  %v3411_v46 = vadd.f32 %v9764_v31, %v3322_v53 }
 0x3e1   : > { %6908 = vrcp.f32 %v9152_v44  ;;  %v4642_v43 = vsel %vm4641_vm1, %v6905_v26, %v4638_v56  ;;  %v4191_v26 = vpop.f32.mrf.mxu0  ;;  %v4280_v42 = vpop.f32.mrf.mxu1  ;;  %v4658_v48 = vand.u32 2147483647, %v9152_v44  ;;  %vm4654_vm3 = vweird.f32 %v9152_v44 }
 0x3e2   : > { %6910 = vpow2.f32 %v6291_v29  ;;  %v4647_v4 = vsel %vm4644_vm12, %v4646_v10, %v4642_v43  ;;  %v4343_v29 = vadd.f32 %v4279_v20, %v3498_v3  ;;  %v4660_v43 = vand.u32 2147483648, %v9152_v44  ;;  %v9765_v3 = vld [vmem:[#allocation25_spill] sm:$0xff] }
 0x3e3   : > { %v5016_v27 = vmul.f32 %v4647_v4, %v9103_v59  ;;  %vm4659_vm4 = vcmp.eq.f32.partialorder %v4658_v48, 8.507059e+37 }
 0x3e4   : > { %v9166_v9 = vadd.f32 %v9010_v49, %v4343_v29  ;;  %v4102_v15 = vpop.f32.mrf.mxu3 }
 0x3e5   : > { %v5080_v5 = vadd.f32 %v5048_v24, %v5016_v27  ;;  %v4192_v54 = vadd.f32 %v4191_v26, %v4102_v15  ;;  %v3325_v27 = vadd.f32 %v9765_v3, %v8827_v14 }
 0x3e6   : > { %v3499_v59 = vpop.f32.mrf.mxu2  ;;  %v6292_v56 = vmul.f32 -1.442695, %v9166_v9 }
 0x3e7   : > { %v6909_v13 = vpop.eup %6908  ;;  %v6579_v39 = vpack.c.bf16 %v5080_v5, %v5079_v55  ;;  %v3500_v52 = vadd.f32 %v3499_v59, %v3411_v46  ;;  %v4281_v10 = vadd.f32 %v4280_v42, %v4192_v54  ;;  %v9768_v59 = vld [vmem:[#allocation59_spill] sm:$0xff] }
 0x3e8   : > { %v6911_v40 = vpop.eup %6910  ;;  %v4650_v2 = vmul.f32 %v6909_v13, %v9152_v44  ;;  %vm4655_vm0 = vweird.f32 %v6909_v13  ;;  %v4661_v44 = vor.u32 1.1754944e-38, %v4660_v43  ;;  %v3414_v15 = vadd.f32 %v9768_v59, %v3325_v27 }
 0x3e9   : > { %v4506_v12 = vadd.f32 1.0, %v6911_v40  ;;  %6643 = vst [vmem:[%s9060_s30 + $0x18] sm:$0xff] %v6579_v39   ;;  %v4344_v16 = vadd.f32 %v4281_v10, %v3500_v52  ;;  %vm9179_vm15 = vmor %vm4654_vm3, %vm4655_vm0  ;;  %v4194_v29 = vpop.f32.mrf.mxu0  ;;  %v287_v39 = vld [vmem:[%s7315_s28 + $0x20] sm:$0xff]  }
 0x3ea   : > { %v4651_v34 = vsub.f32 1.0, %v4650_v2  ;;  %v5049_v42 = vunpack.c.l.bf16 %v287_v39  ;;  %v5050_v10 = vunpack.c.h.bf16 %v287_v39 }
 0x3eb   : > { %6912 = vrcp.f32 %v4506_v12  ;;  %v9175_v4 = vadd.f32 %v9010_v49, %v4344_v16  ;;  %v4675_v5 = vand.u32 2147483648, %v4506_v12  ;;  %vm4669_vm13 = vweird.f32 %v4506_v12 }
 0x3ec   : > { %v4652_v22 = vmul.f32 %v6909_v13, %v4651_v34  ;;  %6914 = vpow2.f32 %v6292_v56  ;;  %v4673_v34 = vand.u32 2147483647, %v4506_v12 }
 0x3ed   : > { %v6293_v55 = vmul.f32 -1.442695, %v9175_v4  ;;  %v4676_v52 = vor.u32 1.1754944e-38, %v4675_v5 }
 0x3ee   : > { %v4653_v24 = vadd.f32 %v6909_v13, %v4652_v22  ;;  %v3502_v26 = vpop.f32.mrf.mxu2  ;;  %v4283_v22 = vpop.f32.mrf.mxu1  ;;  %vm4674_vm6 = vcmp.eq.f32.partialorder %v4673_v34, 8.507059e+37 }
 0x3ef   : > { %6916 = vpow2.f32 %v6293_v55  ;;  %v3503_v54 = vadd.f32 %v3502_v26, %v3414_v15 }
 0x3f0   : > { %v4657_v53 = vsel %vm9179_vm15, %v6909_v13, %v4653_v24  ;;  %v4105_v13 = vpop.f32.mrf.mxu3 }
 0x3f1   : > { %v6913_v11 = vpop.eup %6912  ;;  %v4662_v31 = vsel %vm4659_vm4, %v4661_v44, %v4657_v53  ;;  %v4195_v56 = vadd.f32 %v4194_v29, %v4105_v13  ;;  %v4196_v5 = vpop.f32.mrf.mxu0 }
 0x3f2   : > { %v4665_v23 = vmul.f32 %v6913_v11, %v4506_v12  ;;  %v6915_v28 = vpop.eup %6914  ;;  %vm4670_vm9 = vweird.f32 %v6913_v11  ;;  %v5017_v24 = vmul.f32 %v4662_v31, %v9130_v35  ;;  %v9769_v12 = vld [vmem:[#allocation27_spill] sm:$0xff] }
 0x3f3   : > { %v9186_v2 = vadd.f32 1.0, %v6915_v28  ;;  %vm4671_vm8 = vmor %vm4669_vm13, %vm4670_vm9  ;;  %v4284_v48 = vadd.f32 %v4283_v22, %v4195_v56  ;;  %v3327_v28 = vadd.f32 %v9769_v12, %v8838_v0 }
 0x3f4   : > { %v4666_v40 = vsub.f32 1.0, %v4665_v23 }
 0x3f5   : > { %6918 = vrcp.f32 %v9186_v2  ;;  %v6917_v23 = vpop.eup %6916  ;;  %v4345_v27 = vadd.f32 %v4284_v48, %v3503_v54  ;;  %v4688_v22 = vand.u32 2147483647, %v9186_v2  ;;  %v4690_v56 = vand.u32 2147483648, %v9186_v2 }
 0x3f6   : > { %v4667_v14 = vmul.f32 %v6913_v11, %v4666_v40  ;;  %v4508_v53 = vadd.f32 1.0, %v6917_v23  ;;  %v5081_v40 = vadd.f32 %v5049_v42, %v5017_v24  ;;  %v3504_v29 = vpop.f32.mrf.mxu2  ;;  %v4285_v15 = vpop.f32.mrf.mxu1  ;;  %vm4684_vm11 = vweird.f32 %v9186_v2  ;;  %v9773_v24 = vld [vmem:[#allocation29_spill] sm:$0xff] }
 0x3f7   : > { %v9197_v35 = vadd.f32 %v9010_v49, %v4345_v27  ;;  %vm4689_vm10 = vcmp.eq.f32.partialorder %v4688_v22, 8.507059e+37  ;;  %v4691_v27 = vor.u32 1.1754944e-38, %v4690_v56 }
 0x3f8   : > { %v4668_v46 = vadd.f32 %v6913_v11, %v4667_v14  ;;  %6920 = vrcp.f32 %v4508_v53  ;;  %v9770_v14 = vld [vmem:[#allocation62_spill] sm:$0xff]  ;;  %v4703_v12 = vand.u32 2147483647, %v4508_v53  ;;  %vm4699_vm12 = vweird.f32 %v4508_v53 }
 0x3f9   : > { %v6294_v39 = vmul.f32 -1.442695, %v9197_v35  ;;  %v3416_v34 = vadd.f32 %v9770_v14, %v3327_v28  ;;  %v4705_v28 = vand.u32 2147483648, %v4508_v53  ;;  %v6533_v14 = vld [vmem:[#allocation2 + $0x19c] sm:$0xf] }
 0x3fa   : > { %v4672_v16 = vsel %vm4671_vm8, %v6913_v11, %v4668_v46  ;;  %v4107_v11 = vpop.f32.mrf.mxu3  ;;  %vm4704_vm3 = vcmp.eq.f32.partialorder %v4703_v12, 8.507059e+37 }
 0x3fb   : > { %v4677_v43 = vsel %vm4674_vm6, %v4676_v52, %v4672_v16  ;;  %v6919_v20 = vpop.eup %6918  ;;  %v4197_v59 = vadd.f32 %v4196_v5, %v4107_v11  ;;  %6922 = vpow2.f32 %v6294_v39  ;;  %v3505_v31 = vadd.f32 %v3504_v29, %v3416_v34  ;;  %v4199_v5 = vpop.f32.mrf.mxu0  ;;  %v6178_v34 = vld [vmem:[#allocation2 + $0x1a4] sm:$0xf0] }
 0x3fc   : > { %v5018_v3 = vmul.f32 %v4677_v43, %v9145_v63  ;;  %v4680_v44 = vmul.f32 %v6919_v20, %v9186_v2  ;;  %vm4685_vm14 = vweird.f32 %v6919_v20  ;;  %v3330_v16 = vadd.f32 %v9773_v24, %v8852_v58 }
 0x3fd   : > { %v4286_v13 = vadd.f32 %v4285_v15, %v4197_v59  ;;  %vm9205_vm7 = vmor %vm4684_vm11, %vm4685_vm14  ;;  %v1299_v59 = vld [vmem:[#allocation2 + $0x198] sm:$0x1]  ;;  %v4706_v15 = vor.u32 1.1754944e-38, %v4705_v28 }
 0x3fe   : > { %v5082_v55 = vadd.f32 %v5050_v10, %v5018_v3  ;;  %v4681_v63 = vsub.f32 1.0, %v4680_v44  ;;  %v6921_v54 = vpop.eup %6920  ;;  %v289_v3 = vld [vmem:[%s7315_s28 + $0x28] sm:$0xff]   ;;  %v3507_v44 = vpop.f32.mrf.mxu2  ;;  %v1300_v52 = vsel %vm7347_vm2, 0, %v1299_v59 }
 0x3ff   : > { %v4346_v42 = vadd.f32 %v4286_v13, %v3505_v31  ;;  %v4695_v10 = vmul.f32 %v6921_v54, %v4508_v53  ;;  %vm4700_vm1 = vweird.f32 %v6921_v54  ;;  %v5052_v39 = vunpack.c.h.bf16 %v289_v3  ;;  %v4288_v31 = vpop.f32.mrf.mxu1  ;;  %1301 = vst [vmem:[#allocation2 + $0x198] sm:$0x1] %v1300_v52 }
 0x400   : > { %v6584_v26 = vpack.c.bf16 %v5082_v55, %v5081_v40  ;;  %v4682_v0 = vmul.f32 %v6919_v20, %v4681_v63  ;;  %vm4701_vm0 = vmor %vm4699_vm12, %vm4700_vm1  ;;  %v6181_v13 = vor.u32 %v6533_v14, %v6178_v34  ;;  %v9778_v34 = vld [vmem:[#allocation65_spill] sm:$0xff] }
 0x401   : > { %v9214_v43 = vadd.f32 %v9010_v49, %v4346_v42  ;;  %v6923_v23 = vpop.eup %6922  ;;  %v4696_v2 = vsub.f32 1.0, %v4695_v10 }
 0x402   : > { %6644 = vst [vmem:[%s9060_s30 + $0x20] sm:$0xff] %v6584_v26   ;;  %v4683_v46 = vadd.f32 %v6919_v20, %v4682_v0  ;;  %v9217_v40 = vadd.f32 1.0, %v6923_v23  ;;  %v5051_v26 = vunpack.c.l.bf16 %v289_v3  ;;  %v4110_v22 = vpop.f32.mrf.mxu3  ;;  %4238 = vmatmul.bf16.gmra.mxu0 %v6181_v13 }
 0x403   : > { %v6295_v55 = vmul.f32 -1.442695, %v9214_v43  ;;  %v4697_v58 = vmul.f32 %v6921_v54, %v4696_v2  ;;  %v4200_v24 = vadd.f32 %v4199_v5, %v4110_v22 }
 0x404   : > { %v4687_v48 = vsel %vm9205_vm7, %v6919_v20, %v4683_v46  ;;  %v9774_v20 = vld [vmem:[#allocation64_spill] sm:$0xff]  ;;  %6924 = vrcp.f32 %v9217_v40 }
 0x405   : > { %v4692_v11 = vsel %vm4689_vm10, %v4691_v27, %v4687_v48  ;;  %v3419_v29 = vadd.f32 %v9774_v20, %v3330_v16  ;;  %v4698_v63 = vadd.f32 %v6921_v54, %v4697_v58  ;;  %6926 = vpow2.f32 %v6295_v55  ;;  %v1356_v46 = vld [vmem:[#allocation2 + $0x1ac] sm:$0x8]  ;;  %v9777_v27 = vld [vmem:[#allocation31_spill] sm:$0xff] }
 0x406   : > { %v5019_v0 = vmul.f32 %v4692_v11, %v9166_v9  ;;  %v1357_v53 = vsel %vm7367_vm5, 0, %v1356_v46  ;;  %v4289_v23 = vadd.f32 %v4288_v31, %v4200_v24  ;;  %v3332_v2 = vadd.f32 %v9777_v27, %v8862_v47  ;;  %v3509_v5 = vpop.f32.mrf.mxu2  ;;  %v6184_v47 = vld [vmem:[#allocation2 + $0x1a0] sm:$0xf]  ;;  %v6176_v59 = vld [vmem:[#allocation2 + $0x198] sm:$0xf] }
 0x407   : > { %v4702_v56 = vsel %vm4701_vm0, %v6921_v54, %v4698_v63  ;;  %v3508_v48 = vadd.f32 %v3507_v44, %v3419_v29  ;;  %1358 = vst [vmem:[#allocation2 + $0x1ac] sm:$0x8] %v1357_v53  ;;  %v6534_v29 = vld [vmem:[#allocation2 + $0x1a0] sm:$0xf0]  ;;  %v4201_v63 = vpop.f32.mrf.mxu0  ;;  %v4290_v31 = vpop.f32.mrf.mxu1  ;;  %v4718_v24 = vand.u32 2147483647, %v9217_v40  ;;  %vm4714_vm5 = vweird.f32 %v9217_v40 }
 0x408   : > { %v4707_v16 = vsel %vm4704_vm3, %v4706_v15, %v4702_v56  ;;  %v5083_v12 = vadd.f32 %v5051_v26, %v5019_v0  ;;  %v3421_v26 = vadd.f32 %v9778_v34, %v3332_v2  ;;  %v6177_v13 = vor.u32 %v6534_v29, %v6176_v59 }
 0x409   : > { %v5020_v9 = vmul.f32 %v4707_v16, %v9175_v4  ;;  %v4347_v11 = vadd.f32 %v4289_v23, %v3508_v48  ;;  %v4720_v16 = vand.u32 2147483648, %v9217_v40  ;;  %v9779_v23 = vld [vmem:[#allocation33_spill] sm:$0xff]  ;;  %vm4719_vm4 = vcmp.eq.f32.partialorder %v4718_v24, 8.507059e+37 }
 0x40a   : > { %v6925_v3 = vpop.eup %6924  ;;  %v4112_v14 = vpop.f32.mrf.mxu3  ;;  %v3510_v22 = vadd.f32 %v3509_v5, %v3421_v26  ;;  %4149 = vmatmul.bf16.gmra.mxu3 %v6177_v13  ;;  %v3335_v27 = vadd.f32 %v9779_v23, %v8877_v19  ;;  %v291_v19 = vld [vmem:[%s7315_s28 + $0x30] sm:$0xff]  }
 0x40b   : > { %v6927_v54 = vpop.eup %6926  ;;  %v5084_v28 = vadd.f32 %v5052_v39, %v5020_v9  ;;  %v4710_v55 = vmul.f32 %v6925_v3, %v9217_v40  ;;  %v9234_v4 = vadd.f32 %v9010_v49, %v4347_v11  ;;  %v4202_v15 = vadd.f32 %v4201_v63, %v4112_v14 }
 0x40c   : > { %v9231_v58 = vadd.f32 1.0, %v6927_v54  ;;  %vm4715_vm2 = vweird.f32 %v6925_v3  ;;  %v4721_v5 = vor.u32 1.1754944e-38, %v4720_v16  ;;  %v5053_v59 = vunpack.c.l.bf16 %v291_v19 }
 0x40d   : > { %v6589_v20 = vpack.c.bf16 %v5084_v28, %v5083_v12  ;;  %v4711_v44 = vsub.f32 1.0, %v4710_v55  ;;  %v6296_v0 = vmul.f32 -1.442695, %v9234_v4  ;;  %v4291_v42 = vadd.f32 %v4290_v31, %v4202_v15  ;;  %vm9249_vm15 = vmor %vm4714_vm5, %vm4715_vm2 }
 0x40e   : > { %6928 = vrcp.f32 %v9231_v58  ;;  %v6535_v46 = vld [vmem:[#allocation2 + $0x1a8] sm:$0xf0]  ;;  %v3512_v12 = vpop.f32.mrf.mxu2  ;;  %v4733_v29 = vand.u32 2147483647, %v9231_v58  ;;  %vm4729_vm13 = vweird.f32 %v9231_v58  ;;  %v5054_v15 = vunpack.c.h.bf16 %v291_v19 }
 0x40f   : > { %6645 = vst [vmem:[%s9060_s30 + $0x28] sm:$0xff] %v6589_v20   ;;  %v4712_v39 = vmul.f32 %v6925_v3, %v4711_v44  ;;  %v6185_v56 = vor.u32 %v6535_v46, %v6184_v47  ;;  %6930 = vpow2.f32 %v6296_v0  ;;  %v4348_v10 = vadd.f32 %v4291_v42, %v3510_v22  ;;  %v4204_v11 = vpop.f32.mrf.mxu0  ;;  %v4293_v14 = vpop.f32.mrf.mxu1 }
 0x410   : > { %v3424_v47 = vadd.f32 %v8844_v17, %v3335_v27  ;;  %vm4734_vm6 = vcmp.eq.f32.partialorder %v4733_v29, 8.507059e+37  ;;  %v9782_v17 = vld [vmem:[#allocation35_spill] sm:$0xff] }
 0x411   : > { %v4713_v52 = vadd.f32 %v6925_v3, %v4712_v39  ;;  %4327 = vmatmul.bf16.gmra.mxu1 %v6185_v56  ;;  %v9245_v9 = vadd.f32 %v9010_v49, %v4348_v10  ;;  %v4735_v49 = vand.u32 2147483648, %v9231_v58  ;;  %v3337_v22 = vadd.f32 %v9782_v17, %v8890_v18 }
 0x412   : > { %v4115_v63 = vpop.f32.mrf.mxu3  ;;  %v3513_v39 = vadd.f32 %v3512_v12, %v3424_v47 }
 0x413   : > { %v4717_v28 = vsel %vm9249_vm15, %v6925_v3, %v4713_v52  ;;  %v6297_v40 = vmul.f32 -1.442695, %v9245_v9  ;;  %v4205_v26 = vadd.f32 %v4204_v11, %v4115_v63  ;;  %v4736_v0 = vor.u32 1.1754944e-38, %v4735_v49 }
 0x414   : > { %v6929_v53 = vpop.eup %6928  ;;  %v4722_v3 = vsel %vm4719_vm4, %v4721_v5, %v4717_v28  ;;  %v3426_v2 = vadd.f32 %v8855_v8, %v3337_v22 }
 0x415   : > { %v4725_v48 = vmul.f32 %v6929_v53, %v9231_v58  ;;  %v6931_v54 = vpop.eup %6930  ;;  %vm4730_vm9 = vweird.f32 %v6929_v53  ;;  %6932 = vpow2.f32 %v6297_v40  ;;  %v5021_v31 = vmul.f32 %v4722_v3, %v9197_v35 }
 0x416   : > { %v9257_v20 = vadd.f32 1.0, %v6931_v54  ;;  %vm4731_vm8 = vmor %vm4729_vm13, %vm4730_vm9  ;;  %v4294_v46 = vadd.f32 %v4293_v14, %v4205_v26  ;;  %v3514_v16 = vpop.f32.mrf.mxu2  ;;  %v9783_v14 = vld [vmem:[#allocation37_spill] sm:$0xff] }
 0x417   : > { %v4726_v55 = vsub.f32 1.0, %v4725_v48  ;;  %v5085_v48 = vadd.f32 %v5053_v59, %v5021_v31  ;;  %v4295_v40 = vpop.f32.mrf.mxu1  ;;  %v3515_v11 = vadd.f32 %v3514_v16, %v3426_v2 }
 0x418   : > { %6934 = vrcp.f32 %v9257_v20  ;;  %v4349_v10 = vadd.f32 %v4294_v46, %v3513_v39  ;;  %v4748_v63 = vand.u32 2147483647, %v9257_v20  ;;  %v4750_v8 = vand.u32 2147483648, %v9257_v20 }
 0x419   : > { %v4727_v44 = vmul.f32 %v6929_v53, %v4726_v55  ;;  %vm4744_vm11 = vweird.f32 %v9257_v20 }
 0x41a   : > { %v4117_v27 = vpop.f32.mrf.mxu3  ;;  %vm4749_vm10 = vcmp.eq.f32.partialorder %v4748_v63, 8.507059e+37 }
 0x41b   : > { %v4728_v34 = vadd.f32 %v6929_v53, %v4727_v44  ;;  %v6933_v42 = vpop.eup %6932 }
 0x41c   : > { %v9268_v24 = vadd.f32 1.0, %v6933_v42 }
 0x41d   : > { %v4732_v13 = vsel %vm4731_vm8, %v6929_v53, %v4728_v34  ;;  %v9274_v53 = vld [vmem:[%s9557_s4] ss:$0 sm:$0xff]  ;;  %v3340_v34 = vadd.f32 %v9783_v14, %v8905_v25  ;;  %v293_v25 = vld [vmem:[%s7315_s28 + $0x38] sm:$0xff]  }
 0x41e   : > { %v4737_v56 = vsel %vm4734_vm6, %v4736_v0, %v4732_v13  ;;  %v6935_v58 = vpop.eup %6934  ;;  %v9277_v18 = vadd.f32 %v9274_v53, %v4349_v10  ;;  %6936 = vrcp.f32 %v9268_v24  ;;  %v3517_v59 = vpop.f32.mrf.mxu2  ;;  %v4751_v13 = vor.u32 1.1754944e-38, %v4750_v8 }
 0x41f   : > { %v5022_v52 = vmul.f32 %v4737_v56, %v9214_v43  ;;  %v4740_v35 = vmul.f32 %v6935_v58, %v9257_v20  ;;  %v4206_v43 = vpop.f32.mrf.mxu0  ;;  %vm4745_vm14 = vweird.f32 %v6935_v58  ;;  %v4765_v46 = vand.u32 2147483648, %v9268_v24 }
 0x420   : > { %v6298_v28 = vmul.f32 -1.442695, %v9277_v18  ;;  %v4207_v55 = vadd.f32 %v4206_v43, %v4117_v27  ;;  %vm9292_vm7 = vmor %vm4744_vm11, %vm4745_vm14  ;;  %v4763_v56 = vand.u32 2147483647, %v9268_v24  ;;  %vm4759_vm12 = vweird.f32 %v9268_v24 }
 0x421   : > { %v5086_v23 = vadd.f32 %v5054_v15, %v5022_v52  ;;  %v4741_v12 = vsub.f32 1.0, %v4740_v35  ;;  %v3429_v52 = vadd.f32 %v8870_v30, %v3340_v34  ;;  %v5055_v35 = vunpack.c.l.bf16 %v293_v25  ;;  %v9786_v30 = vld [vmem:[#allocation38_spill] sm:$0xff] }
 0x422   : > { %6938 = vpow2.f32 %v6298_v28  ;;  %v4296_v49 = vadd.f32 %v4295_v40, %v4207_v55  ;;  %v4120_v42 = vpop.f32.mrf.mxu3  ;;  %v4766_v27 = vor.u32 1.1754944e-38, %v4765_v46  ;;  %v5056_v43 = vunpack.c.h.bf16 %v293_v25 }
 0x423   : > { %v6594_v54 = vpack.c.bf16 %v5086_v23, %v5085_v48  ;;  %v4742_v5 = vmul.f32 %v6935_v58, %v4741_v12  ;;  %v3518_v23 = vadd.f32 %v3517_v59, %v3429_v52  ;;  %vm4764_vm3 = vcmp.eq.f32.partialorder %v4763_v56, 8.507059e+37  ;;  %v9787_v56 = vld [vmem:[#allocation41_spill] sm:$0xff] }
 0x424   : > { %v4350_v44 = vadd.f32 %v4296_v49, %v3515_v11  ;;  %v6937_v29 = vpop.eup %6936  ;;  %v3342_v28 = vadd.f32 %v9786_v30, %v8918_v45 }
 0x425   : > { %6646 = vst [vmem:[%s9060_s30 + $0x30] sm:$0xff] %v6594_v54   ;;  %v4743_v19 = vadd.f32 %v6935_v58, %v4742_v5  ;;  %v4755_v47 = vmul.f32 %v6937_v29, %v9268_v24  ;;  %vm4760_vm1 = vweird.f32 %v6937_v29 }
 0x426   : > { %v9288_v3 = vadd.f32 %v9274_v53, %v4350_v44  ;;  %vm4761_vm0 = vmor %vm4759_vm12, %vm4760_vm1  ;;  %v3431_v45 = vadd.f32 %v8882_v21, %v3342_v28 }
 0x427   : > { %v4747_v0 = vsel %vm9292_vm7, %v6935_v58, %v4743_v19  ;;  %v4756_v15 = vsub.f32 1.0, %v4755_v47  ;;  %v4209_v31 = vpop.f32.mrf.mxu0  ;;  %v4298_v58 = vpop.f32.mrf.mxu1 }
 0x428   : > { %v6939_v39 = vpop.eup %6938  ;;  %v6299_v20 = vmul.f32 -1.442695, %v9288_v3  ;;  %v4752_v10 = vsel %vm4749_vm10, %v4751_v13, %v4747_v0  ;;  %v4210_v48 = vadd.f32 %v4209_v31, %v4120_v42  ;;  %v3519_v19 = vpop.f32.mrf.mxu2  ;;  %v3345_v42 = vadd.f32 %v9787_v56, %v8931_v36 }
 0x429   : > { %v9300_v17 = vadd.f32 1.0, %v6939_v39  ;;  %v4757_v22 = vmul.f32 %v6937_v29, %v4756_v15  ;;  %v5023_v2 = vmul.f32 %v4752_v10, %v9234_v4  ;;  %v3520_v59 = vadd.f32 %v3519_v19, %v3431_v45 }
 0x42a   : > { %6940 = vpow2.f32 %v6299_v20  ;;  %v4299_v12 = vadd.f32 %v4298_v58, %v4210_v48  ;;  %v3434_v30 = vadd.f32 %v8896_v38, %v3345_v42 }
 0x42b   : > { %6942 = vrcp.f32 %v9300_v17  ;;  %v4758_v16 = vadd.f32 %v6937_v29, %v4757_v22  ;;  %v5087_v44 = vadd.f32 %v5055_v35, %v5023_v2  ;;  %v4778_v46 = vand.u32 2147483647, %v9300_v17  ;;  %v295_v2 = vld [vmem:[%s7315_s28 + $0x40] sm:$0xff]  }
 0x42c   : > { %v4351_v5 = vadd.f32 %v4299_v12, %v3518_v23  ;;  %v4780_v21 = vand.u32 2147483648, %v9300_v17  ;;  %vm4774_vm5 = vweird.f32 %v9300_v17 }
 0x42d   : > { %v4762_v54 = vsel %vm4761_vm0, %v6937_v29, %v4758_v16  ;;  %v4122_v29 = vpop.f32.mrf.mxu3  ;;  %vm4779_vm4 = vcmp.eq.f32.partialorder %v4778_v46, 8.507059e+37 }
 0x42e   : > { %v4767_v55 = vsel %vm4764_vm3, %v4766_v27, %v4762_v54  ;;  %v9313_v4 = vadd.f32 %v9274_v53, %v4351_v5  ;;  %v4781_v35 = vor.u32 1.1754944e-38, %v4780_v21 }
 0x42f   : > { %v5024_v11 = vmul.f32 %v4767_v55, %v9245_v9  ;;  %v4211_v47 = vpop.f32.mrf.mxu0  ;;  %v4300_v39 = vpop.f32.mrf.mxu1 }
 0x430   : > { %v6941_v40 = vpop.eup %6940  ;;  %v6300_v9 = vmul.f32 -1.442695, %v9313_v4  ;;  %v4212_v26 = vadd.f32 %v4211_v47, %v4122_v29  ;;  %v3522_v58 = vpop.f32.mrf.mxu2  ;;  %v9790_v47 = vld [vmem:[#allocation43_spill] sm:$0xff] }
 0x431   : > { %v6943_v24 = vpop.eup %6942  ;;  %v4514_v49 = vadd.f32 1.0, %v6941_v40  ;;  %v5088_v63 = vadd.f32 %v5056_v43, %v5024_v11  ;;  %v3523_v5 = vadd.f32 %v3522_v58, %v3434_v30  ;;  %v3347_v38 = vadd.f32 %v9790_v47, %v8942_v41 }
 0x432   : > { %v4770_v8 = vmul.f32 %v6943_v24, %v9300_v17  ;;  %v4301_v15 = vadd.f32 %v4300_v39, %v4212_v26  ;;  %vm4775_vm2 = vweird.f32 %v6943_v24 }
 0x433   : > { %6944 = vrcp.f32 %v4514_v49  ;;  %v6599_v14 = vpack.c.bf16 %v5088_v63, %v5087_v44  ;;  %vm9326_vm15 = vmor %vm4774_vm5, %vm4775_vm2  ;;  %v4795_v27 = vand.u32 2147483648, %v4514_v49  ;;  %v4793_v54 = vand.u32 2147483647, %v4514_v49 }
 0x434   : > { %v4771_v34 = vsub.f32 1.0, %v4770_v8  ;;  %6946 = vpow2.f32 %v6300_v9  ;;  %v4352_v31 = vadd.f32 %v4301_v15, %v3520_v59  ;;  %vm4789_vm13 = vweird.f32 %v4514_v49 }
 0x435   : > { %6647 = vst [vmem:[%s9060_s30 + $0x38] sm:$0xff] %v6599_v14   ;;  %v4125_v12 = vpop.f32.mrf.mxu3  ;;  %v4796_v19 = vor.u32 1.1754944e-38, %v4795_v27  ;;  %v5058_v44 = vunpack.c.h.bf16 %v295_v2  ;;  %vm4794_vm6 = vcmp.eq.f32.partialorder %v4793_v54, 8.507059e+37  ;;  %v3436_v41 = vadd.f32 %v8908_v33, %v3347_v38 }
 0x436   : > { %v4772_v0 = vmul.f32 %v6943_v24, %v4771_v34  ;;  %v9322_v22 = vadd.f32 %v9274_v53, %v4352_v31 }
 0x437   : > { %v4214_v17 = vpop.f32.mrf.mxu0  ;;  %v4303_v55 = vpop.f32.mrf.mxu1 }
 0x438   : > { %v4773_v20 = vadd.f32 %v6943_v24, %v4772_v0  ;;  %v6301_v23 = vmul.f32 -1.442695, %v9322_v22  ;;  %v4215_v11 = vadd.f32 %v4214_v17, %v4125_v12  ;;  %v3524_v39 = vpop.f32.mrf.mxu2 }
 0x439   : > { %v6945_v13 = vpop.eup %6944  ;;  %v3525_v56 = vadd.f32 %v3524_v39, %v3436_v41 }
 0x43a   : > { %v4785_v25 = vmul.f32 %v6945_v13, %v4514_v49  ;;  %v6947_v10 = vpop.eup %6946  ;;  %v4777_v16 = vsel %vm9326_vm15, %v6943_v24, %v4773_v20  ;;  %vm4790_vm9 = vweird.f32 %v6945_v13  ;;  %6948 = vpow2.f32 %v6301_v23 }
 0x43b   : > { %v9333_v43 = vadd.f32 1.0, %v6947_v10  ;;  %v4782_v28 = vsel %vm4779_vm4, %v4781_v35, %v4777_v16  ;;  %v5057_v24 = vunpack.c.l.bf16 %v295_v2  ;;  %vm4791_vm8 = vmor %vm4789_vm13, %vm4790_vm9  ;;  %v4304_v29 = vadd.f32 %v4303_v55, %v4215_v11  ;;  %v9791_v35 = vld [vmem:[#allocation46_spill] sm:$0xff] }
 0x43c   : > { %v4786_v48 = vsub.f32 1.0, %v4785_v25  ;;  %v5025_v63 = vmul.f32 %v4782_v28, %v9277_v18  ;;  %v3350_v27 = vadd.f32 %v9791_v35, %v8950_v32 }
 0x43d   : > { %6950 = vrcp.f32 %v9333_v43  ;;  %v4353_v9 = vadd.f32 %v4304_v29, %v3523_v5  ;;  %v4127_v20 = vpop.f32.mrf.mxu3  ;;  %v4810_v33 = vand.u32 2147483648, %v9333_v43  ;;  %vm4804_vm11 = vweird.f32 %v9333_v43  ;;  %v297_v5 = vld [vmem:[%s7315_s28 + $0x48] sm:$0xff]  }
 0x43e   : > { %v4787_v36 = vmul.f32 %v6945_v13, %v4786_v48  ;;  %v5089_v59 = vadd.f32 %v5057_v24, %v5025_v63  ;;  %v4808_v48 = vand.u32 2147483647, %v9333_v43 }
 0x43f   : > { %v9344_v18 = vadd.f32 %v9274_v53, %v4353_v9  ;;  %v4216_v31 = vpop.f32.mrf.mxu0  ;;  %v4305_v25 = vpop.f32.mrf.mxu1  ;;  %v4811_v55 = vor.u32 1.1754944e-38, %v4810_v33 }
 0x440   : > { %v4788_v40 = vadd.f32 %v6945_v13, %v4787_v36  ;;  %v6949_v14 = vpop.eup %6948  ;;  %v4217_v21 = vadd.f32 %v4216_v31, %v4127_v20  ;;  %v3527_v54 = vpop.f32.mrf.mxu2  ;;  %vm4809_vm10 = vcmp.eq.f32.partialorder %v4808_v48, 8.507059e+37 }
 0x441   : > { %v4516_v26 = vadd.f32 1.0, %v6949_v14 }
 0x442   : > { %v4792_v8 = vsel %vm4791_vm8, %v6945_v13, %v4788_v40  ;;  %v4306_v52 = vadd.f32 %v4305_v25, %v4217_v21 }
 0x443   : > { %v4797_v45 = vsel %vm4794_vm6, %v4796_v19, %v4792_v8  ;;  %v6951_v49 = vpop.eup %6950  ;;  %6952 = vrcp.f32 %v4516_v26  ;;  %v4825_v40 = vand.u32 2147483648, %v4516_v26  ;;  %v4823_v24 = vand.u32 2147483647, %v4516_v26 }
 0x444   : > { %v5026_v34 = vmul.f32 %v4797_v45, %v9288_v3  ;;  %v4800_v15 = vmul.f32 %v6951_v49, %v9333_v43  ;;  %v6302_v3 = vmul.f32 -1.442695, %v9344_v18  ;;  %vm4805_vm14 = vweird.f32 %v6951_v49 }
 0x445   : > { %v4354_v58 = vadd.f32 %v4306_v52, %v3525_v56  ;;  %vm9357_vm7 = vmor %vm4804_vm11, %vm4805_vm14  ;;  %v4130_v19 = vpop.f32.mrf.mxu3  ;;  %vm4819_vm12 = vweird.f32 %v4516_v26  ;;  %v5059_v45 = vunpack.c.l.bf16 %v297_v5  ;;  %v4826_v14 = vor.u32 1.1754944e-38, %v4825_v40 }
 0x446   : > { %v5090_v0 = vadd.f32 %v5058_v44, %v5026_v34  ;;  %v4801_v46 = vsub.f32 1.0, %v4800_v15  ;;  %6954 = vpow2.f32 %v6302_v3  ;;  %v3439_v44 = vadd.f32 %v8924_v61, %v3350_v27 }
 0x447   : > { %v9353_v17 = vadd.f32 %v9274_v53, %v4354_v58  ;;  %v4219_v43 = vpop.f32.mrf.mxu0  ;;  %v4308_v8 = vpop.f32.mrf.mxu1  ;;  %v5060_v34 = vunpack.c.h.bf16 %v297_v5  ;;  %vm4824_vm3 = vcmp.eq.f32.partialorder %v4823_v24, 8.507059e+37 }
 0x448   : > { %v6604_v13 = vpack.c.bf16 %v5090_v0, %v5089_v59  ;;  %v4802_v42 = vmul.f32 %v6951_v49, %v4801_v46  ;;  %v4220_v47 = vadd.f32 %v4219_v43, %v4130_v19  ;;  %v3528_v38 = vadd.f32 %v3527_v54, %v3439_v44  ;;  %v9794_v59 = vld [vmem:[#allocation49_spill] sm:$0xff] }
 0x449   : > { %v6953_v16 = vpop.eup %6952  ;;  %v6303_v28 = vmul.f32 -1.442695, %v9353_v17  ;;  %v3352_v61 = vadd.f32 %v9794_v59, %v8956_v1 }
 0x44a   : > { %6648 = vst [vmem:[%s9060_s30 + $0x40] sm:$0xff] %v6604_v13   ;;  %v4803_v10 = vadd.f32 %v6951_v49, %v4802_v42  ;;  %v4815_v23 = vmul.f32 %v6953_v16, %v4516_v26  ;;  %vm4820_vm1 = vweird.f32 %v6953_v16  ;;  %v4309_v39 = vadd.f32 %v4308_v8, %v4220_v47  ;;  %v3529_v13 = vpop.f32.mrf.mxu2 }
 0x44b   : > { %6956 = vpow2.f32 %v6303_v28  ;;  %vm4821_vm0 = vmor %vm4819_vm12, %vm4820_vm1  ;;  %v3441_v1 = vadd.f32 %v8938_v6, %v3352_v61 }
 0x44c   : > { %v6955_v36 = vpop.eup %6954  ;;  %v4807_v12 = vsel %vm9357_vm7, %v6951_v49, %v4803_v10  ;;  %v4816_v30 = vsub.f32 1.0, %v4815_v23  ;;  %v4355_v31 = vadd.f32 %v4309_v39, %v3528_v38 }
 0x44d   : > { %v9364_v11 = vadd.f32 1.0, %v6955_v36  ;;  %v4812_v63 = vsel %vm4809_vm10, %v4811_v55, %v4807_v12  ;;  %v4132_v25 = vpop.f32.mrf.mxu3  ;;  %v9795_v12 = vld [vmem:[#allocation53_spill] sm:$0xff] }
 0x44e   : > { %v4817_v32 = vmul.f32 %v6953_v16, %v4816_v30  ;;  %v5027_v9 = vmul.f32 %v4812_v63, %v9313_v4  ;;  %v9375_v4 = vadd.f32 %v9274_v53, %v4355_v31  ;;  %v3355_v30 = vadd.f32 %v9795_v12, %v8964_v50  ;;  %v299_v63 = vld [vmem:[%s7315_s28 + $0x50] sm:$0xff]  }
 0x44f   : > { %6958 = vrcp.f32 %v9364_v11  ;;  %v4221_v56 = vpop.f32.mrf.mxu0  ;;  %v4310_v58 = vpop.f32.mrf.mxu1  ;;  %v4838_v2 = vand.u32 2147483647, %v9364_v11  ;;  %v4840_v6 = vand.u32 2147483648, %v9364_v11  ;;  %vm4834_vm5 = vweird.f32 %v9364_v11 }
 0x450   : > { %v4818_v29 = vadd.f32 %v6953_v16, %v4817_v32  ;;  %v5091_v46 = vadd.f32 %v5059_v45, %v5027_v9  ;;  %v4222_v10 = vadd.f32 %v4221_v56, %v4132_v25  ;;  %v3444_v47 = vadd.f32 %v8948_v62, %v3355_v30  ;;  %v9799_v30 = vld [vmem:[#allocation61_spill] sm:$0xff] }
 0x451   : > { %v6957_v15 = vpop.eup %6956  ;;  %vm4839_vm4 = vcmp.eq.f32.partialorder %v4838_v2, 8.507059e+37  ;;  %v4841_v24 = vor.u32 1.1754944e-38, %v4840_v6  ;;  %v5062_v59 = vunpack.c.h.bf16 %v299_v63  ;;  %v3360_v28 = vadd.f32 %v9799_v30, %v8976_v51  ;;  %v9805_v30 = vld [vmem:[#allocation66_spill] sm:$0xff] }
 0x452   : > { %v4822_v49 = vsel %vm4821_vm0, %v6953_v16, %v4818_v29  ;;  %v4518_v41 = vadd.f32 1.0, %v6957_v15  ;;  %v3530_v16 = vadd.f32 %v3529_v13, %v3441_v1  ;;  %v4311_v33 = vadd.f32 %v4310_v58, %v4222_v10  ;;  %v3532_v55 = vpop.f32.mrf.mxu2 }
 0x453   : > { %v4827_v0 = vsel %vm4824_vm3, %v4826_v14, %v4822_v49  ;;  %v3533_v9 = vadd.f32 %v3532_v55, %v3444_v47  ;;  %v5061_v49 = vunpack.c.l.bf16 %v299_v63  ;;  %v3449_v47 = vadd.f32 %v8966_v60, %v3360_v28 }
 0x454   : > { %v5028_v20 = vmul.f32 %v4827_v0, %v9322_v22  ;;  %6960 = vrcp.f32 %v4518_v41  ;;  %v6304_v22 = vmul.f32 -1.442695, %v9375_v4  ;;  %v4356_v35 = vadd.f32 %v4311_v33, %v3530_v16 }
 0x455   : > { %v6959_v26 = vpop.eup %6958  ;;  %v4855_v19 = vand.u32 2147483648, %v4518_v41  ;;  %v4853_v8 = vand.u32 2147483647, %v4518_v41  ;;  %v4135_v29 = vpop.f32.mrf.mxu3  ;;  %vm4849_vm13 = vweird.f32 %v4518_v41 }
 0x456   : > { %v5092_v3 = vadd.f32 %v5060_v34, %v5028_v20  ;;  %v4830_v21 = vmul.f32 %v6959_v26, %v9364_v11  ;;  %6962 = vpow2.f32 %v6304_v22  ;;  %vm4835_vm2 = vweird.f32 %v6959_v26  ;;  %v9798_v20 = vld [vmem:[#allocation57_spill] sm:$0xff] }
 0x457   : > { %v9384_v54 = vadd.f32 %v9274_v53, %v4356_v35  ;;  %vm9388_vm15 = vmor %vm4834_vm5, %vm4835_vm2  ;;  %v4224_v11 = vpop.f32.mrf.mxu0  ;;  %v4313_v45 = vpop.f32.mrf.mxu1  ;;  %v4856_v39 = vor.u32 1.1754944e-38, %v4855_v19  ;;  %vm4854_vm6 = vcmp.eq.f32.partialorder %v4853_v8, 8.507059e+37  ;;  %v3357_v62 = vadd.f32 %v9798_v20, %v8970_v7  ;;  %v9802_v20 = vld [vmem:[#allocation63_spill] sm:$0xff] }
 0x458   : > { %v6609_v42 = vpack.c.bf16 %v5092_v3, %v5091_v46  ;;  %v4831_v52 = vsub.f32 1.0, %v4830_v21  ;;  %v4225_v34 = vadd.f32 %v4224_v11, %v4135_v29  ;;  %v3362_v60 = vadd.f32 %v9802_v20, %v8982_v57 }
 0x459   : > { %v6305_v32 = vmul.f32 -1.442695, %v9384_v54  ;;  %v3446_v7 = vadd.f32 %v8958_v37, %v3357_v62 }
 0x45a   : > { %6649 = vst [vmem:[%s9060_s30 + $0x48] sm:$0xff] %v6609_v42   ;;  %v4832_v48 = vmul.f32 %v6959_v26, %v4831_v52  ;;  %v6961_v27 = vpop.eup %6960  ;;  %v4314_v15 = vadd.f32 %v4313_v45, %v4225_v34  ;;  %v3534_v21 = vpop.f32.mrf.mxu2 }
 0x45b   : > { %v4845_v36 = vmul.f32 %v6961_v27, %v4518_v41  ;;  %vm4850_vm9 = vweird.f32 %v6961_v27  ;;  %6964 = vpow2.f32 %v6305_v32 }
 0x45c   : > { %v4833_v23 = vadd.f32 %v6959_v26, %v4832_v48  ;;  %v6963_v43 = vpop.eup %6962  ;;  %vm4851_vm8 = vmor %vm4849_vm13, %vm4850_vm9  ;;  %v4357_v46 = vadd.f32 %v4314_v15, %v3533_v9  ;;  %v3535_v48 = vadd.f32 %v3534_v21, %v3446_v7 }
 0x45d   : > { %v4846_v5 = vsub.f32 1.0, %v4845_v36  ;;  %v9395_v44 = vadd.f32 1.0, %v6963_v43  ;;  %v4137_v42 = vpop.f32.mrf.mxu3  ;;  %v9813_v43 = vld [vmem:[#allocation68_spill] sm:$0xff] }
 0x45e   : > { %v4837_v40 = vsel %vm9388_vm15, %v6959_v26, %v4833_v23 }
 0x45f   : > { %v4847_v50 = vmul.f32 %v6961_v27, %v4846_v5  ;;  %v4842_v38 = vsel %vm4839_vm4, %v4841_v24, %v4837_v40  ;;  %6966 = vrcp.f32 %v9395_v44  ;;  %v4226_v52 = vpop.f32.mrf.mxu0  ;;  %v4315_v16 = vpop.f32.mrf.mxu1  ;;  %v4868_v6 = vand.u32 2147483647, %v9395_v44 }
 0x460   : > { %v5029_v61 = vmul.f32 %v4842_v38, %v9344_v18  ;;  %v9406_v18 = vadd.f32 %v9274_v53, %v4357_v46  ;;  %v4227_v58 = vadd.f32 %v4226_v52, %v4137_v42  ;;  %v4870_v37 = vand.u32 2147483648, %v9395_v44  ;;  %v9803_v52 = vld [vmem:[#allocation39_spill] sm:$0xff] }
 0x461   : > { %v4848_v14 = vadd.f32 %v6961_v27, %v4847_v50  ;;  %v6965_v26 = vpop.eup %6964  ;;  %vm4864_vm11 = vweird.f32 %v9395_v44  ;;  %vm4869_vm10 = vcmp.eq.f32.partialorder %v4868_v6, 8.507059e+37  ;;  %v301_v50 = vld [vmem:[%s7315_s28 + $0x58] sm:$0xff]   ;;  %v3451_v57 = vadd.f32 %v9803_v52, %v3362_v60 }
 0x462   : > { %v4520_v3 = vadd.f32 1.0, %v6965_v26  ;;  %v5093_v25 = vadd.f32 %v5061_v49, %v5029_v61  ;;  %v4316_v23 = vadd.f32 %v4315_v16, %v4227_v58  ;;  %v3537_v40 = vpop.f32.mrf.mxu2  ;;  %v4871_v19 = vor.u32 1.1754944e-38, %v4870_v37  ;;  %v9809_v60 = vld [vmem:[#allocation40_spill] sm:$0xff] }
 0x463   : > { %v4852_v0 = vsel %vm4851_vm8, %v6961_v27, %v4848_v14  ;;  %v3538_v9 = vadd.f32 %v3537_v40, %v3449_v47  ;;  %v5063_v49 = vunpack.c.l.bf16 %v301_v50  ;;  %v9808_v47 = vld [vmem:[#allocation15_spill] sm:$0xff] }
 0x464   : > { %v4857_v31 = vsel %vm4854_vm6, %v4856_v39, %v4852_v0  ;;  %6968 = vrcp.f32 %v4520_v3  ;;  %v4358_v27 = vadd.f32 %v4316_v23, %v3535_v48  ;;  %v4883_v8 = vand.u32 2147483647, %v4520_v3 }
 0x465   : > { %v5030_v13 = vmul.f32 %v4857_v31, %v9353_v17  ;;  %v6967_v41 = vpop.eup %6966  ;;  %v6306_v17 = vmul.f32 -1.442695, %v9406_v18  ;;  %v4140_v29 = vpop.f32.mrf.mxu3  ;;  %vm4879_vm12 = vweird.f32 %v4520_v3 }
 0x466   : > { %v4860_v1 = vmul.f32 %v6967_v41, %v9395_v44  ;;  %vm4865_vm14 = vweird.f32 %v6967_v41  ;;  %v9415_v12 = vadd.f32 %v9274_v53, %v4358_v27  ;;  %v4885_v44 = vand.u32 2147483648, %v4520_v3 }
 0x467   : > { %v5094_v56 = vadd.f32 %v5062_v59, %v5030_v13  ;;  %6970 = vpow2.f32 %v6306_v17  ;;  %vm9419_vm7 = vmor %vm4864_vm11, %vm4865_vm14  ;;  %v4229_v24 = vpop.f32.mrf.mxu0  ;;  %v4318_v45 = vpop.f32.mrf.mxu1  ;;  %v5064_v59 = vunpack.c.h.bf16 %v301_v50  ;;  %vm4884_vm3 = vcmp.eq.f32.partialorder %v4883_v8, 8.507059e+37  ;;  %v303_v50 = vld [vmem:[%s7315_s28 + $0x60] sm:$0xff]  }
 0x468   : > { %v4861_v10 = vsub.f32 1.0, %v4860_v1  ;;  %v6307_v11 = vmul.f32 -1.442695, %v9415_v12  ;;  %v4230_v34 = vadd.f32 %v4229_v24, %v4140_v29  ;;  %v4886_v39 = vor.u32 1.1754944e-38, %v4885_v44 }
 0x469   : > { %v6614_v22 = vpack.c.bf16 %v5094_v56, %v5093_v25 }
 0x46a   : > { %v4862_v33 = vmul.f32 %v6967_v41, %v4861_v10  ;;  %v6969_v2 = vpop.eup %6968  ;;  %6972 = vpow2.f32 %v6307_v11  ;;  %v4319_v15 = vadd.f32 %v4318_v45, %v4230_v34 }
 0x46b   : > { %6650 = vst [vmem:[%s9060_s30 + $0x50] sm:$0xff] %v6614_v22   ;;  %v4875_v36 = vmul.f32 %v6969_v2, %v4520_v3  ;;  %vm4880_vm1 = vweird.f32 %v6969_v2  ;;  %v3539_v3 = vpop.f32.mrf.mxu2 }
 0x46c   : > { %v4863_v35 = vadd.f32 %v6967_v41, %v4862_v33  ;;  %vm4881_vm0 = vmor %vm4879_vm12, %vm4880_vm1  ;;  %v4359_v13 = vadd.f32 %v4319_v15, %v3538_v9  ;;  %v3540_v58 = vadd.f32 %v3539_v3, %v3451_v57 }
 0x46d   : > { %v6971_v55 = vpop.eup %6970  ;;  %v4876_v32 = vsub.f32 1.0, %v4875_v36  ;;  %v4142_v1 = vpop.f32.mrf.mxu3  ;;  %v9804_v36 = vld [vmem:[#allocation45_spill] sm:$0xff] }
 0x46e   : > { %v4867_v5 = vsel %vm9419_vm7, %v6967_v41, %v4863_v35  ;;  %v9426_v63 = vadd.f32 1.0, %v6971_v55  ;;  %v3365_v28 = vadd.f32 %v9805_v30, %v9804_v36 }
 0x46f   : > { %v4877_v51 = vmul.f32 %v6969_v2, %v4876_v32  ;;  %v4872_v38 = vsel %vm4869_vm10, %v4871_v19, %v4867_v5  ;;  %v4231_v42 = vpop.f32.mrf.mxu0  ;;  %v4320_v17 = vpop.f32.mrf.mxu1 }
 0x470   : > { %6974 = vrcp.f32 %v9426_v63  ;;  %v5031_v61 = vmul.f32 %v4872_v38, %v9375_v4  ;;  %v6973_v31 = vpop.eup %6972  ;;  %v9437_v4 = vadd.f32 %v9274_v53, %v4359_v13  ;;  %v4232_v10 = vadd.f32 %v4231_v42, %v4142_v1 }
 0x471   : > { %v4878_v14 = vadd.f32 %v6969_v2, %v4877_v51  ;;  %v4522_v41 = vadd.f32 1.0, %v6973_v31  ;;  %v4898_v27 = vand.u32 2147483647, %v9426_v63  ;;  %vm4894_vm5 = vweird.f32 %v9426_v63 }
 0x472   : > { %v5095_v21 = vadd.f32 %v5063_v49, %v5031_v61  ;;  %v4321_v48 = vadd.f32 %v4320_v17, %v4232_v10  ;;  %v3454_v38 = vadd.f32 %v9808_v47, %v3365_v28  ;;  %v5066_v61 = vunpack.c.h.bf16 %v303_v50  ;;  %v9812_v28 = vld [vmem:[#allocation42_spill] sm:$0xff] }
 0x473   : > { %v4882_v0 = vsel %vm4881_vm0, %v6969_v2, %v4878_v14  ;;  %6976 = vrcp.f32 %v4522_v41  ;;  %v4900_v2 = vand.u32 2147483648, %v9426_v63  ;;  %v3542_v40 = vpop.f32.mrf.mxu2  ;;  %vm4899_vm4 = vcmp.eq.f32.partialorder %v4898_v27, 8.507059e+37 }
 0x474   : > { %v4887_v62 = vsel %vm4884_vm3, %v4886_v39, %v4882_v0  ;;  %v4360_v23 = vadd.f32 %v4321_v48, %v3540_v58  ;;  %v4915_v44 = vand.u32 2147483648, %v4522_v41  ;;  %v4913_v8 = vand.u32 2147483647, %v4522_v41 }
 0x475   : > { %v5032_v26 = vmul.f32 %v4887_v62, %v9384_v54  ;;  %v6308_v54 = vmul.f32 -1.442695, %v9437_v4  ;;  %v4901_v19 = vor.u32 1.1754944e-38, %v4900_v2  ;;  %v4145_v29 = vpop.f32.mrf.mxu3  ;;  %vm4909_vm13 = vweird.f32 %v4522_v41  ;;  %v9810_v62 = vld [vmem:[#allocation67_spill] sm:$0xff] }
 0x476   : > { %v6975_v46 = vpop.eup %6974  ;;  %v9446_v37 = vadd.f32 %v9274_v53, %v4360_v23  ;;  %v3543_v49 = vadd.f32 %v3542_v40, %v3454_v38  ;;  %v5065_v39 = vunpack.c.l.bf16 %v303_v50  ;;  %vm4914_vm6 = vcmp.eq.f32.partialorder %v4913_v8, 8.507059e+37  ;;  %v9816_v38 = vld [vmem:[#allocation18_spill] sm:$0xff] }
 0x477   : > { %v5096_v25 = vadd.f32 %v5064_v59, %v5032_v26  ;;  %v4890_v56 = vmul.f32 %v6975_v46, %v9426_v63  ;;  %6978 = vpow2.f32 %v6308_v54  ;;  %vm4895_vm2 = vweird.f32 %v6975_v46  ;;  %v4234_v24 = vpop.f32.mrf.mxu0  ;;  %v4323_v14 = vpop.f32.mrf.mxu1 }
 0x478   : > { %vm9450_vm15 = vmor %vm4894_vm5, %vm4895_vm2  ;;  %v6309_v11 = vmul.f32 -1.442695, %v9446_v37  ;;  %v4235_v9 = vadd.f32 %v4234_v24, %v4145_v29  ;;  %v4916_v59 = vor.u32 1.1754944e-38, %v4915_v44  ;;  %v3367_v31 = vadd.f32 %v9810_v62, %v9809_v60 }
 0x479   : > { %v6619_v7 = vpack.c.bf16 %v5096_v25, %v5095_v21  ;;  %v4891_v22 = vsub.f32 1.0, %v4890_v56  ;;  %v6977_v35 = vpop.eup %6976 }
 0x47a   : > { %v4905_v6 = vmul.f32 %v6977_v35, %v4522_v41  ;;  %vm4910_vm9 = vweird.f32 %v6977_v35  ;;  %6980 = vpow2.f32 %v6309_v11  ;;  %v4324_v20 = vadd.f32 %v4323_v14, %v4235_v9 }
 0x47b   : > { %6651 = vst [vmem:[%s9060_s30 + $0x58] sm:$0xff] %v6619_v7   ;;  %v4892_v16 = vmul.f32 %v6975_v46, %v4891_v22  ;;  %vm4911_vm8 = vmor %vm4909_vm13, %vm4910_vm9  ;;  %v3544_v25 = vpop.f32.mrf.mxu2  ;;  %v9811_v7 = vld [vmem:[#allocation16_spill] sm:$0xff] }
 0x47c   : > { %v4906_v32 = vsub.f32 1.0, %v4905_v6  ;;  %v4361_v3 = vadd.f32 %v4324_v20, %v3543_v49  ;;  %v3456_v22 = vadd.f32 %v9811_v7, %v3367_v31  ;;  %v9817_v31 = vld [vmem:[#allocation44_spill] sm:$0xff] }
 0x47d   : > { %v4893_v33 = vadd.f32 %v6975_v46, %v4892_v16  ;;  %v6979_v55 = vpop.eup %6978  ;;  %v4147_v52 = vpop.f32.mrf.mxu3  ;;  %v9819_v7 = vld [vmem:[#allocation20_spill] sm:$0xff] }
 0x47e   : > { %v9457_v63 = vadd.f32 1.0, %v6979_v55  ;;  %v4907_v51 = vmul.f32 %v6977_v35, %v4906_v32  ;;  %v3545_v16 = vadd.f32 %v3544_v25, %v3456_v22  ;;  %v3370_v55 = vadd.f32 %v9813_v43, %v9812_v28 }
 0x47f   : > { %v4897_v5 = vsel %vm9450_vm15, %v6975_v46, %v4893_v33  ;;  %v4236_v57 = vpop.f32.mrf.mxu0  ;;  %v4325_v58 = vpop.f32.mrf.mxu1 }
 0x480   : > { %v4902_v45 = vsel %vm4899_vm4, %v4901_v19, %v4897_v5  ;;  %6982 = vrcp.f32 %v9457_v63  ;;  %v4908_v34 = vadd.f32 %v6977_v35, %v4907_v51  ;;  %v6981_v13 = vpop.eup %6980  ;;  %v4237_v17 = vadd.f32 %v4236_v57, %v4147_v52  ;;  %v305_v51 = vld [vmem:[%s7315_s28 + $0x68] sm:$0xff]  }
 0x481   : > { %v5033_v0 = vmul.f32 %v4902_v45, %v9406_v18  ;;  %v4524_v21 = vadd.f32 1.0, %v6981_v13  ;;  %v9468_v18 = vadd.f32 %v9274_v53, %v4361_v3  ;;  %v4928_v2 = vand.u32 2147483647, %v9457_v63 }
 0x482   : > { %v4912_v15 = vsel %vm4911_vm8, %v6977_v35, %v4908_v34  ;;  %v4326_v33 = vadd.f32 %v4325_v58, %v4237_v17  ;;  %v4930_v6 = vand.u32 2147483648, %v9457_v63  ;;  %vm4924_vm11 = vweird.f32 %v9457_v63 }
 0x483   : > { %v4917_v26 = vsel %vm4914_vm6, %v4916_v59, %v4912_v15  ;;  %v5097_v56 = vadd.f32 %v5065_v39, %v5033_v0  ;;  %6984 = vrcp.f32 %v4524_v21  ;;  %v3547_v32 = vpop.f32.mrf.mxu2  ;;  %vm4929_vm10 = vcmp.eq.f32.partialorder %v4928_v2, 8.507059e+37 }
 0x484   : > { %v5034_v46 = vmul.f32 %v4917_v26, %v9415_v12  ;;  %v6310_v12 = vmul.f32 -1.442695, %v9468_v18  ;;  %v4362_v35 = vadd.f32 %v4326_v33, %v3545_v16  ;;  %v4931_v44 = vor.u32 1.1754944e-38, %v4930_v6  ;;  %v9818_v26 = vld [vmem:[#allocation69_spill] sm:$0xff] }
 0x485   : > { %v4943_v29 = vand.u32 2147483647, %v4524_v21  ;;  %v3459_v45 = vadd.f32 %v9816_v38, %v3370_v55  ;;  %vm4939_vm12 = vweird.f32 %v4524_v21  ;;  %v5068_v15 = vunpack.c.h.bf16 %v305_v51 }
 0x486   : > { %v6983_v41 = vpop.eup %6982  ;;  %v5098_v1 = vadd.f32 %v5066_v61, %v5034_v46  ;;  %6986 = vpow2.f32 %v6310_v12  ;;  %v9477_v30 = vadd.f32 %v9274_v53, %v4362_v35  ;;  %v5067_v61 = vunpack.c.l.bf16 %v305_v51 }
 0x487   : > { %v4920_v42 = vmul.f32 %v6983_v41, %v9457_v63  ;;  %vm4925_vm14 = vweird.f32 %v6983_v41  ;;  %v4945_v63 = vand.u32 2147483648, %v4524_v21  ;;  %v4239_v47 = vpop.f32.mrf.mxu0  ;;  %v3548_v59 = vadd.f32 %v3547_v32, %v3459_v45 }
 0x488   : > { %v6624_v54 = vpack.c.bf16 %v5098_v1, %v5097_v56  ;;  %vm9481_vm7 = vmor %vm4924_vm11, %vm4925_vm14  ;;  %v6311_v19 = vmul.f32 -1.442695, %v9477_v30  ;;  %vm4944_vm3 = vcmp.eq.f32.partialorder %v4943_v29, 8.507059e+37  ;;  %v3372_v13 = vadd.f32 %v9818_v26, %v9817_v31 }
 0x489   : > { %v4921_v10 = vsub.f32 1.0, %v4920_v42  ;;  %v6985_v27 = vpop.eup %6984  ;;  %v4946_v0 = vor.u32 1.1754944e-38, %v4945_v63 }
 0x48a   : > { %6652 = vst [vmem:[%s9060_s30 + $0x60] sm:$0xff] %v6624_v54   ;;  %v4935_v36 = vmul.f32 %v6985_v27, %v4524_v21  ;;  %vm4940_vm1 = vweird.f32 %v6985_v27  ;;  %6988 = vpow2.f32 %v6311_v19  ;;  %v3461_v22 = vadd.f32 %v9819_v7, %v3372_v13 }
 0x48b   : > { %v4922_v48 = vmul.f32 %v6983_v41, %v4921_v10  ;;  %vm4941_vm0 = vmor %vm4939_vm12, %vm4940_vm1  ;;  %v3549_v1 = vpop.f32.mrf.mxu2 }
 0x48c   : > { %v6987_v5 = vpop.eup %6986  ;;  %v4936_v24 = vsub.f32 1.0, %v4935_v36 }
 0x48d   : > { %v4923_v23 = vadd.f32 %v6983_v41, %v4922_v48  ;;  %v9488_v50 = vadd.f32 1.0, %v6987_v5  ;;  %v4150_v9 = vpop.f32.mrf.mxu3  ;;  %v3550_v48 = vadd.f32 %v3549_v1, %v3461_v22 }
 0x48e   : > { %v4937_v8 = vmul.f32 %v6985_v27, %v4936_v24  ;;  %v4328_v34 = vpop.f32.mrf.mxu1  ;;  %v4240_v39 = vadd.f32 %v4239_v47, %v4150_v9 }
 0x48f   : > { %v4927_v11 = vsel %vm9481_vm7, %v6983_v41, %v4923_v23  ;;  %6990 = vrcp.f32 %v9488_v50  ;;  %v4241_v54 = vpop.f32.mrf.mxu0  ;;  %v4958_v6 = vand.u32 2147483647, %v9488_v50  ;;  %v4960_v36 = vand.u32 2147483648, %v9488_v50 }
 0x490   : > { %v4932_v14 = vsel %vm4929_vm10, %v4931_v44, %v4927_v11  ;;  %v4938_v49 = vadd.f32 %v6985_v27, %v4937_v8  ;;  %v4329_v62 = vadd.f32 %v4328_v34, %v4240_v39  ;;  %v6989_v3 = vpop.eup %6988  ;;  %vm4954_vm5 = vweird.f32 %v9488_v50  ;;  %v307_v44 = vld [vmem:[%s7315_s28 + $0x70] sm:$0xff]  }
 0x491   : > { %v5035_v20 = vmul.f32 %v4932_v14, %v9437_v4  ;;  %v4526_v56 = vadd.f32 1.0, %v6989_v3  ;;  %vm4959_vm4 = vcmp.eq.f32.partialorder %v4958_v6, 8.507059e+37  ;;  %v4961_v11 = vor.u32 1.1754944e-38, %v4960_v36 }
 0x492   : > { %v4942_v60 = vsel %vm4941_vm0, %v6985_v27, %v4938_v49  ;;  %v4363_v25 = vadd.f32 %v4329_v62, %v3548_v59  ;;  %v5070_v45 = vunpack.c.h.bf16 %v307_v44 }
 0x493   : > { %v4947_v46 = vsel %vm4944_vm3, %v4946_v0, %v4942_v60  ;;  %v5099_v42 = vadd.f32 %v5067_v61, %v5035_v20  ;;  %6992 = vrcp.f32 %v4526_v56  ;;  %v4975_v24 = vand.u32 2147483648, %v4526_v56 }
 0x494   : > { %v5036_v41 = vmul.f32 %v4947_v46, %v9446_v37  ;;  %v9499_v4 = vadd.f32 %v9274_v53, %v4363_v25  ;;  %v4973_v51 = vand.u32 2147483647, %v4526_v56  ;;  %vm4969_vm13 = vweird.f32 %v4526_v56  ;;  %v309_v25 = vld [vmem:[%s7315_s28 + $0x78] sm:$0xff]   ;;  %s5184_s28 = sshll.u32 %s5181_s24, 4  ;;  %s5185_s28 = int_to_ptr.hbm [resolvable:$true] %s5184_s28 }
 0x495   : > { %v6991_v21 = vpop.eup %6990  ;;  %v4152_v10 = vpop.f32.mrf.mxu3  ;;  %v4976_v29 = vor.u32 1.1754944e-38, %v4975_v24  ;;  %s7109_s11 = sshra.s32 %s5185_s28, 4  ;;  %s7110_s11 = int_to_ptr.hbm [resolvable:$true] %s7109_s11 }
 0x496   : > { %v5100_v52 = vadd.f32 %v5068_v15, %v5036_v41  ;;  %v4950_v57 = vmul.f32 %v6991_v21, %v9488_v50  ;;  %v6312_v37 = vmul.f32 -1.442695, %v9499_v4  ;;  %v4242_v58 = vadd.f32 %v4241_v54, %v4152_v10  ;;  %v4330_v16 = vpop.f32.mrf.mxu1  ;;  %s7111_s9 = scalar_lea.hbm %s7110_s11, 128  ;;  %p7116_p11 = scmp.lt.s32.totalorder %s7110_s11, %s9558_s5 }
 0x497   : > { %vm4955_vm2 = vweird.f32 %v6991_v21  ;;  %vm4974_vm6 = vcmp.eq.f32.partialorder %v4973_v51, 8.507059e+37  ;;  %v5072_v54 = vunpack.c.h.bf16 %v309_v25  ;;  %p7112_p1 = scmp.ne.s32.totalorder %s7110_s11, %s7111_s9  ;;  %p7117_p2 = scmp.lt.s32.totalorder %s7115_s15, %s7111_s9 }
 0x498   : > { %v6629_v12 = vpack.c.bf16 %v5100_v52, %v5099_v42  ;;  %v4951_v17 = vsub.f32 1.0, %v4950_v57  ;;  %6994 = vpow2.f32 %v6312_v37  ;;  %v4331_v23 = vadd.f32 %v4330_v16, %v4242_v58  ;;  %vm4956_vm15 = vmor %vm4954_vm5, %vm4955_vm2 }
 0x499   : > { %v6993_v2 = vpop.eup %6992  ;;  %v5071_v52 = vunpack.c.l.bf16 %v309_v25  ;;  %p7113_p4 = pnand %p7112_p1, %p7276_p3  ;;  %p7118_p9 = por %p7117_p2, %p7116_p11 }
 0x49a   : > { %6653 = vst [vmem:[%s9060_s30 + $0x68] sm:$0xff] %v6629_v12   ;;  %v4952_v33 = vmul.f32 %v6991_v21, %v4951_v17  ;;  %v4364_v27 = vadd.f32 %v4331_v23, %v3550_v48  ;;  %v4965_v28 = vmul.f32 %v6993_v2, %v4526_v56  ;;  %vm4970_vm9 = vweird.f32 %v6993_v2 }
 0x49b   : > { %vm4971_vm8 = vmor %vm4969_vm13, %vm4970_vm9  ;;  %p7114_p8 = pneg %p7113_p4 }
 0x49c   : > { %v4953_v35 = vadd.f32 %v6991_v21, %v4952_v33  ;;  %v9508_v43 = vadd.f32 %v9274_v53, %v4364_v27  ;;  %v4966_v5 = vsub.f32 1.0, %v4965_v28  ;;  %v5069_v53 = vunpack.c.l.bf16 %v307_v44 }
 0x49d   : > { %p7119_p10 = pnand %p7118_p9, %p7114_p8 }
 0x49e   : > { %v6995_v55 = vpop.eup %6994  ;;  %v4957_v40 = vsel %vm4956_vm15, %v6991_v21, %v4953_v35  ;;  %v6313_v32 = vmul.f32 -1.442695, %v9508_v43  ;;  %v4967_v63 = vmul.f32 %v6993_v2, %v4966_v5 }
 0x49f   : > { %v4527_v19 = vadd.f32 1.0, %v6995_v55  ;;  %v4962_v50 = vsel %vm4959_vm4, %v4961_v11, %v4957_v40 }
 0x4a0   : > { %6996 = vpow2.f32 %v6313_v32  ;;  %v4968_v8 = vadd.f32 %v6993_v2, %v4967_v63  ;;  %v5037_v47 = vmul.f32 %v4962_v50, %v9468_v18 }
 0x4a1   : > { %6998 = vrcp.f32 %v4527_v19  ;;  %v4990_v31 = vand.u32 2147483648, %v4527_v19  ;;  %vm4984_vm11 = vweird.f32 %v4527_v19  ;;  %v4988_v26 = vand.u32 2147483647, %v4527_v19 }
 0x4a2   : > { %v4972_v38 = vsel %vm4971_vm8, %v6993_v2, %v4968_v8  ;;  %v5101_v59 = vadd.f32 %v5069_v53, %v5037_v47 }
 0x4a3   : > { %v4977_v14 = vsel %vm4974_vm6, %v4976_v29, %v4972_v38  ;;  %v4991_v3 = vor.u32 1.1754944e-38, %v4990_v31  ;;  %vm4989_vm10 = vcmp.eq.f32.partialorder %v4988_v26, 8.507059e+37 }
 0x4a4   : > { %v5038_v9 = vmul.f32 %v4977_v14, %v9477_v30 }
 0x4a6   : > { %v6997_v34 = vpop.eup %6996  ;;  %v5102_v61 = vadd.f32 %v5070_v45, %v5038_v9 }
 0x4a7   : > { %v6999_v49 = vpop.eup %6998  ;;  %v4528_v39 = vadd.f32 1.0, %v6997_v34 }
 0x4a8   : > { %v4980_v0 = vmul.f32 %v6999_v49, %v4527_v19  ;;  %v6634_v15 = vpack.c.bf16 %v5102_v61, %v5101_v59  ;;  %vm4985_vm14 = vweird.f32 %v6999_v49 }
 0x4a9   : > { %7000 = vrcp.f32 %v4528_v39  ;;  %vm4986_vm7 = vmor %vm4984_vm11, %vm4985_vm14  ;;  %v5005_v41 = vand.u32 2147483648, %v4528_v39  ;;  %v5003_v56 = vand.u32 2147483647, %v4528_v39  ;;  %vm4999_vm12 = vweird.f32 %v4528_v39 }
 0x4aa   : > { %v4981_v20 = vsub.f32 1.0, %v4980_v0  ;;  %6654 = vst [vmem:[%s9060_s30 + $0x70] sm:$0xff] %v6634_v15  }
 0x4ab   : > { %v5006_v57 = vor.u32 1.1754944e-38, %v5005_v41  ;;  %vm5004_vm3 = vcmp.eq.f32.partialorder %v5003_v56, 8.507059e+37 }
 0x4ac   : > { %v4982_v60 = vmul.f32 %v6999_v49, %v4981_v20 }
 0x4ae   : > { %v4983_v62 = vadd.f32 %v6999_v49, %v4982_v60 }
 0x4af   : > { %v7001_v18 = vpop.eup %7000 }
 0x4b0   : > { %v4995_v13 = vmul.f32 %v7001_v18, %v4528_v39  ;;  %v4987_v30 = vsel %vm4986_vm7, %v6999_v49, %v4983_v62  ;;  %vm5000_vm1 = vweird.f32 %v7001_v18 }
 0x4b1   : > { %v4992_v1 = vsel %vm4989_vm10, %v4991_v3, %v4987_v30  ;;  %vm5001_vm0 = vmor %vm4999_vm12, %vm5000_vm1 }
 0x4b2   : > { %v4996_v46 = vsub.f32 1.0, %v4995_v13  ;;  %v5039_v7 = vmul.f32 %v4992_v1, %v9499_v4 }
 0x4b4   : > { %v4997_v21 = vmul.f32 %v7001_v18, %v4996_v46  ;;  %v5103_v17 = vadd.f32 %v5071_v52, %v5039_v7 }
 0x4b6   : > { %v4998_v42 = vadd.f32 %v7001_v18, %v4997_v21 }
 0x4b8   : > { %v5002_v22 = vsel %vm5001_vm0, %v7001_v18, %v4998_v42 }
 0x4b9   : > { %v5007_v10 = vsel %vm5004_vm3, %v5006_v57, %v5002_v22 }
 0x4ba   : > { %v5040_v12 = vmul.f32 %v5007_v10, %v9508_v43 }
 0x4bc   : > { %v5104_v37 = vadd.f32 %v5072_v54, %v5040_v12 }
 0x4be   : > { %v6639_v58 = vpack.c.bf16 %v5104_v37, %v5103_v17 }
 0x4c0   : > { %6655 = vst [vmem:[%s9060_s30 + $0x78] sm:$0xff] %v6639_v58  }
 0x4c1   : > { %7122 = shalt.err (!%p7119_p10)
}
 0x4c2   : > { %s7172_s8 = smov 64   ;;  %s7173_s30 = smov 4  }
 0x4c3   : > { %6682 = dma.vmem_to_hbm [thread:$0]  (%p7276_p3), %s5183_s22, 2048, %s5185_s28, %s5170_s29, %s7172_s8, %s7172_s8, %s7173_s30  }
 0x4c4 PF: > { %s5199_s7 = sand.u32 1, %s7153_s18   ;;  %p9820_p12 = scmp.ge.s32.totalorder %s7165_s21, 2 }
 0x4c5   : > { %s5200_s26 = scalar_lea.sflag [#allocation5], %s5199_s7 }
 0x4c6   : > { %p6696_p13 = pnand %p9820_p12, %p7239_p6 }
 0x4c8   : > { %p6697_p0 = pneg %p6696_p13 }
 0x4ca   : > { %7148 = dma.done.wait (%p6697_p0), %s5200_s26, 2048  }
 0x4cb   : > { %7150 = vsyncadd (%p6697_p0), %s5200_s26, 4294965248  ;;  %p19_p5 = scmp.ge.s32.totalorder %s7266_s14, 4   ;;  %s9821_s18 = smov %s7157_s19 }
 0x4cc   : > { %s9822_s19 = smov %s7161_s20  ;;  %s9823_s20 = smov %s7282_s23 }
 0x4cd   : > { %s9824_s21 = smov %s7266_s14  ;;  %21 = sbr.rel (!%p19_p5) target bundleno = 6 (0x6), region = 98 }
 0x4d2   :  { %5206 = vsyncpa [#allocation4], 1 }
 0x4d3   :  { %5208 = vsyncpa [#allocation4 + $0x1], 1 }
 0x4d4   :  { %5209 = vsyncpa [#allocation7], 1 }
 0x4d5   :  { %5210 = vsyncpa [#allocation5], 1 }
 0x4d6   :  { %5212 = vsyncpa [#allocation5 + $0x1], 1 }

</bundles_post_ra>
